<compile_context>
chip_gen: v5e
topology: v5e:2x2
jax: 0.10.0
libtpu: 0.0.40
codegen_flags: <defaults>
</compile_context>

<pallas_src>
import functools

import numpy as np
import jax
import jax.numpy as jnp
from jax import lax
from jax.experimental import pallas as pl
from jax.experimental.pallas import tpu as pltpu

IDIM = 512
ODIM = 512
NHEADS = 4
DH = ODIM // NHEADS  # 128


def _nonlocal_kernel(x_ref, mask_ref, w_ref, b_ref, out_ref, attn_ref,
                     *, bb, nseg, compute_dtype, approx_recip):
    # x_ref:    (bb*T, D)      f32 features, batch-flattened (also the residual)
    # mask_ref: (bb, 1, T)     f32 column mask (0 = padded)
    # w_ref:    (D, 3*ODIM)    packed [Wk | Wq | Wv], compute_dtype, grid-resident
    # b_ref:    (1, 3*ODIM)    packed [bk | bq | bv], f32, grid-resident
    # out_ref:  (bb*T, D)      updated_m, batch-flattened
    # attn_ref: (bb, H, T, T)  attention weights
    T = nseg
    x = x_ref[...]                                    # (bb*T, D) f32
    mask = mask_ref[...]                              # (bb, 1, T) f32

    # One fused projection for all batch elements, all heads, all of k/q/v:
    # (bb*T, D) @ (D, 3*ODIM) on the MXU, f32 accumulate.
    proj = jnp.dot(x.astype(compute_dtype), w_ref[...],
                   preferred_element_type=jnp.float32) + b_ref[...]

    scale = jnp.float32(1.0 / (DH ** 0.5))

    for b in range(bb):                               # static loop over fused batch
        rs = slice(b * T, (b + 1) * T)
        kb = proj[rs, :ODIM]                          # (T, ODIM) f32
        qb = proj[rs, ODIM:2 * ODIM]
        vb = proj[rs, 2 * ODIM:]

        # Head-batched scores: stack the four (T, T) score tiles along sublanes.
        s_parts = []
        for h in range(NHEADS):                       # static loop over 4 heads
            cs = slice(h * DH, (h + 1) * DH)
            s_parts.append(lax.dot_general(
                kb[:, cs].astype(compute_dtype), qb[:, cs].astype(compute_dtype),
                (((1,), (1,)), ((), ())),
                preferred_element_type=jnp.float32))  # (T, T) = k @ q^T
        s_all = jnp.concatenate(s_parts, axis=0) * scale           # (H*T, T)

        # Mask hoisted out of the head loop: one compare/select for all heads.
        s_all = jnp.where(mask[b] == 0.0, jnp.float32(-1e9), s_all)

        # One f32 softmax over columns for all 4 heads (single exp / max / sum).
        s_max = jnp.max(s_all, axis=-1, keepdims=True)
        e = jnp.exp(s_all - s_max)
        denom = jnp.sum(e, axis=-1, keepdims=True)
        if approx_recip:
            w_all = e * pl.reciprocal(denom, approx=True)
        else:
            w_all = e / denom                                       # (H*T, T)

        # Per-head AV matmul; write attention + residual directly (no concat).
        for h in range(NHEADS):
            w_h = w_all[h * T:(h + 1) * T, :]                       # (T, T)
            attn_ref[b, h] = w_h
            cs = slice(h * DH, (h + 1) * DH)
            r_h = jnp.dot(w_h.astype(compute_dtype), vb[:, cs].astype(compute_dtype),
                          preferred_element_type=jnp.float32)       # (T, DH)
            # DH=128 slices are lane-tile aligned -> full-lane stores.
            out_ref[rs, cs] = x[rs, cs] + r_h


def nonlocal_block(m_feats, mask, Wv_lin, bv_lin, Wc_lin, bc_lin,
                   *, compute_dtype=jnp.bfloat16, approx_recip=None,
                   block_batch=None):
    """Equivalent of NonLocalBlock.forward. Returns (updated_m, attn_weights)."""
    B, T, D = m_feats.shape
    assert D == IDIM
    H = NHEADS

    if approx_recip is None:
        # EUP approximate reciprocal only on the relaxed-tolerance (bf16) path.
        approx_recip = jnp.dtype(compute_dtype) != jnp.dtype(jnp.float32)

    if block_batch is None:
        # Fuse as many batch elements per grid step as keeps the matmul M
        # dimension within ~256 rows (one MXU pass on v6e/v7x); must divide B.
        bb = 1
        for cand in range(1, B + 1):
            if B % cand == 0 and cand * T <= 256:
                bb = cand
        block_batch = bb
    assert B % block_batch == 0
    num_blocks = B // block_batch

    x_flat = m_feats.reshape(B * T, D).astype(jnp.float32)
    mask_f = mask.astype(jnp.float32).reshape(B, 1, T)

    # PyTorch Linear: y = x @ W.T + b, W is [out, in].
    # Pack [Wk | Wq | Wv] into one (D, 3*ODIM) matrix (single wide matmul);
    # shipped in compute_dtype (bf16 by default -> half the weight DMA bytes).
    wk = Wv_lin.T                         # (D, ODIM)  -> m_k
    wq = Wc_lin.T[:, :ODIM]               # (D, ODIM)  -> m_q
    wv = Wc_lin.T[:, ODIM:]               # (D, ODIM)  -> m_v
    w_pack = jnp.concatenate([wk, wq, wv], axis=1).astype(compute_dtype)
    b_pack = jnp.concatenate([bv_lin, bc_lin[:ODIM], bc_lin[ODIM:]]
                             ).reshape(1, 3 * ODIM).astype(jnp.float32)

    kernel = functools.partial(_nonlocal_kernel,
                               bb=block_batch, nseg=T,
                               compute_dtype=compute_dtype,
                               approx_recip=approx_recip)

    grid = (num_blocks,)
    in_specs = [
        pl.BlockSpec((block_batch * T, D), lambda i: (i, 0)),      # features (flat)
        pl.BlockSpec((block_batch, 1, T),  lambda i: (i, 0, 0)),   # mask
        pl.BlockSpec((D, 3 * ODIM),        lambda i: (0, 0)),      # packed weights (resident)
        pl.BlockSpec((1, 3 * ODIM),        lambda i: (0, 0)),      # packed biases  (resident)
    ]
    out_specs = [
        pl.BlockSpec((block_batch * T, D),        lambda i: (i, 0)),        # updated_m (flat)
        pl.BlockSpec((block_batch, H, T, T),      lambda i: (i, 0, 0, 0)),  # attention
    ]
    out_shapes = (
        jax.ShapeDtypeStruct((B * T, D), jnp.float32),
        jax.ShapeDtypeStruct((B, H, T, T), jnp.float32),
    )

    # Only shard across TensorCores when there are enough grid steps to
    # amortize the per-core weight copy (review item: megacore is net-negative
    # at this size; with a single fused step there is nothing to shard anyway).
    semantics = ("parallel",) if num_blocks > 2 else ("arbitrary",)

    updated_flat, attn = pl.pallas_call(
        kernel,
        out_shape=out_shapes,
        grid_spec=pltpu.PrefetchScalarGridSpec(
            num_scalar_prefetch=0, grid=grid,
            in_specs=in_specs, out_specs=out_specs),
        compiler_params=pltpu.CompilerParams(
            dimension_semantics=semantics),
    )(x_flat, mask_f, w_pack, b_pack)
    return updated_flat.reshape(B, T, D), attn


def ref_forward(x, mask, Wv_lin, bv_lin, Wc_lin, bc_lin):
    """Pure-JAX reference matching the PyTorch forward (dropout p=0.0 is identity)."""
    mask = mask.astype(jnp.float32)
    m_k = x @ Wv_lin.T + bv_lin
    m_trans = x @ Wc_lin.T + bc_lin
    m_q, m_v = m_trans[..., :ODIM], m_trans[..., ODIM:]
    r_list, w_list = [], []
    for h in range(NHEADS):
        sl = slice(h * DH, (h + 1) * DH)
        k, q, v = m_k[..., sl], m_q[..., sl], m_v[..., sl]
        s = jnp.einsum('btd,bsd->bts', k, q) / (DH ** 0.5)
        s = jnp.where(mask[:, None, :] == 0, -1e9, s)
        w = jax.nn.softmax(s, axis=-1)
        w_list.append(w)
        r_list.append(jnp.einsum('bts,bsd->btd', w, v))
    r = jnp.concatenate(r_list, axis=-1)
    return x + r, jnp.stack(w_list, axis=1)


if __name__ == "__main__":
    key = jax.random.PRNGKey(0)
    k0, k1, k2, k3, k4 = jax.random.split(key, 5)

    B, T = 2, 8  # small nseg; idim/odim fixed at 512 by the module
    m_feats = jax.random.normal(k0, (B, T, IDIM), dtype=jnp.float32)
    Wc_lin = jax.random.normal(k1, (2 * ODIM, IDIM), dtype=jnp.float32) * 0.02
    bc_lin = jax.random.normal(k2, (2 * ODIM,), dtype=jnp.float32) * 0.02
    Wv_lin = jax.random.normal(k3, (ODIM, IDIM), dtype=jnp.float32) * 0.02
    bv_lin = jax.random.normal(k4, (ODIM,), dtype=jnp.float32) * 0.02

    # variable-length mask (1 = valid, 0 = padded)
    lengths = jnp.array([T, 5])
    mask = (jnp.arange(T)[None, :] < lengths[:, None]).astype(jnp.float32)

    ref_u, ref_w = ref_forward(m_feats, mask, Wv_lin, bv_lin, Wc_lin, bc_lin)

    # --- default path: bf16 weights/MXU feed, f32 softmax, approx reciprocal ---
    updated_bf, attn_bf = nonlocal_block(m_feats, mask, Wv_lin, bv_lin, Wc_lin, bc_lin)
    jax.block_until_ready(updated_bf)
    jax.block_until_ready(attn_bf)
    assert updated_bf.shape == (B, T, IDIM) and attn_bf.shape == (B, NHEADS, T, T)
    assert np.allclose(np.asarray(updated_bf), np.asarray(ref_u), rtol=3e-2, atol=3e-2)
    assert np.allclose(np.asarray(attn_bf), np.asarray(ref_w), rtol=3e-2, atol=3e-2)

    # --- exact f32 path: strict 1e-4 tolerance, exact reciprocal ---
    updated, attn = nonlocal_block(m_feats, mask, Wv_lin, bv_lin, Wc_lin, bc_lin,
                                   compute_dtype=jnp.float32)
    jax.block_until_ready(updated)
    jax.block_until_ready(attn)
    assert np.allclose(np.asarray(updated), np.asarray(ref_u), rtol=1e-4, atol=1e-4)
    assert np.allclose(np.asarray(attn), np.asarray(ref_w), rtol=1e-4, atol=1e-4)

    print("KERNEL_OK")
</pallas_src>

<mosaic_0001>
module attributes {stable_mosaic.version = 11 : i64} {
  func.func @_nonlocal_kernel(%arg0: i32, %arg1: memref<16x512xf32, #tpu.memory_space<vmem>>, %arg2: memref<2x1x8xf32, #tpu.memory_space<vmem>>, %arg3: memref<512x1536xbf16, #tpu.memory_space<vmem>>, %arg4: memref<1x1536xf32, #tpu.memory_space<vmem>>, %arg5: memref<16x512xf32, #tpu.memory_space<vmem>>, %arg6: memref<2x4x8x8xf32, #tpu.memory_space<vmem>>) attributes {dimension_semantics = [#tpu.dimension_semantics<arbitrary>], iteration_bounds = array<i64: 1>, scalar_prefetch = 0 : i64, scratch_operands = 0 : i64, tpu.core_type = #tpu.core_type<tc>, window_params = [{transform_indices = @transform_0, window_bounds = array<i64: 16, 512>}, {transform_indices = @transform_1, window_bounds = array<i64: 2, 1, 8>}, {pipeline_mode = #tpu.pipeline_mode<synchronous>, transform_indices = @transform_2, window_bounds = array<i64: 512, 1536>}, {pipeline_mode = #tpu.pipeline_mode<synchronous>, transform_indices = @transform_3, window_bounds = array<i64: 1, 1536>}, {transform_indices = @transform_4, window_bounds = array<i64: 16, 512>}, {transform_indices = @transform_5, window_bounds = array<i64: 2, 4, 8, 8>}]} {
    %c0 = arith.constant 0 : index
    %c0_0 = arith.constant 0 : index
    %0 = vector.load %arg1[%c0, %c0_0] : memref<16x512xf32, #tpu.memory_space<vmem>>, vector<16x512xf32>
    %c0_1 = arith.constant 0 : index
    %c0_2 = arith.constant 0 : index
    %c0_3 = arith.constant 0 : index
    %1 = vector.load %arg2[%c0_1, %c0_2, %c0_3] : memref<2x1x8xf32, #tpu.memory_space<vmem>>, vector<2x1x8xf32>
    %2 = arith.truncf %0 : vector<16x512xf32> to vector<16x512xbf16>
    %c0_4 = arith.constant 0 : index
    %c0_5 = arith.constant 0 : index
    %3 = vector.load %arg3[%c0_4, %c0_5] : memref<512x1536xbf16, #tpu.memory_space<vmem>>, vector<512x1536xbf16>
    %cst = arith.constant dense<0.000000e+00> : vector<16x1536xf32>
    %4 = tpu.matmul %2, %3, %cst {dimension_numbers = #tpu.dot_dimension_numbers<[1], [0], [0], [1], [0, 0, 1, 1], [], []>} : vector<16x512xbf16>, vector<512x1536xbf16>, vector<16x1536xf32> -> vector<16x1536xf32>
    %c0_6 = arith.constant 0 : index
    %c0_7 = arith.constant 0 : index
    %5 = vector.load %arg4[%c0_6, %c0_7] : memref<1x1536xf32, #tpu.memory_space<vmem>>, vector<1x1536xf32>
    %6 = vector.broadcast %5 : vector<1x1536xf32> to vector<16x1536xf32>
    %7 = arith.addf %4, %6 : vector<16x1536xf32>
    %8 = vector.extract_strided_slice %7 {offsets = [0, 0], sizes = [8, 512], strides = [1, 1]} : vector<16x1536xf32> to vector<8x512xf32>
    %9 = vector.extract_strided_slice %7 {offsets = [0, 512], sizes = [8, 512], strides = [1, 1]} : vector<16x1536xf32> to vector<8x512xf32>
    %10 = vector.extract_strided_slice %7 {offsets = [0, 1024], sizes = [8, 512], strides = [1, 1]} : vector<16x1536xf32> to vector<8x512xf32>
    %11 = vector.extract_strided_slice %8 {offsets = [0, 0], sizes = [8, 128], strides = [1, 1]} : vector<8x512xf32> to vector<8x128xf32>
    %12 = arith.truncf %11 : vector<8x128xf32> to vector<8x128xbf16>
    %13 = vector.extract_strided_slice %9 {offsets = [0, 0], sizes = [8, 128], strides = [1, 1]} : vector<8x512xf32> to vector<8x128xf32>
    %14 = arith.truncf %13 : vector<8x128xf32> to vector<8x128xbf16>
    %cst_8 = arith.constant dense<0.000000e+00> : vector<8x8xf32>
    %15 = tpu.matmul %12, %14, %cst_8 {dimension_numbers = #tpu.dot_dimension_numbers<[1], [1], [0], [0], [0, 0, 1, 0], [], []>} : vector<8x128xbf16>, vector<8x128xbf16>, vector<8x8xf32> -> vector<8x8xf32>
    %16 = vector.extract_strided_slice %8 {offsets = [0, 128], sizes = [8, 128], strides = [1, 1]} : vector<8x512xf32> to vector<8x128xf32>
    %17 = arith.truncf %16 : vector<8x128xf32> to vector<8x128xbf16>
    %18 = vector.extract_strided_slice %9 {offsets = [0, 128], sizes = [8, 128], strides = [1, 1]} : vector<8x512xf32> to vector<8x128xf32>
    %19 = arith.truncf %18 : vector<8x128xf32> to vector<8x128xbf16>
    %cst_9 = arith.constant dense<0.000000e+00> : vector<8x8xf32>
    %20 = tpu.matmul %17, %19, %cst_9 {dimension_numbers = #tpu.dot_dimension_numbers<[1], [1], [0], [0], [0, 0, 1, 0], [], []>} : vector<8x128xbf16>, vector<8x128xbf16>, vector<8x8xf32> -> vector<8x8xf32>
    %21 = vector.extract_strided_slice %8 {offsets = [0, 256], sizes = [8, 128], strides = [1, 1]} : vector<8x512xf32> to vector<8x128xf32>
    %22 = arith.truncf %21 : vector<8x128xf32> to vector<8x128xbf16>
    %23 = vector.extract_strided_slice %9 {offsets = [0, 256], sizes = [8, 128], strides = [1, 1]} : vector<8x512xf32> to vector<8x128xf32>
    %24 = arith.truncf %23 : vector<8x128xf32> to vector<8x128xbf16>
    %cst_10 = arith.constant dense<0.000000e+00> : vector<8x8xf32>
    %25 = tpu.matmul %22, %24, %cst_10 {dimension_numbers = #tpu.dot_dimension_numbers<[1], [1], [0], [0], [0, 0, 1, 0], [], []>} : vector<8x128xbf16>, vector<8x128xbf16>, vector<8x8xf32> -> vector<8x8xf32>
    %26 = vector.extract_strided_slice %8 {offsets = [0, 384], sizes = [8, 128], strides = [1, 1]} : vector<8x512xf32> to vector<8x128xf32>
    %27 = arith.truncf %26 : vector<8x128xf32> to vector<8x128xbf16>
    %28 = vector.extract_strided_slice %9 {offsets = [0, 384], sizes = [8, 128], strides = [1, 1]} : vector<8x512xf32> to vector<8x128xf32>
    %29 = arith.truncf %28 : vector<8x128xf32> to vector<8x128xbf16>
    %cst_11 = arith.constant dense<0.000000e+00> : vector<8x8xf32>
    %30 = tpu.matmul %27, %29, %cst_11 {dimension_numbers = #tpu.dot_dimension_numbers<[1], [1], [0], [0], [0, 0, 1, 0], [], []>} : vector<8x128xbf16>, vector<8x128xbf16>, vector<8x8xf32> -> vector<8x8xf32>
    %31 = tpu.concatenate %15, %20, %25, %30 in 0 : vector<8x8xf32>, vector<8x8xf32>, vector<8x8xf32>, vector<8x8xf32> -> vector<32x8xf32>
    %cst_12 = arith.constant 0.0883883461 : f32
    %32 = vector.broadcast %cst_12 : f32 to vector<32x8xf32>
    %33 = arith.mulf %31, %32 : vector<32x8xf32>
    %34 = vector.extract_strided_slice %1 {offsets = [0, 0, 0], sizes = [1, 1, 8], strides = [1, 1, 1]} : vector<2x1x8xf32> to vector<1x1x8xf32>
    %35 = vector.shape_cast %34 : vector<1x1x8xf32> to vector<1x8xf32>
    %cst_13 = arith.constant 0.000000e+00 : f32
    %36 = vector.broadcast %cst_13 : f32 to vector<1x8xf32>
    %37 = arith.cmpf oeq, %35, %36 : vector<1x8xf32>
    %cst_14 = arith.constant -1.000000e+09 : f32
    %38 = vector.shape_cast %37 : vector<1x8xi1> to vector<1x8xi1>
    %39 = vector.broadcast %38 : vector<1x8xi1> to vector<32x8xi1>
    %40 = vector.broadcast %cst_14 : f32 to vector<32x8xf32>
    %41 = arith.select %39, %40, %33 : vector<32x8xi1>, vector<32x8xf32>
    %cst_15 = arith.constant dense<0xFF800000> : vector<32xf32>
    %42 = vector.multi_reduction <maximumf>, %41, %cst_15 [1] : vector<32x8xf32> to vector<32xf32>
    %43 = vector.shape_cast %42 : vector<32xf32> to vector<32x1xf32>
    %44 = vector.broadcast %43 : vector<32x1xf32> to vector<32x8xf32>
    %45 = arith.subf %41, %44 : vector<32x8xf32>
    %46 = math.exp %45 : vector<32x8xf32>
    %cst_16 = arith.constant dense<0.000000e+00> : vector<32xf32>
    %47 = vector.multi_reduction <add>, %46, %cst_16 [1] : vector<32x8xf32> to vector<32xf32>
    %48 = vector.shape_cast %47 : vector<32xf32> to vector<32x1xf32>
    %49 = tpu.reciprocal %48 {approx = true} : vector<32x1xf32> -> vector<32x1xf32>
    %50 = vector.broadcast %49 : vector<32x1xf32> to vector<32x8xf32>
    %51 = arith.mulf %46, %50 : vector<32x8xf32>
    %52 = vector.extract_strided_slice %51 {offsets = [0, 0], sizes = [8, 8], strides = [1, 1]} : vector<32x8xf32> to vector<8x8xf32>
    %c0_17 = arith.constant 0 : index
    %c0_18 = arith.constant 0 : index
    %c0_19 = arith.constant 0 : index
    %c0_20 = arith.constant 0 : index
    %53 = vector.load %arg6[%c0_17, %c0_18, %c0_19, %c0_20] : memref<2x4x8x8xf32, #tpu.memory_space<vmem>>, vector<1x1x8x8xf32>
    %54 = vector.shape_cast %53 : vector<1x1x8x8xf32> to vector<8x8xf32>
    %55 = vector.shape_cast %52 : vector<8x8xf32> to vector<1x1x8x8xf32>
    tpu.vector_store %arg6[%c0_17, %c0_18, %c0_19, %c0_20], %55 {strides = array<i32>} : memref<2x4x8x8xf32, #tpu.memory_space<vmem>>, vector<1x1x8x8xf32>,
    %56 = arith.truncf %52 : vector<8x8xf32> to vector<8x8xbf16>
    %57 = vector.extract_strided_slice %10 {offsets = [0, 0], sizes = [8, 128], strides = [1, 1]} : vector<8x512xf32> to vector<8x128xf32>
    %58 = arith.truncf %57 : vector<8x128xf32> to vector<8x128xbf16>
    %cst_21 = arith.constant dense<0.000000e+00> : vector<8x128xf32>
    %59 = tpu.matmul %56, %58, %cst_21 {dimension_numbers = #tpu.dot_dimension_numbers<[1], [0], [0], [1], [0, 0, 1, 1], [], []>} : vector<8x8xbf16>, vector<8x128xbf16>, vector<8x128xf32> -> vector<8x128xf32>
    %60 = vector.extract_strided_slice %0 {offsets = [0, 0], sizes = [8, 128], strides = [1, 1]} : vector<16x512xf32> to vector<8x128xf32>
    %61 = arith.addf %60, %59 : vector<8x128xf32>
    %c0_22 = arith.constant 0 : index
    %c0_23 = arith.constant 0 : index
    %62 = vector.load %arg5[%c0_22, %c0_23] : memref<16x512xf32, #tpu.memory_space<vmem>>, vector<8x128xf32>
    tpu.vector_store %arg5[%c0_22, %c0_23], %61 {strides = array<i32>} : memref<16x512xf32, #tpu.memory_space<vmem>>, vector<8x128xf32>,
    %63 = vector.extract_strided_slice %51 {offsets = [8, 0], sizes = [8, 8], strides = [1, 1]} : vector<32x8xf32> to vector<8x8xf32>
    %c0_24 = arith.constant 0 : index
    %c1 = arith.constant 1 : index
    %c0_25 = arith.constant 0 : index
    %c0_26 = arith.constant 0 : index
    %64 = vector.load %arg6[%c0_24, %c1, %c0_25, %c0_26] : memref<2x4x8x8xf32, #tpu.memory_space<vmem>>, vector<1x1x8x8xf32>
    %65 = vector.shape_cast %64 : vector<1x1x8x8xf32> to vector<8x8xf32>
    %66 = vector.shape_cast %63 : vector<8x8xf32> to vector<1x1x8x8xf32>
    tpu.vector_store %arg6[%c0_24, %c1, %c0_25, %c0_26], %66 {strides = array<i32>} : memref<2x4x8x8xf32, #tpu.memory_space<vmem>>, vector<1x1x8x8xf32>,
    %67 = arith.truncf %63 : vector<8x8xf32> to vector<8x8xbf16>
    %68 = vector.extract_strided_slice %10 {offsets = [0, 128], sizes = [8, 128], strides = [1, 1]} : vector<8x512xf32> to vector<8x128xf32>
    %69 = arith.truncf %68 : vector<8x128xf32> to vector<8x128xbf16>
    %cst_27 = arith.constant dense<0.000000e+00> : vector<8x128xf32>
    %70 = tpu.matmul %67, %69, %cst_27 {dimension_numbers = #tpu.dot_dimension_numbers<[1], [0], [0], [1], [0, 0, 1, 1], [], []>} : vector<8x8xbf16>, vector<8x128xbf16>, vector<8x128xf32> -> vector<8x128xf32>
    %71 = vector.extract_strided_slice %0 {offsets = [0, 128], sizes = [8, 128], strides = [1, 1]} : vector<16x512xf32> to vector<8x128xf32>
    %72 = arith.addf %71, %70 : vector<8x128xf32>
    %c0_28 = arith.constant 0 : index
    %c128 = arith.constant 128 : index
    %73 = vector.load %arg5[%c0_28, %c128] : memref<16x512xf32, #tpu.memory_space<vmem>>, vector<8x128xf32>
    tpu.vector_store %arg5[%c0_28, %c128], %72 {strides = array<i32>} : memref<16x512xf32, #tpu.memory_space<vmem>>, vector<8x128xf32>,
    %74 = vector.extract_strided_slice %51 {offsets = [16, 0], sizes = [8, 8], strides = [1, 1]} : vector<32x8xf32> to vector<8x8xf32>
    %c0_29 = arith.constant 0 : index
    %c2 = arith.constant 2 : index
    %c0_30 = arith.constant 0 : index
    %c0_31 = arith.constant 0 : index
    %75 = vector.load %arg6[%c0_29, %c2, %c0_30, %c0_31] : memref<2x4x8x8xf32, #tpu.memory_space<vmem>>, vector<1x1x8x8xf32>
    %76 = vector.shape_cast %75 : vector<1x1x8x8xf32> to vector<8x8xf32>
    %77 = vector.shape_cast %74 : vector<8x8xf32> to vector<1x1x8x8xf32>
    tpu.vector_store %arg6[%c0_29, %c2, %c0_30, %c0_31], %77 {strides = array<i32>} : memref<2x4x8x8xf32, #tpu.memory_space<vmem>>, vector<1x1x8x8xf32>,
    %78 = arith.truncf %74 : vector<8x8xf32> to vector<8x8xbf16>
    %79 = vector.extract_strided_slice %10 {offsets = [0, 256], sizes = [8, 128], strides = [1, 1]} : vector<8x512xf32> to vector<8x128xf32>
    %80 = arith.truncf %79 : vector<8x128xf32> to vector<8x128xbf16>
    %cst_32 = arith.constant dense<0.000000e+00> : vector<8x128xf32>
    %81 = tpu.matmul %78, %80, %cst_32 {dimension_numbers = #tpu.dot_dimension_numbers<[1], [0], [0], [1], [0, 0, 1, 1], [], []>} : vector<8x8xbf16>, vector<8x128xbf16>, vector<8x128xf32> -> vector<8x128xf32>
    %82 = vector.extract_strided_slice %0 {offsets = [0, 256], sizes = [8, 128], strides = [1, 1]} : vector<16x512xf32> to vector<8x128xf32>
    %83 = arith.addf %82, %81 : vector<8x128xf32>
    %c0_33 = arith.constant 0 : index
    %c256 = arith.constant 256 : index
    %84 = vector.load %arg5[%c0_33, %c256] : memref<16x512xf32, #tpu.memory_space<vmem>>, vector<8x128xf32>
    tpu.vector_store %arg5[%c0_33, %c256], %83 {strides = array<i32>} : memref<16x512xf32, #tpu.memory_space<vmem>>, vector<8x128xf32>,
    %85 = vector.extract_strided_slice %51 {offsets = [24, 0], sizes = [8, 8], strides = [1, 1]} : vector<32x8xf32> to vector<8x8xf32>
    %c0_34 = arith.constant 0 : index
    %c3 = arith.constant 3 : index
    %c0_35 = arith.constant 0 : index
    %c0_36 = arith.constant 0 : index
    %86 = vector.load %arg6[%c0_34, %c3, %c0_35, %c0_36] : memref<2x4x8x8xf32, #tpu.memory_space<vmem>>, vector<1x1x8x8xf32>
    %87 = vector.shape_cast %86 : vector<1x1x8x8xf32> to vector<8x8xf32>
    %88 = vector.shape_cast %85 : vector<8x8xf32> to vector<1x1x8x8xf32>
    tpu.vector_store %arg6[%c0_34, %c3, %c0_35, %c0_36], %88 {strides = array<i32>} : memref<2x4x8x8xf32, #tpu.memory_space<vmem>>, vector<1x1x8x8xf32>,
    %89 = arith.truncf %85 : vector<8x8xf32> to vector<8x8xbf16>
    %90 = vector.extract_strided_slice %10 {offsets = [0, 384], sizes = [8, 128], strides = [1, 1]} : vector<8x512xf32> to vector<8x128xf32>
    %91 = arith.truncf %90 : vector<8x128xf32> to vector<8x128xbf16>
    %cst_37 = arith.constant dense<0.000000e+00> : vector<8x128xf32>
    %92 = tpu.matmul %89, %91, %cst_37 {dimension_numbers = #tpu.dot_dimension_numbers<[1], [0], [0], [1], [0, 0, 1, 1], [], []>} : vector<8x8xbf16>, vector<8x128xbf16>, vector<8x128xf32> -> vector<8x128xf32>
    %93 = vector.extract_strided_slice %0 {offsets = [0, 384], sizes = [8, 128], strides = [1, 1]} : vector<16x512xf32> to vector<8x128xf32>
    %94 = arith.addf %93, %92 : vector<8x128xf32>
    %c0_38 = arith.constant 0 : index
    %c384 = arith.constant 384 : index
    %95 = vector.load %arg5[%c0_38, %c384] : memref<16x512xf32, #tpu.memory_space<vmem>>, vector<8x128xf32>
    tpu.vector_store %arg5[%c0_38, %c384], %94 {strides = array<i32>} : memref<16x512xf32, #tpu.memory_space<vmem>>, vector<8x128xf32>,
    %96 = vector.extract_strided_slice %7 {offsets = [8, 0], sizes = [8, 512], strides = [1, 1]} : vector<16x1536xf32> to vector<8x512xf32>
    %97 = vector.extract_strided_slice %7 {offsets = [8, 512], sizes = [8, 512], strides = [1, 1]} : vector<16x1536xf32> to vector<8x512xf32>
    %98 = vector.extract_strided_slice %7 {offsets = [8, 1024], sizes = [8, 512], strides = [1, 1]} : vector<16x1536xf32> to vector<8x512xf32>
    %99 = vector.extract_strided_slice %96 {offsets = [0, 0], sizes = [8, 128], strides = [1, 1]} : vector<8x512xf32> to vector<8x128xf32>
    %100 = arith.truncf %99 : vector<8x128xf32> to vector<8x128xbf16>
    %101 = vector.extract_strided_slice %97 {offsets = [0, 0], sizes = [8, 128], strides = [1, 1]} : vector<8x512xf32> to vector<8x128xf32>
    %102 = arith.truncf %101 : vector<8x128xf32> to vector<8x128xbf16>
    %cst_39 = arith.constant dense<0.000000e+00> : vector<8x8xf32>
    %103 = tpu.matmul %100, %102, %cst_39 {dimension_numbers = #tpu.dot_dimension_numbers<[1], [1], [0], [0], [0, 0, 1, 0], [], []>} : vector<8x128xbf16>, vector<8x128xbf16>, vector<8x8xf32> -> vector<8x8xf32>
    %104 = vector.extract_strided_slice %96 {offsets = [0, 128], sizes = [8, 128], strides = [1, 1]} : vector<8x512xf32> to vector<8x128xf32>
    %105 = arith.truncf %104 : vector<8x128xf32> to vector<8x128xbf16>
    %106 = vector.extract_strided_slice %97 {offsets = [0, 128], sizes = [8, 128], strides = [1, 1]} : vector<8x512xf32> to vector<8x128xf32>
    %107 = arith.truncf %106 : vector<8x128xf32> to vector<8x128xbf16>
    %cst_40 = arith.constant dense<0.000000e+00> : vector<8x8xf32>
    %108 = tpu.matmul %105, %107, %cst_40 {dimension_numbers = #tpu.dot_dimension_numbers<[1], [1], [0], [0], [0, 0, 1, 0], [], []>} : vector<8x128xbf16>, vector<8x128xbf16>, vector<8x8xf32> -> vector<8x8xf32>
    %109 = vector.extract_strided_slice %96 {offsets = [0, 256], sizes = [8, 128], strides = [1, 1]} : vector<8x512xf32> to vector<8x128xf32>
    %110 = arith.truncf %109 : vector<8x128xf32> to vector<8x128xbf16>
    %111 = vector.extract_strided_slice %97 {offsets = [0, 256], sizes = [8, 128], strides = [1, 1]} : vector<8x512xf32> to vector<8x128xf32>
    %112 = arith.truncf %111 : vector<8x128xf32> to vector<8x128xbf16>
    %cst_41 = arith.constant dense<0.000000e+00> : vector<8x8xf32>
    %113 = tpu.matmul %110, %112, %cst_41 {dimension_numbers = #tpu.dot_dimension_numbers<[1], [1], [0], [0], [0, 0, 1, 0], [], []>} : vector<8x128xbf16>, vector<8x128xbf16>, vector<8x8xf32> -> vector<8x8xf32>
    %114 = vector.extract_strided_slice %96 {offsets = [0, 384], sizes = [8, 128], strides = [1, 1]} : vector<8x512xf32> to vector<8x128xf32>
    %115 = arith.truncf %114 : vector<8x128xf32> to vector<8x128xbf16>
    %116 = vector.extract_strided_slice %97 {offsets = [0, 384], sizes = [8, 128], strides = [1, 1]} : vector<8x512xf32> to vector<8x128xf32>
    %117 = arith.truncf %116 : vector<8x128xf32> to vector<8x128xbf16>
    %cst_42 = arith.constant dense<0.000000e+00> : vector<8x8xf32>
    %118 = tpu.matmul %115, %117, %cst_42 {dimension_numbers = #tpu.dot_dimension_numbers<[1], [1], [0], [0], [0, 0, 1, 0], [], []>} : vector<8x128xbf16>, vector<8x128xbf16>, vector<8x8xf32> -> vector<8x8xf32>
    %119 = tpu.concatenate %103, %108, %113, %118 in 0 : vector<8x8xf32>, vector<8x8xf32>, vector<8x8xf32>, vector<8x8xf32> -> vector<32x8xf32>
    %cst_43 = arith.constant 0.0883883461 : f32
    %120 = vector.broadcast %cst_43 : f32 to vector<32x8xf32>
    %121 = arith.mulf %119, %120 : vector<32x8xf32>
    %122 = vector.extract_strided_slice %1 {offsets = [1, 0, 0], sizes = [1, 1, 8], strides = [1, 1, 1]} : vector<2x1x8xf32> to vector<1x1x8xf32>
    %123 = vector.shape_cast %122 : vector<1x1x8xf32> to vector<1x8xf32>
    %cst_44 = arith.constant 0.000000e+00 : f32
    %124 = vector.broadcast %cst_44 : f32 to vector<1x8xf32>
    %125 = arith.cmpf oeq, %123, %124 : vector<1x8xf32>
    %cst_45 = arith.constant -1.000000e+09 : f32
    %126 = vector.shape_cast %125 : vector<1x8xi1> to vector<1x8xi1>
    %127 = vector.broadcast %126 : vector<1x8xi1> to vector<32x8xi1>
    %128 = vector.broadcast %cst_45 : f32 to vector<32x8xf32>
    %129 = arith.select %127, %128, %121 : vector<32x8xi1>, vector<32x8xf32>
    %cst_46 = arith.constant dense<0xFF800000> : vector<32xf32>
    %130 = vector.multi_reduction <maximumf>, %129, %cst_46 [1] : vector<32x8xf32> to vector<32xf32>
    %131 = vector.shape_cast %130 : vector<32xf32> to vector<32x1xf32>
    %132 = vector.broadcast %131 : vector<32x1xf32> to vector<32x8xf32>
    %133 = arith.subf %129, %132 : vector<32x8xf32>
    %134 = math.exp %133 : vector<32x8xf32>
    %cst_47 = arith.constant dense<0.000000e+00> : vector<32xf32>
    %135 = vector.multi_reduction <add>, %134, %cst_47 [1] : vector<32x8xf32> to vector<32xf32>
    %136 = vector.shape_cast %135 : vector<32xf32> to vector<32x1xf32>
    %137 = tpu.reciprocal %136 {approx = true} : vector<32x1xf32> -> vector<32x1xf32>
    %138 = vector.broadcast %137 : vector<32x1xf32> to vector<32x8xf32>
    %139 = arith.mulf %134, %138 : vector<32x8xf32>
    %140 = vector.extract_strided_slice %139 {offsets = [0, 0], sizes = [8, 8], strides = [1, 1]} : vector<32x8xf32> to vector<8x8xf32>
    %c1_48 = arith.constant 1 : index
    %c0_49 = arith.constant 0 : index
    %c0_50 = arith.constant 0 : index
    %c0_51 = arith.constant 0 : index
    %141 = vector.load %arg6[%c1_48, %c0_49, %c0_50, %c0_51] : memref<2x4x8x8xf32, #tpu.memory_space<vmem>>, vector<1x1x8x8xf32>
    %142 = vector.shape_cast %141 : vector<1x1x8x8xf32> to vector<8x8xf32>
    %143 = vector.shape_cast %140 : vector<8x8xf32> to vector<1x1x8x8xf32>
    tpu.vector_store %arg6[%c1_48, %c0_49, %c0_50, %c0_51], %143 {strides = array<i32>} : memref<2x4x8x8xf32, #tpu.memory_space<vmem>>, vector<1x1x8x8xf32>,
    %144 = arith.truncf %140 : vector<8x8xf32> to vector<8x8xbf16>
    %145 = vector.extract_strided_slice %98 {offsets = [0, 0], sizes = [8, 128], strides = [1, 1]} : vector<8x512xf32> to vector<8x128xf32>
    %146 = arith.truncf %145 : vector<8x128xf32> to vector<8x128xbf16>
    %cst_52 = arith.constant dense<0.000000e+00> : vector<8x128xf32>
    %147 = tpu.matmul %144, %146, %cst_52 {dimension_numbers = #tpu.dot_dimension_numbers<[1], [0], [0], [1], [0, 0, 1, 1], [], []>} : vector<8x8xbf16>, vector<8x128xbf16>, vector<8x128xf32> -> vector<8x128xf32>
    %148 = vector.extract_strided_slice %0 {offsets = [8, 0], sizes = [8, 128], strides = [1, 1]} : vector<16x512xf32> to vector<8x128xf32>
    %149 = arith.addf %148, %147 : vector<8x128xf32>
    %c8 = arith.constant 8 : index
    %c0_53 = arith.constant 0 : index
    %150 = vector.load %arg5[%c8, %c0_53] : memref<16x512xf32, #tpu.memory_space<vmem>>, vector<8x128xf32>
    tpu.vector_store %arg5[%c8, %c0_53], %149 {strides = array<i32>} : memref<16x512xf32, #tpu.memory_space<vmem>>, vector<8x128xf32>,
    %151 = vector.extract_strided_slice %139 {offsets = [8, 0], sizes = [8, 8], strides = [1, 1]} : vector<32x8xf32> to vector<8x8xf32>
    %c1_54 = arith.constant 1 : index
    %c1_55 = arith.constant 1 : index
    %c0_56 = arith.constant 0 : index
    %c0_57 = arith.constant 0 : index
    %152 = vector.load %arg6[%c1_54, %c1_55, %c0_56, %c0_57] : memref<2x4x8x8xf32, #tpu.memory_space<vmem>>, vector<1x1x8x8xf32>
    %153 = vector.shape_cast %152 : vector<1x1x8x8xf32> to vector<8x8xf32>
    %154 = vector.shape_cast %151 : vector<8x8xf32> to vector<1x1x8x8xf32>
    tpu.vector_store %arg6[%c1_54, %c1_55, %c0_56, %c0_57], %154 {strides = array<i32>} : memref<2x4x8x8xf32, #tpu.memory_space<vmem>>, vector<1x1x8x8xf32>,
    %155 = arith.truncf %151 : vector<8x8xf32> to vector<8x8xbf16>
    %156 = vector.extract_strided_slice %98 {offsets = [0, 128], sizes = [8, 128], strides = [1, 1]} : vector<8x512xf32> to vector<8x128xf32>
    %157 = arith.truncf %156 : vector<8x128xf32> to vector<8x128xbf16>
    %cst_58 = arith.constant dense<0.000000e+00> : vector<8x128xf32>
    %158 = tpu.matmul %155, %157, %cst_58 {dimension_numbers = #tpu.dot_dimension_numbers<[1], [0], [0], [1], [0, 0, 1, 1], [], []>} : vector<8x8xbf16>, vector<8x128xbf16>, vector<8x128xf32> -> vector<8x128xf32>
    %159 = vector.extract_strided_slice %0 {offsets = [8, 128], sizes = [8, 128], strides = [1, 1]} : vector<16x512xf32> to vector<8x128xf32>
    %160 = arith.addf %159, %158 : vector<8x128xf32>
    %c8_59 = arith.constant 8 : index
    %c128_60 = arith.constant 128 : index
    %161 = vector.load %arg5[%c8_59, %c128_60] : memref<16x512xf32, #tpu.memory_space<vmem>>, vector<8x128xf32>
    tpu.vector_store %arg5[%c8_59, %c128_60], %160 {strides = array<i32>} : memref<16x512xf32, #tpu.memory_space<vmem>>, vector<8x128xf32>,
    %162 = vector.extract_strided_slice %139 {offsets = [16, 0], sizes = [8, 8], strides = [1, 1]} : vector<32x8xf32> to vector<8x8xf32>
    %c1_61 = arith.constant 1 : index
    %c2_62 = arith.constant 2 : index
    %c0_63 = arith.constant 0 : index
    %c0_64 = arith.constant 0 : index
    %163 = vector.load %arg6[%c1_61, %c2_62, %c0_63, %c0_64] : memref<2x4x8x8xf32, #tpu.memory_space<vmem>>, vector<1x1x8x8xf32>
    %164 = vector.shape_cast %163 : vector<1x1x8x8xf32> to vector<8x8xf32>
    %165 = vector.shape_cast %162 : vector<8x8xf32> to vector<1x1x8x8xf32>
    tpu.vector_store %arg6[%c1_61, %c2_62, %c0_63, %c0_64], %165 {strides = array<i32>} : memref<2x4x8x8xf32, #tpu.memory_space<vmem>>, vector<1x1x8x8xf32>,
    %166 = arith.truncf %162 : vector<8x8xf32> to vector<8x8xbf16>
    %167 = vector.extract_strided_slice %98 {offsets = [0, 256], sizes = [8, 128], strides = [1, 1]} : vector<8x512xf32> to vector<8x128xf32>
    %168 = arith.truncf %167 : vector<8x128xf32> to vector<8x128xbf16>
    %cst_65 = arith.constant dense<0.000000e+00> : vector<8x128xf32>
    %169 = tpu.matmul %166, %168, %cst_65 {dimension_numbers = #tpu.dot_dimension_numbers<[1], [0], [0], [1], [0, 0, 1, 1], [], []>} : vector<8x8xbf16>, vector<8x128xbf16>, vector<8x128xf32> -> vector<8x128xf32>
    %170 = vector.extract_strided_slice %0 {offsets = [8, 256], sizes = [8, 128], strides = [1, 1]} : vector<16x512xf32> to vector<8x128xf32>
    %171 = arith.addf %170, %169 : vector<8x128xf32>
    %c8_66 = arith.constant 8 : index
    %c256_67 = arith.constant 256 : index
    %172 = vector.load %arg5[%c8_66, %c256_67] : memref<16x512xf32, #tpu.memory_space<vmem>>, vector<8x128xf32>
    tpu.vector_store %arg5[%c8_66, %c256_67], %171 {strides = array<i32>} : memref<16x512xf32, #tpu.memory_space<vmem>>, vector<8x128xf32>,
    %173 = vector.extract_strided_slice %139 {offsets = [24, 0], sizes = [8, 8], strides = [1, 1]} : vector<32x8xf32> to vector<8x8xf32>
    %c1_68 = arith.constant 1 : index
    %c3_69 = arith.constant 3 : index
    %c0_70 = arith.constant 0 : index
    %c0_71 = arith.constant 0 : index
    %174 = vector.load %arg6[%c1_68, %c3_69, %c0_70, %c0_71] : memref<2x4x8x8xf32, #tpu.memory_space<vmem>>, vector<1x1x8x8xf32>
    %175 = vector.shape_cast %174 : vector<1x1x8x8xf32> to vector<8x8xf32>
    %176 = vector.shape_cast %173 : vector<8x8xf32> to vector<1x1x8x8xf32>
    tpu.vector_store %arg6[%c1_68, %c3_69, %c0_70, %c0_71], %176 {strides = array<i32>} : memref<2x4x8x8xf32, #tpu.memory_space<vmem>>, vector<1x1x8x8xf32>,
    %177 = arith.truncf %173 : vector<8x8xf32> to vector<8x8xbf16>
    %178 = vector.extract_strided_slice %98 {offsets = [0, 384], sizes = [8, 128], strides = [1, 1]} : vector<8x512xf32> to vector<8x128xf32>
    %179 = arith.truncf %178 : vector<8x128xf32> to vector<8x128xbf16>
    %cst_72 = arith.constant dense<0.000000e+00> : vector<8x128xf32>
    %180 = tpu.matmul %177, %179, %cst_72 {dimension_numbers = #tpu.dot_dimension_numbers<[1], [0], [0], [1], [0, 0, 1, 1], [], []>} : vector<8x8xbf16>, vector<8x128xbf16>, vector<8x128xf32> -> vector<8x128xf32>
    %181 = vector.extract_strided_slice %0 {offsets = [8, 384], sizes = [8, 128], strides = [1, 1]} : vector<16x512xf32> to vector<8x128xf32>
    %182 = arith.addf %181, %180 : vector<8x128xf32>
    %c8_73 = arith.constant 8 : index
    %c384_74 = arith.constant 384 : index
    %183 = vector.load %arg5[%c8_73, %c384_74] : memref<16x512xf32, #tpu.memory_space<vmem>>, vector<8x128xf32>
    tpu.vector_store %arg5[%c8_73, %c384_74], %182 {strides = array<i32>} : memref<16x512xf32, #tpu.memory_space<vmem>>, vector<8x128xf32>,
    return
  }
  func.func @transform_0(%arg0: i32) -> (i32, i32) {
    %c0_i32 = arith.constant 0 : i32
    %c0_i32_0 = arith.constant 0 : i32
    return %arg0, %c0_i32 : i32, i32
  }
  func.func @transform_1(%arg0: i32) -> (i32, i32, i32) {
    %c0_i32 = arith.constant 0 : i32
    %c0_i32_0 = arith.constant 0 : i32
    %c0_i32_1 = arith.constant 0 : i32
    return %arg0, %c0_i32, %c0_i32_0 : i32, i32, i32
  }
  func.func @transform_2(%arg0: i32) -> (i32, i32) {
    %c0_i32 = arith.constant 0 : i32
    %c0_i32_0 = arith.constant 0 : i32
    %c0_i32_1 = arith.constant 0 : i32
    return %c0_i32, %c0_i32_0 : i32, i32
  }
  func.func @transform_3(%arg0: i32) -> (i32, i32) {
    %c0_i32 = arith.constant 0 : i32
    %c0_i32_0 = arith.constant 0 : i32
    %c0_i32_1 = arith.constant 0 : i32
    return %c0_i32, %c0_i32_0 : i32, i32
  }
  func.func @transform_4(%arg0: i32) -> (i32, i32) {
    %c0_i32 = arith.constant 0 : i32
    %c0_i32_0 = arith.constant 0 : i32
    return %arg0, %c0_i32 : i32, i32
  }
  func.func @transform_5(%arg0: i32) -> (i32, i32, i32, i32) {
    %c0_i32 = arith.constant 0 : i32
    %c0_i32_0 = arith.constant 0 : i32
    %c0_i32_1 = arith.constant 0 : i32
    %c0_i32_2 = arith.constant 0 : i32
    return %arg0, %c0_i32, %c0_i32_0, %c0_i32_1 : i32, i32, i32, i32
  }
}

</mosaic_0001>

<bundles_post_ra>
// kernel: tpu_custom_call.1
= control target key start
LH: loop header
LB: loop body
LE: loop exit
PB: predicated region body
PF: predicated region fallthrough
CT: control target
= control target key end

     0   :  { %11 = vsyncpa [#allocation3], 0  ;;  %s6064_s0 = inlined_call_operand.hbm [shape: f32[16,512], index: 0, kind: input, shape index: {}]   ;;  %s6065_s1 = inlined_call_operand.hbm [shape: f32[2,1,8], index: 1, kind: input, shape index: {}]   ;;  %s6066_s2 = inlined_call_operand.hbm [shape: bf16[512,1536], index: 2, kind: input, shape index: {}]   ;;  %s6067_s3 = inlined_call_operand.hbm [shape: f32[1,1536], index: 3, kind: input, shape index: {}]   ;;  %s6068_s4 = inlined_call_operand.hbm [shape: f32[16,512], index: 4, kind: output, shape index: {0}]   ;;  %s6069_s5 = inlined_call_operand.hbm [shape: f32[2,4,8,8], index: 5, kind: output, shape index: {1}]  }
   0x1   :  { %12 = vsyncpa [#allocation6], 0 }
   0x2   :  { %13 = vsyncpa [#allocation9], 0 }
   0x3   :  { %14 = vsyncpa [#allocation4], 0  ;;  %s33_s20 = sshll.u32 %s6065_s1, 4  ;;  %s34_s20 = int_to_ptr.hbm [resolvable:$true] %s33_s20 }
   0x4   :  { %15 = vsyncpa [#allocation12], 0  ;;  %s5711_s21 = smov [#allocation5]   ;;  %s20_s25 = sshll.u32 %s6064_s0, 4  ;;  %s21_s25 = int_to_ptr.hbm [resolvable:$true] %s20_s25 }
   0x5   :  { %s35_s22 = sshll.u32 %s5711_s21, 4  ;;  %s5712_s26 = smov 16   ;;  %s36_s22 = int_to_ptr.vmem [resolvable:$true] %s35_s22 }
   0x6   :  { %s5713_s27 = smov 1   ;;  %s5714_s28 = smov [#allocation2]  }
   0x7   :  { %41 = dma.hbm_to_vmem [thread:$0]  %s34_s20, 32, %s36_s22, [#allocation6], %s5712_s26, %s5712_s26, %s5713_s27  }
   0x8   :  { %s22_s29 = sshll.u32 %s5714_s28, 4  ;;  %s5715_s30 = smov 512   ;;  %s23_s29 = int_to_ptr.vmem [resolvable:$true] %s22_s29 }
   0x9   :  { %s5716_s6 = smov 32   ;;  %s46_s8 = sshll.u32 %s6066_s2, 4  ;;  %s47_s8 = int_to_ptr.hbm [resolvable:$true] %s46_s8 }
   0xa   :  { %28 = dma.hbm_to_vmem [thread:$0]  %s21_s25, 1024, %s23_s29, [#allocation3], %s5715_s30, %s5715_s30, %s5716_s6  }
   0xb   :  { %s5717_s9 = smov [#allocation7]   ;;  %s60_s12 = sshll.u32 %s6067_s3, 4  ;;  %s61_s12 = int_to_ptr.hbm [resolvable:$true] %s60_s12 }
   0xc   :  { %s48_s0 = sshll.u32 %s5717_s9, 4  ;;  %s5718_s13 = smov 768   ;;  %s49_s0 = int_to_ptr.vmem [resolvable:$true] %s48_s0 }
   0xd   :  { %s5719_s14 = smov 48   ;;  %s5720_s15 = smov [#allocation8]  }
   0xe   :  { %54 = dma.hbm_to_vmem [thread:$0]  %s47_s8, 49152, %s49_s0, [#allocation6], %s5718_s13, %s5718_s13, %s5719_s14  }
   0xf   :  { %s62_s16 = sshll.u32 %s5720_s15, 4  ;;  %s63_s16 = int_to_ptr.vmem [resolvable:$true] %s62_s16 }
  0x10   :  { %65 = dma.hbm_to_vmem [thread:$0]  %s61_s12, 192, %s63_s16, [#allocation9]  }
  0x11   :  { %5701 = dma.done.wait [#allocation3], 1024  }
  0x12   :  { %5702 = vsyncadd [#allocation3], 4294966272 }
  0x13   :  { %5703 = dma.done.wait [#allocation6], 49184  }
  0x14   :  { %5704 = vsyncadd [#allocation6], 4294918112 }
  0x15   :  { %5705 = dma.done.wait [#allocation9], 192  }
  0x16   :  { %5706 = vsyncadd [#allocation9], 4294967104  ;;  %v3911_v0 = vld [vmem:[#allocation7 + $0x2a0] sm:$0xf]  ;;  %v5207_v1 = vld [vmem:[#allocation7 + $0x2cc] sm:$0xf0] }
  0x17   :  { %v4295_v2 = vld [vmem:[#allocation7 + $0x5a0] sm:$0xf]  ;;  %v3912_v3 = vor.u32 %v5207_v1, %v3911_v0  ;;  %v5303_v4 = vld [vmem:[#allocation7 + $0x5cc] sm:$0xf0]  ;;  %vm3224_vm0 = vcmask 1043456   ;;  %vm3173_vm3 = vcmask 64512  }
  0x18   :  { %v4679_v5 = vld [vmem:[#allocation7 + $0x8a0] sm:$0xf]  ;;  %v5399_v6 = vld [vmem:[#allocation7 + $0x8cc] sm:$0xf0]  ;;  %v4296_v7 = vor.u32 %v5303_v4, %v4295_v2  ;;  %s5722_s2 = smov [#allocation11]   ;;  %s3553_s19 = sshll.u32 %s6069_s5, 4  ;;  %s3554_s19 = int_to_ptr.hbm [resolvable:$true] %s3553_s19 }
  0x19   :  { %v4680_v8 = vor.u32 %v5399_v6, %v4679_v5  ;;  %v5063_v9 = vld [vmem:[#allocation7 + $0xba0] sm:$0xf]  ;;  %v5495_v10 = vld [vmem:[#allocation7 + $0xbcc] sm:$0xf0]  ;;  %2429 = vmatpush.bf16.msra.mxu0 %v3912_v3  ;;  %s3551_s3 = sshll.u32 %s5722_s2, 4  ;;  %s5723_s20 = smov 128   ;;  %s3552_s3 = int_to_ptr.vmem [resolvable:$true] %s3551_s3 }
  0x1a   :  { %v3863_v11 = vld [vmem:[#allocation7 + $0x240] sm:$0xf]  ;;  %v5064_v12 = vor.u32 %v5495_v10, %v5063_v9  ;;  %v5195_v13 = vld [vmem:[#allocation7 + $0x26c] sm:$0xf0]  ;;  %2443 = vmatpush.bf16.msra.mxu1 %v4296_v7  ;;  %s5724_s21 = smov 8   ;;  %s5725_s5 = smov [#allocation10]  }
  0x1b   :  { %v4247_v14 = vld [vmem:[#allocation7 + $0x540] sm:$0xf]  ;;  %v5291_v15 = vld [vmem:[#allocation7 + $0x56c] sm:$0xf0]  ;;  %2457 = vmatpush.bf16.msra.mxu2 %v4680_v8  ;;  %v3864_v16 = vor.u32 %v5195_v13, %v3863_v11  ;;  %s3538_s22 = sshll.u32 %s5725_s5, 4  ;;  %s3540_s25 = sshll.u32 %s6068_s4, 4  ;;  %s3539_s22 = int_to_ptr.vmem [resolvable:$true] %s3538_s22  ;;  %s3541_s25 = int_to_ptr.hbm [resolvable:$true] %s3540_s25 }
  0x1c   :  { %v4248_v17 = vor.u32 %v5291_v15, %v4247_v14  ;;  %v4631_v18 = vld [vmem:[#allocation7 + $0x840] sm:$0xf]  ;;  %v5387_v19 = vld [vmem:[#allocation7 + $0x86c] sm:$0xf0]  ;;  %2471 = vmatpush.bf16.msra.mxu3 %v5064_v12 }
  0x1d   :  { %v5015_v20 = vld [vmem:[#allocation7 + $0xb40] sm:$0xf]  ;;  %v4632_v21 = vor.u32 %v5387_v19, %v4631_v18  ;;  %v5483_v22 = vld [vmem:[#allocation7 + $0xb6c] sm:$0xf0]  ;;  %2430 = vmatpush.bf16.msra.mxu0 %v3864_v16 }
  0x1e   :  { %v3815_v23 = vld [vmem:[#allocation7 + $0x1e0] sm:$0xf]  ;;  %v5183_v24 = vld [vmem:[#allocation7 + $0x20c] sm:$0xf0]  ;;  %v5016_v25 = vor.u32 %v5483_v22, %v5015_v20  ;;  %2444 = vmatpush.bf16.msra.mxu1 %v4248_v17 }
  0x1f   :  { %v4199_v26 = vld [vmem:[#allocation7 + $0x4e0] sm:$0xf]  ;;  %v5279_v27 = vld [vmem:[#allocation7 + $0x50c] sm:$0xf0]  ;;  %v3816_v29 = vor.u32 %v5183_v24, %v3815_v23  ;;  %2458 = vmatpush.bf16.msra.mxu2 %v4632_v21 }
  0x20   :  { %v4583_v28 = vld [vmem:[#allocation7 + $0x7e0] sm:$0xf]  ;;  %v5375_v30 = vld [vmem:[#allocation7 + $0x80c] sm:$0xf0]  ;;  %v4200_v33 = vor.u32 %v5279_v27, %v4199_v26  ;;  %2472 = vmatpush.bf16.msra.mxu3 %v5016_v25 }
  0x21   :  { %v4967_v31 = vld [vmem:[#allocation7 + $0xae0] sm:$0xf]  ;;  %v5471_v32 = vld [vmem:[#allocation7 + $0xb0c] sm:$0xf0]  ;;  %v4584_v34 = vor.u32 %v5375_v30, %v4583_v28  ;;  %2431 = vmatpush.bf16.msra.mxu0 %v3816_v29  ;;  %v5201_v28 = vld [vmem:[#allocation7 + $0x2a4] sm:$0xf] }
  0x22   :  { %v3767_v35 = vld [vmem:[#allocation7 + $0x180] sm:$0xf]  ;;  %v5171_v36 = vld [vmem:[#allocation7 + $0x1ac] sm:$0xf0]  ;;  %v4968_v38 = vor.u32 %v5471_v32, %v4967_v31  ;;  %2445 = vmatpush.bf16.msra.mxu1 %v4200_v33  ;;  %v3913_v29 = vld [vmem:[#allocation7 + $0x2d0] sm:$0xf0] }
  0x23   :  { %v4151_v37 = vld [vmem:[#allocation7 + $0x480] sm:$0xf]  ;;  %v5267_v39 = vld [vmem:[#allocation7 + $0x4ac] sm:$0xf0]  ;;  %v3768_v44 = vor.u32 %v5171_v36, %v3767_v35  ;;  %2459 = vmatpush.bf16.msra.mxu2 %v4584_v34  ;;  %v5297_v30 = vld [vmem:[#allocation7 + $0x5a4] sm:$0xf] }
  0x24   :  { %v4535_v40 = vld [vmem:[#allocation7 + $0x780] sm:$0xf]  ;;  %v5363_v41 = vld [vmem:[#allocation7 + $0x7ac] sm:$0xf0]  ;;  %v4152_v45 = vor.u32 %v5267_v39, %v4151_v37  ;;  %2473 = vmatpush.bf16.msra.mxu3 %v4968_v38  ;;  %v4297_v32 = vld [vmem:[#allocation7 + $0x5d0] sm:$0xf0] }
  0x25   :  { %v4919_v42 = vld [vmem:[#allocation7 + $0xa80] sm:$0xf]  ;;  %v5459_v43 = vld [vmem:[#allocation7 + $0xaac] sm:$0xf0]  ;;  %v4536_v46 = vor.u32 %v5363_v41, %v4535_v40  ;;  %2432 = vmatpush.bf16.msra.mxu0 %v3768_v44  ;;  %v5393_v33 = vld [vmem:[#allocation7 + $0x8a4] sm:$0xf]  ;;  %v3916_v40 = vor.u32 %v5201_v28, %v3913_v29  ;;  %v4300_v41 = vor.u32 %v5297_v30, %v4297_v32 }
  0x26   :  { %v3719_v47 = vld [vmem:[#allocation7 + $0x120] sm:$0xf]  ;;  %v5159_v48 = vld [vmem:[#allocation7 + $0x14c] sm:$0xf0]  ;;  %v4920_v50 = vor.u32 %v5459_v43, %v4919_v42  ;;  %2446 = vmatpush.bf16.msra.mxu1 %v4152_v45  ;;  %v4681_v34 = vld [vmem:[#allocation7 + $0x8d0] sm:$0xf0] }
  0x27   :  { %v4103_v49 = vld [vmem:[#allocation7 + $0x420] sm:$0xf]  ;;  %v5255_v51 = vld [vmem:[#allocation7 + $0x44c] sm:$0xf0]  ;;  %v3720_v56 = vor.u32 %v5159_v48, %v3719_v47  ;;  %2460 = vmatpush.bf16.msra.mxu2 %v4536_v46  ;;  %v5489_v37 = vld [vmem:[#allocation7 + $0xba4] sm:$0xf]  ;;  %v4684_v42 = vor.u32 %v5393_v33, %v4681_v34 }
  0x28   :  { %v4487_v52 = vld [vmem:[#allocation7 + $0x720] sm:$0xf]  ;;  %v5351_v53 = vld [vmem:[#allocation7 + $0x74c] sm:$0xf0]  ;;  %v4104_v57 = vor.u32 %v5255_v51, %v4103_v49  ;;  %2474 = vmatpush.bf16.msra.mxu3 %v4920_v50  ;;  %v5065_v38 = vld [vmem:[#allocation7 + $0xbd0] sm:$0xf0] }
  0x29   :  { %v4871_v54 = vld [vmem:[#allocation7 + $0xa20] sm:$0xf]  ;;  %v5447_v55 = vld [vmem:[#allocation7 + $0xa4c] sm:$0xf0]  ;;  %v4488_v58 = vor.u32 %v5351_v53, %v4487_v52  ;;  %2433 = vmatpush.bf16.msra.mxu0 %v3720_v56  ;;  %v5189_v43 = vld [vmem:[#allocation7 + $0x244] sm:$0xf]  ;;  %v5068_v46 = vor.u32 %v5489_v37, %v5065_v38 }
  0x2a   :  { %v3671_v59 = vld [vmem:[#allocation7 + $0xc0] sm:$0xf]  ;;  %v5147_v60 = vld [vmem:[#allocation7 + $0xec] sm:$0xf0]  ;;  %v4872_v62 = vor.u32 %v5447_v55, %v4871_v54  ;;  %2447 = vmatpush.bf16.msra.mxu1 %v4104_v57  ;;  %v3865_v44 = vld [vmem:[#allocation7 + $0x270] sm:$0xf0] }
  0x2b   :  { %v4055_v61 = vld [vmem:[#allocation7 + $0x3c0] sm:$0xf]  ;;  %v5243_v63 = vld [vmem:[#allocation7 + $0x3ec] sm:$0xf0]  ;;  %v3672_v4 = vor.u32 %v5147_v60, %v3671_v59  ;;  %2461 = vmatpush.bf16.msra.mxu2 %v4488_v58  ;;  %v5285_v45 = vld [vmem:[#allocation7 + $0x544] sm:$0xf]  ;;  %v3868_v52 = vor.u32 %v5189_v43, %v3865_v44 }
  0x2c   :  { %v4439_v0 = vld [vmem:[#allocation7 + $0x6c0] sm:$0xf]  ;;  %v5339_v1 = vld [vmem:[#allocation7 + $0x6ec] sm:$0xf0]  ;;  %v4056_v5 = vor.u32 %v5243_v63, %v4055_v61  ;;  %2475 = vmatpush.bf16.msra.mxu3 %v4872_v62  ;;  %v4249_v47 = vld [vmem:[#allocation7 + $0x570] sm:$0xf0] }
  0x2d   :  { %v4823_v2 = vld [vmem:[#allocation7 + $0x9c0] sm:$0xf]  ;;  %v5435_v3 = vld [vmem:[#allocation7 + $0x9ec] sm:$0xf0]  ;;  %v4440_v6 = vor.u32 %v5339_v1, %v4439_v0  ;;  %2434 = vmatpush.bf16.msra.mxu0 %v3672_v4  ;;  %v5381_v48 = vld [vmem:[#allocation7 + $0x844] sm:$0xf]  ;;  %v4252_v54 = vor.u32 %v5285_v45, %v4249_v47 }
  0x2e   :  { %v3623_v7 = vld [vmem:[#allocation7 + $0x60] sm:$0xf]  ;;  %v5135_v8 = vld [vmem:[#allocation7 + $0x8c] sm:$0xf0]  ;;  %v4824_v10 = vor.u32 %v5435_v3, %v4823_v2  ;;  %2448 = vmatpush.bf16.msra.mxu1 %v4056_v5  ;;  %v4633_v49 = vld [vmem:[#allocation7 + $0x870] sm:$0xf0] }
  0x2f   :  { %v4007_v9 = vld [vmem:[#allocation7 + $0x360] sm:$0xf]  ;;  %v5231_v11 = vld [vmem:[#allocation7 + $0x38c] sm:$0xf0]  ;;  %v3624_v16 = vor.u32 %v5135_v8, %v3623_v7  ;;  %2462 = vmatpush.bf16.msra.mxu2 %v4440_v6  ;;  %v5477_v50 = vld [vmem:[#allocation7 + $0xb44] sm:$0xf]  ;;  %v4636_v55 = vor.u32 %v5381_v48, %v4633_v49 }
  0x30   :  { %v4391_v12 = vld [vmem:[#allocation7 + $0x660] sm:$0xf]  ;;  %v5327_v13 = vld [vmem:[#allocation7 + $0x68c] sm:$0xf0]  ;;  %v4008_v19 = vor.u32 %v5231_v11, %v4007_v9  ;;  %2476 = vmatpush.bf16.msra.mxu3 %v4824_v10  ;;  %v5017_v51 = vld [vmem:[#allocation7 + $0xb70] sm:$0xf0] }
  0x31   :  { %v4775_v14 = vld [vmem:[#allocation7 + $0x960] sm:$0xf]  ;;  %v5423_v15 = vld [vmem:[#allocation7 + $0x98c] sm:$0xf0]  ;;  %v4392_v20 = vor.u32 %v5327_v13, %v4391_v12  ;;  %2435 = vmatpush.bf16.msra.mxu0 %v3624_v16  ;;  %v5177_v53 = vld [vmem:[#allocation7 + $0x1e4] sm:$0xf]  ;;  %v5020_v59 = vor.u32 %v5477_v50, %v5017_v51 }
  0x32   :  { %v3575_v17 = vld [vmem:[#allocation7] sm:$0xf]  ;;  %v5123_v18 = vld [vmem:[#allocation7 + $0x2c] sm:$0xf0]  ;;  %v4776_v24 = vor.u32 %v5423_v15, %v4775_v14  ;;  %2449 = vmatpush.bf16.msra.mxu1 %v4008_v19  ;;  %v3817_v56 = vld [vmem:[#allocation7 + $0x210] sm:$0xf0] }
  0x33   :  { %v3959_v21 = vld [vmem:[#allocation7 + $0x300] sm:$0xf]  ;;  %v5219_v22 = vld [vmem:[#allocation7 + $0x32c] sm:$0xf0]  ;;  %v3576_v31 = vor.u32 %v5123_v18, %v3575_v17  ;;  %2463 = vmatpush.bf16.msra.mxu2 %v4392_v20  ;;  %v5273_v57 = vld [vmem:[#allocation7 + $0x4e4] sm:$0xf]  ;;  %v3820_v2 = vor.u32 %v5177_v53, %v3817_v56 }
  0x34   :  { %v4343_v23 = vld [vmem:[#allocation7 + $0x600] sm:$0xf]  ;;  %v5315_v25 = vld [vmem:[#allocation7 + $0x62c] sm:$0xf0]  ;;  %v3960_v35 = vor.u32 %v5219_v22, %v3959_v21  ;;  %2477 = vmatpush.bf16.msra.mxu3 %v4776_v24  ;;  %v4201_v58 = vld [vmem:[#allocation7 + $0x510] sm:$0xf0] }
  0x35   :  { %v4727_v26 = vld [vmem:[#allocation7 + $0x900] sm:$0xf]  ;;  %v5411_v27 = vld [vmem:[#allocation7 + $0x92c] sm:$0xf0]  ;;  %v4344_v36 = vor.u32 %v5315_v25, %v4343_v23  ;;  %2436 = vmatpush.bf16.msra.mxu0 %v3576_v31  ;;  %v5369_v60 = vld [vmem:[#allocation7 + $0x7e4] sm:$0xf]  ;;  %v4204_v7 = vor.u32 %v5273_v57, %v4201_v58 }
  0x36   :  { %v4728_v39 = vor.u32 %v5411_v27, %v4727_v26  ;;  %2450 = vmatpush.bf16.msra.mxu1 %v3960_v35  ;;  %v4585_v61 = vld [vmem:[#allocation7 + $0x810] sm:$0xf0]  ;;  %v5465_v62 = vld [vmem:[#allocation7 + $0xae4] sm:$0xf] }
  0x37   :  { %2464 = vmatpush.bf16.msra.mxu2 %v4344_v36  ;;  %v4969_v63 = vld [vmem:[#allocation7 + $0xb10] sm:$0xf0]  ;;  %v5165_v0 = vld [vmem:[#allocation7 + $0x184] sm:$0xf]  ;;  %v4588_v8 = vor.u32 %v5369_v60, %v4585_v61 }
  0x38   :  { %2478 = vmatpush.bf16.msra.mxu3 %v4728_v39  ;;  %v3769_v1 = vld [vmem:[#allocation7 + $0x1b0] sm:$0xf0]  ;;  %v5261_v3 = vld [vmem:[#allocation7 + $0x484] sm:$0xf]  ;;  %v4972_v13 = vor.u32 %v5465_v62, %v4969_v63 }
  0x39   :  { %2485 = vmatpush.bf16.msrb.mxu0 %v3916_v40  ;;  %v4153_v4 = vld [vmem:[#allocation7 + $0x4b0] sm:$0xf0]  ;;  %v83_v10 = vld [vmem:[#allocation2] sm:$0xff]  ;;  %v3772_v21 = vor.u32 %v5165_v0, %v3769_v1  ;;  %v84_v27 = vld [vmem:[#allocation2 + $0x8] sm:$0xff] }
  0x3a   :  { %2499 = vmatpush.bf16.msrb.mxu1 %v4300_v41  ;;  %v85_v5 = vld [vmem:[#allocation2 + $0x10] sm:$0xff]  ;;  %v87_v11 = vld [vmem:[#allocation2 + $0x20] sm:$0xff]  ;;  %v86_v12 = vld [vmem:[#allocation2 + $0x18] sm:$0xff]  ;;  %v4156_v24 = vor.u32 %v5261_v3, %v4153_v4 }
  0x3b   :  { %2513 = vmatpush.bf16.msrb.mxu2 %v4684_v42  ;;  %v89_v6 = vld [vmem:[#allocation2 + $0x30] sm:$0xff]  ;;  %v5357_v14 = vld [vmem:[#allocation7 + $0x784] sm:$0xf]  ;;  %v5773_v16 = vpack.c.bf16 %v87_v11, %v83_v10  ;;  %v90_v17 = vld [vmem:[#allocation2 + $0x38] sm:$0xff] }
  0x3c   :  { %2527 = vmatpush.bf16.msrb.mxu3 %v5068_v46  ;;  %v5771_v9 = vpack.c.bf16 %v89_v6, %v85_v5  ;;  %v4537_v15 = vld [vmem:[#allocation7 + $0x7b0] sm:$0xf0]  ;;  %v5453_v18 = vld [vmem:[#allocation7 + $0xa84] sm:$0xf]  ;;  %v5776_v20 = vpack.c.bf16 %v90_v17, %v86_v12  ;;  %v5208_v10 = vld [vmem:[#allocation7 + $0x2d4] sm:$0xf0] }
  0x3d   :  { %2486 = vmatpush.bf16.msrb.mxu0 %v3868_v52  ;;  %v4921_v19 = vld [vmem:[#allocation7 + $0xab0] sm:$0xf0]  ;;  %v5153_v22 = vld [vmem:[#allocation7 + $0x124] sm:$0xf]  ;;  %v4540_v25 = vor.u32 %v5357_v14, %v4537_v15  ;;  %v4303_v11 = vld [vmem:[#allocation7 + $0x5a8] sm:$0xf] }
  0x3e   :  { %2500 = vmatpush.bf16.msrb.mxu1 %v4252_v54  ;;  %2465 = vmatmul.bf16.vlgmr.msra.gmra.mxu2 %v5771_v9  ;;  %v3721_v23 = vld [vmem:[#allocation7 + $0x150] sm:$0xf0]  ;;  %v5249_v26 = vld [vmem:[#allocation7 + $0x424] sm:$0xf]  ;;  %v4924_v29 = vor.u32 %v5453_v18, %v4921_v19  ;;  %v4687_v14 = vld [vmem:[#allocation7 + $0x8a8] sm:$0xf] }
  0x3f   :  { %2514 = vmatpush.bf16.msrb.mxu2 %v4636_v55  ;;  %v88_v28 = vld [vmem:[#allocation2 + $0x28] sm:$0xff]  ;;  %v4105_v30 = vld [vmem:[#allocation7 + $0x450] sm:$0xf0]  ;;  %2437 = vmatmul.bf16.vlgmr.msra.gmra.mxu0 %v5773_v16  ;;  %v3724_v36 = vor.u32 %v5153_v22, %v3721_v23  ;;  %v5400_v15 = vld [vmem:[#allocation7 + $0x8d4] sm:$0xf0] }
  0x40   :  { %2528 = vmatpush.bf16.msrb.mxu3 %v5020_v59  ;;  %v5345_v31 = vld [vmem:[#allocation7 + $0x724] sm:$0xf]  ;;  %v4489_v32 = vld [vmem:[#allocation7 + $0x750] sm:$0xf0]  ;;  %v5779_v33 = vpack.c.bf16 %v88_v28, %v84_v27  ;;  %v4108_v37 = vor.u32 %v5249_v26, %v4105_v30  ;;  %v5071_v19 = vld [vmem:[#allocation7 + $0xba8] sm:$0xf] }
  0x41   :  { %2487 = vmatpush.bf16.msrb.mxu0 %v3820_v2  ;;  %v5441_v34 = vld [vmem:[#allocation7 + $0xa24] sm:$0xf]  ;;  %v4873_v35 = vld [vmem:[#allocation7 + $0xa50] sm:$0xf0]  ;;  %2479 = vmatmul.bf16.vlgmr.msra.gmra.mxu3 %v5776_v20  ;;  %v4492_v38 = vor.u32 %v5345_v31, %v4489_v32  ;;  %v3871_v26 = vld [vmem:[#allocation7 + $0x248] sm:$0xf] }
  0x42   :  { %2501 = vmatpush.bf16.msrb.mxu1 %v4204_v7  ;;  %v5141_v39 = vld [vmem:[#allocation7 + $0xc4] sm:$0xf]  ;;  %v3673_v40 = vld [vmem:[#allocation7 + $0xf0] sm:$0xf0]  ;;  %v4876_v42 = vor.u32 %v5441_v34, %v4873_v35  ;;  %v5196_v27 = vld [vmem:[#allocation7 + $0x274] sm:$0xf0] }
  0x43   :  { %2515 = vmatpush.bf16.msrb.mxu2 %v4588_v8  ;;  %2451 = vmatmul.bf16.vlgmr.msra.gmra.mxu1 %v5779_v33  ;;  %v5237_v41 = vld [vmem:[#allocation7 + $0x3c4] sm:$0xf]  ;;  %v4057_v43 = vld [vmem:[#allocation7 + $0x3f0] sm:$0xf0]  ;;  %v3676_v48 = vor.u32 %v5141_v39, %v3673_v40  ;;  %v3919_v8 = vld [vmem:[#allocation7 + $0x2a8] sm:$0xf] }
  0x44   :  { %2529 = vmatpush.bf16.msrb.mxu3 %v4972_v13  ;;  %v5333_v44 = vld [vmem:[#allocation7 + $0x6c4] sm:$0xf]  ;;  %v4441_v45 = vld [vmem:[#allocation7 + $0x6f0] sm:$0xf0]  ;;  %v4060_v49 = vor.u32 %v5237_v41, %v4057_v43  ;;  %v5304_v13 = vld [vmem:[#allocation7 + $0x5d4] sm:$0xf0]  ;;  %v3920_v23 = vor.u32 %v5208_v10, %v3919_v8 }
  0x45   :  { %2488 = vmatpush.bf16.msrb.mxu0 %v3772_v21  ;;  %v5429_v46 = vld [vmem:[#allocation7 + $0x9c4] sm:$0xf]  ;;  %v4825_v47 = vld [vmem:[#allocation7 + $0x9f0] sm:$0xf0]  ;;  %v4444_v50 = vor.u32 %v5333_v44, %v4441_v45  ;;  %v5496_v21 = vld [vmem:[#allocation7 + $0xbd4] sm:$0xf0] }
  0x46   :  { %2502 = vmatpush.bf16.msrb.mxu1 %v4156_v24  ;;  %v5129_v51 = vld [vmem:[#allocation7 + $0x64] sm:$0xf]  ;;  %v3625_v52 = vld [vmem:[#allocation7 + $0x90] sm:$0xf0]  ;;  %v4828_v54 = vor.u32 %v5429_v46, %v4825_v47  ;;  %v4304_v24 = vor.u32 %v5304_v13, %v4303_v11  ;;  %v4255_v28 = vld [vmem:[#allocation7 + $0x548] sm:$0xf] }
  0x47   :  { %2516 = vmatpush.bf16.msrb.mxu2 %v4540_v25  ;;  %v5225_v53 = vld [vmem:[#allocation7 + $0x364] sm:$0xf]  ;;  %v4009_v55 = vld [vmem:[#allocation7 + $0x390] sm:$0xf0]  ;;  %v3628_v60 = vor.u32 %v5129_v51, %v3625_v52  ;;  %v4688_v25 = vor.u32 %v5400_v15, %v4687_v14  ;;  %v5292_v30 = vld [vmem:[#allocation7 + $0x574] sm:$0xf0] }
  0x48   :  { %2530 = vmatpush.bf16.msrb.mxu3 %v4924_v29  ;;  %v5321_v56 = vld [vmem:[#allocation7 + $0x664] sm:$0xf]  ;;  %v4393_v57 = vld [vmem:[#allocation7 + $0x690] sm:$0xf0]  ;;  %v4012_v63 = vor.u32 %v5225_v53, %v4009_v55  ;;  %v5072_v29 = vor.u32 %v5496_v21, %v5071_v19  ;;  %v4639_v31 = vld [vmem:[#allocation7 + $0x848] sm:$0xf] }
  0x49   :  { %2489 = vmatpush.bf16.msrb.mxu0 %v3724_v36  ;;  %v5417_v58 = vld [vmem:[#allocation7 + $0x964] sm:$0xf]  ;;  %v4777_v59 = vld [vmem:[#allocation7 + $0x990] sm:$0xf0]  ;;  %v4396_v0 = vor.u32 %v5321_v56, %v4393_v57  ;;  %v5388_v32 = vld [vmem:[#allocation7 + $0x874] sm:$0xf0]  ;;  %v3872_v36 = vor.u32 %v5196_v27, %v3871_v26 }
  0x4a   :  { %2503 = vmatpush.bf16.msrb.mxu1 %v4108_v37  ;;  %v5117_v61 = vld [vmem:[#allocation7 + $0x4] sm:$0xf]  ;;  %v3577_v62 = vld [vmem:[#allocation7 + $0x30] sm:$0xf0]  ;;  %v4780_v4 = vor.u32 %v5417_v58, %v4777_v59  ;;  %v5023_v34 = vld [vmem:[#allocation7 + $0xb48] sm:$0xf]  ;;  %v4256_v37 = vor.u32 %v5292_v30, %v4255_v28 }
  0x4b   :  { %2517 = vmatpush.bf16.msrb.mxu2 %v4492_v38  ;;  %v5213_v1 = vld [vmem:[#allocation7 + $0x304] sm:$0xf]  ;;  %v3961_v2 = vld [vmem:[#allocation7 + $0x330] sm:$0xf0]  ;;  %v3580_v12 = vor.u32 %v5117_v61, %v3577_v62  ;;  %v5484_v35 = vld [vmem:[#allocation7 + $0xb74] sm:$0xf0]  ;;  %v4640_v38 = vor.u32 %v5388_v32, %v4639_v31 }
  0x4c   :  { %2531 = vmatpush.bf16.msrb.mxu3 %v4876_v42  ;;  %v5309_v3 = vld [vmem:[#allocation7 + $0x604] sm:$0xf]  ;;  %v4345_v5 = vld [vmem:[#allocation7 + $0x630] sm:$0xf0]  ;;  %v3964_v17 = vor.u32 %v5213_v1, %v3961_v2  ;;  %v3823_v39 = vld [vmem:[#allocation7 + $0x1e8] sm:$0xf]  ;;  %v5024_v42 = vor.u32 %v5484_v35, %v5023_v34 }
  0x4d   :  { %2490 = vmatpush.bf16.msrb.mxu0 %v3676_v48  ;;  %v5405_v6 = vld [vmem:[#allocation7 + $0x904] sm:$0xf]  ;;  %v4729_v7 = vld [vmem:[#allocation7 + $0x930] sm:$0xf0]  ;;  %v4348_v18 = vor.u32 %v5309_v3, %v4345_v5  ;;  %v5184_v40 = vld [vmem:[#allocation7 + $0x214] sm:$0xf0] }
  0x4e   :  { %2504 = vmatpush.bf16.msrb.mxu1 %v4060_v49  ;;  %v4732_v22 = vor.u32 %v5405_v6, %v4729_v7  ;;  %v4207_v41 = vld [vmem:[#allocation7 + $0x4e8] sm:$0xf]  ;;  %v5280_v43 = vld [vmem:[#allocation7 + $0x514] sm:$0xf0]  ;;  %v3824_v48 = vor.u32 %v5184_v40, %v3823_v39 }
  0x4f   :  { %2518 = vmatpush.bf16.msrb.mxu2 %v4444_v50  ;;  %v4591_v44 = vld [vmem:[#allocation7 + $0x7e8] sm:$0xf]  ;;  %v5376_v45 = vld [vmem:[#allocation7 + $0x814] sm:$0xf0]  ;;  %v4208_v49 = vor.u32 %v5280_v43, %v4207_v41 }
  0x50   :  { %2532 = vmatpush.bf16.msrb.mxu3 %v4828_v54  ;;  %v4975_v46 = vld [vmem:[#allocation7 + $0xae8] sm:$0xf]  ;;  %v5472_v47 = vld [vmem:[#allocation7 + $0xb14] sm:$0xf0]  ;;  %v4592_v50 = vor.u32 %v5376_v45, %v4591_v44 }
  0x51   :  { %2491 = vmatpush.bf16.msrb.mxu0 %v3628_v60  ;;  %v3775_v51 = vld [vmem:[#allocation7 + $0x188] sm:$0xf]  ;;  %v5172_v52 = vld [vmem:[#allocation7 + $0x1b4] sm:$0xf0]  ;;  %v4976_v54 = vor.u32 %v5472_v47, %v4975_v46 }
  0x52   :  { %2505 = vmatpush.bf16.msrb.mxu1 %v4012_v63  ;;  %v4159_v53 = vld [vmem:[#allocation7 + $0x488] sm:$0xf]  ;;  %v5268_v55 = vld [vmem:[#allocation7 + $0x4b4] sm:$0xf0]  ;;  %v3776_v60 = vor.u32 %v5172_v52, %v3775_v51  ;;  %v4305_v52 = vld [vmem:[#allocation7 + $0x5d8] sm:$0xf0] }
  0x53   :  { %2519 = vmatpush.bf16.msrb.mxu2 %v4396_v0  ;;  %v4543_v56 = vld [vmem:[#allocation7 + $0x788] sm:$0xf]  ;;  %v5364_v57 = vld [vmem:[#allocation7 + $0x7b4] sm:$0xf0]  ;;  %v4160_v61 = vor.u32 %v5268_v55, %v4159_v53  ;;  %v5394_v53 = vld [vmem:[#allocation7 + $0x8ac] sm:$0xf] }
  0x54   :  { %2533 = vmatpush.bf16.msrb.mxu3 %v4780_v4  ;;  %v4927_v58 = vld [vmem:[#allocation7 + $0xa88] sm:$0xf]  ;;  %v5460_v59 = vld [vmem:[#allocation7 + $0xab4] sm:$0xf0]  ;;  %v4544_v62 = vor.u32 %v5364_v57, %v4543_v56  ;;  %v5490_v57 = vld [vmem:[#allocation7 + $0xbac] sm:$0xf] }
  0x55   :  { %2492 = vmatpush.bf16.msrb.mxu0 %v3580_v12  ;;  %v3727_v63 = vld [vmem:[#allocation7 + $0x128] sm:$0xf]  ;;  %v5160_v0 = vld [vmem:[#allocation7 + $0x154] sm:$0xf0]  ;;  %v4928_v2 = vor.u32 %v5460_v59, %v4927_v58  ;;  %v5073_v58 = vld [vmem:[#allocation7 + $0xbd8] sm:$0xf0] }
  0x56   :  { %2506 = vmatpush.bf16.msrb.mxu1 %v3964_v17  ;;  %v4111_v1 = vld [vmem:[#allocation7 + $0x428] sm:$0xf]  ;;  %v5256_v3 = vld [vmem:[#allocation7 + $0x454] sm:$0xf0]  ;;  %v3728_v8 = vor.u32 %v5160_v0, %v3727_v63  ;;  %v5190_v63 = vld [vmem:[#allocation7 + $0x24c] sm:$0xf] }
  0x57   :  { %2520 = vmatpush.bf16.msrb.mxu2 %v4348_v18  ;;  %v4495_v4 = vld [vmem:[#allocation7 + $0x728] sm:$0xf]  ;;  %v5352_v5 = vld [vmem:[#allocation7 + $0x754] sm:$0xf0]  ;;  %v4112_v10 = vor.u32 %v5256_v3, %v4111_v1  ;;  %v3873_v0 = vld [vmem:[#allocation7 + $0x278] sm:$0xf0] }
  0x58   :  { %2534 = vmatpush.bf16.msrb.mxu3 %v4732_v22  ;;  %2493 = vmatmul.bf16.vlgmr.msrb.gmra.mxu0 %v5773_v16  ;;  %v4879_v6 = vld [vmem:[#allocation7 + $0xa28] sm:$0xf]  ;;  %v5448_v7 = vld [vmem:[#allocation7 + $0xa54] sm:$0xf0]  ;;  %v4496_v11 = vor.u32 %v5352_v5, %v4495_v4  ;;  %v5286_v1 = vld [vmem:[#allocation7 + $0x54c] sm:$0xf] }
  0x59   :  { %2541 = vmatpush.bf16.msra.mxu0 %v3920_v23  ;;  %2507 = vmatmul.bf16.vlgmr.msrb.gmra.mxu1 %v5779_v33  ;;  %v3679_v12 = vld [vmem:[#allocation7 + $0xc8] sm:$0xf]  ;;  %v5148_v13 = vld [vmem:[#allocation7 + $0xf4] sm:$0xf0]  ;;  %v4880_v15 = vor.u32 %v5448_v7, %v4879_v6  ;;  %v4257_v3 = vld [vmem:[#allocation7 + $0x578] sm:$0xf0] }
  0x5a   :  { %2555 = vmatpush.bf16.msra.mxu1 %v4304_v24  ;;  %2521 = vmatmul.bf16.vlgmr.msrb.gmra.mxu2 %v5771_v9  ;;  %v4063_v14 = vld [vmem:[#allocation7 + $0x3c8] sm:$0xf]  ;;  %v5244_v17 = vld [vmem:[#allocation7 + $0x3f4] sm:$0xf0]  ;;  %v3680_v23 = vor.u32 %v5148_v13, %v3679_v12  ;;  %v5382_v4 = vld [vmem:[#allocation7 + $0x84c] sm:$0xf] }
  0x5b   :  { %2569 = vmatpush.bf16.msra.mxu2 %v4688_v25  ;;  %2535 = vmatmul.bf16.vlgmr.msrb.gmra.mxu3 %v5776_v20  ;;  %v4447_v18 = vld [vmem:[#allocation7 + $0x6c8] sm:$0xf]  ;;  %v5340_v19 = vld [vmem:[#allocation7 + $0x6f4] sm:$0xf0]  ;;  %v4064_v24 = vor.u32 %v5244_v17, %v4063_v14  ;;  %v4641_v5 = vld [vmem:[#allocation7 + $0x878] sm:$0xf0] }
  0x5c   :  { %2583 = vmatpush.bf16.msra.mxu3 %v5072_v29  ;;  %v4831_v21 = vld [vmem:[#allocation7 + $0x9c8] sm:$0xf]  ;;  %v5436_v22 = vld [vmem:[#allocation7 + $0x9f4] sm:$0xf0]  ;;  %v4448_v25 = vor.u32 %v5340_v19, %v4447_v18  ;;  %v5478_v6 = vld [vmem:[#allocation7 + $0xb4c] sm:$0xf] }
  0x5d   :  { %2542 = vmatpush.bf16.msra.mxu0 %v3872_v36  ;;  %v3631_v26 = vld [vmem:[#allocation7 + $0x68] sm:$0xf]  ;;  %v5136_v27 = vld [vmem:[#allocation7 + $0x94] sm:$0xf0]  ;;  %v4832_v29 = vor.u32 %v5436_v22, %v4831_v21  ;;  %v5025_v7 = vld [vmem:[#allocation7 + $0xb78] sm:$0xf0] }
  0x5e   :  { %2556 = vmatpush.bf16.msra.mxu1 %v4256_v37  ;;  %v4015_v28 = vld [vmem:[#allocation7 + $0x368] sm:$0xf]  ;;  %v5232_v30 = vld [vmem:[#allocation7 + $0x394] sm:$0xf0]  ;;  %v3632_v36 = vor.u32 %v5136_v27, %v3631_v26  ;;  %v5178_v12 = vld [vmem:[#allocation7 + $0x1ec] sm:$0xf] }
  0x5f   :  { %2570 = vmatpush.bf16.msra.mxu2 %v4640_v38  ;;  %v4399_v31 = vld [vmem:[#allocation7 + $0x668] sm:$0xf]  ;;  %v5328_v32 = vld [vmem:[#allocation7 + $0x694] sm:$0xf0]  ;;  %v4016_v39 = vor.u32 %v5232_v30, %v4015_v28  ;;  %v3825_v13 = vld [vmem:[#allocation7 + $0x218] sm:$0xf0] }
  0x60   :  { %2584 = vmatpush.bf16.msra.mxu3 %v5024_v42  ;;  %v4783_v34 = vld [vmem:[#allocation7 + $0x968] sm:$0xf]  ;;  %v5424_v35 = vld [vmem:[#allocation7 + $0x994] sm:$0xf0]  ;;  %v4400_v40 = vor.u32 %v5328_v32, %v4399_v31  ;;  %v5274_v14 = vld [vmem:[#allocation7 + $0x4ec] sm:$0xf] }
  0x61   :  { %2543 = vmatpush.bf16.msra.mxu0 %v3824_v48  ;;  %v3583_v37 = vld [vmem:[#allocation7 + $0x8] sm:$0xf]  ;;  %v5124_v38 = vld [vmem:[#allocation7 + $0x34] sm:$0xf0]  ;;  %v4784_v44 = vor.u32 %v5424_v35, %v4783_v34  ;;  %v5202_v48 = vld [vmem:[#allocation7 + $0x2ac] sm:$0xf] }
  0x62   :  { %2557 = vmatpush.bf16.msra.mxu1 %v4208_v49  ;;  %v3967_v41 = vld [vmem:[#allocation7 + $0x308] sm:$0xf]  ;;  %v5220_v42 = vld [vmem:[#allocation7 + $0x334] sm:$0xf0]  ;;  %v3921_v49 = vld [vmem:[#allocation7 + $0x2d8] sm:$0xf0]  ;;  %v3584_v51 = vor.u32 %v5124_v38, %v3583_v37 }
  0x63   :  { %2571 = vmatpush.bf16.msra.mxu2 %v4592_v50  ;;  %v4351_v43 = vld [vmem:[#allocation7 + $0x608] sm:$0xf]  ;;  %v5316_v45 = vld [vmem:[#allocation7 + $0x634] sm:$0xf0]  ;;  %v5298_v50 = vld [vmem:[#allocation7 + $0x5ac] sm:$0xf]  ;;  %v3968_v55 = vor.u32 %v5220_v42, %v3967_v41 }
  0x64   :  { %2585 = vmatpush.bf16.msra.mxu3 %v4976_v54  ;;  %v4735_v46 = vld [vmem:[#allocation7 + $0x908] sm:$0xf]  ;;  %v5412_v47 = vld [vmem:[#allocation7 + $0x934] sm:$0xf0]  ;;  %v4689_v54 = vld [vmem:[#allocation7 + $0x8d8] sm:$0xf0]  ;;  %v4352_v56 = vor.u32 %v5316_v45, %v4351_v43 }
  0x65   :  { %2544 = vmatpush.bf16.msra.mxu0 %v3776_v60  ;;  %v4736_v59 = vor.u32 %v5412_v47, %v4735_v46  ;;  %v3924_v60 = vor.u32 %v5202_v48, %v3921_v49  ;;  %v4209_v17 = vld [vmem:[#allocation7 + $0x518] sm:$0xf0]  ;;  %v5370_v18 = vld [vmem:[#allocation7 + $0x7ec] sm:$0xf] }
  0x66   :  { %2558 = vmatpush.bf16.msra.mxu1 %v4160_v61  ;;  %v4308_v61 = vor.u32 %v5298_v50, %v4305_v52  ;;  %v4593_v19 = vld [vmem:[#allocation7 + $0x818] sm:$0xf0]  ;;  %v5466_v21 = vld [vmem:[#allocation7 + $0xaec] sm:$0xf] }
  0x67   :  { %2572 = vmatpush.bf16.msra.mxu2 %v4544_v62  ;;  %v4692_v62 = vor.u32 %v5394_v53, %v4689_v54  ;;  %v4977_v22 = vld [vmem:[#allocation7 + $0xb18] sm:$0xf0]  ;;  %v5166_v26 = vld [vmem:[#allocation7 + $0x18c] sm:$0xf] }
  0x68   :  { %2586 = vmatpush.bf16.msra.mxu3 %v4928_v2  ;;  %v5076_v2 = vor.u32 %v5490_v57, %v5073_v58  ;;  %v3777_v27 = vld [vmem:[#allocation7 + $0x1b8] sm:$0xf0]  ;;  %v5262_v28 = vld [vmem:[#allocation7 + $0x48c] sm:$0xf] }
  0x69   :  { %2545 = vmatpush.bf16.msra.mxu0 %v3728_v8  ;;  %v3876_v8 = vor.u32 %v5190_v63, %v3873_v0  ;;  %v4161_v30 = vld [vmem:[#allocation7 + $0x4b8] sm:$0xf0]  ;;  %v5358_v31 = vld [vmem:[#allocation7 + $0x78c] sm:$0xf] }
  0x6a   :  { %2559 = vmatpush.bf16.msra.mxu1 %v4112_v10  ;;  %v4260_v10 = vor.u32 %v5286_v1, %v4257_v3  ;;  %v4545_v32 = vld [vmem:[#allocation7 + $0x7b8] sm:$0xf0]  ;;  %v5454_v34 = vld [vmem:[#allocation7 + $0xa8c] sm:$0xf]  ;;  %v4164_v37 = vor.u32 %v5262_v28, %v4161_v30  ;;  %v4695_v28 = vld [vmem:[#allocation7 + $0x8b0] sm:$0xf] }
  0x6b   :  { %2573 = vmatpush.bf16.msra.mxu2 %v4496_v11  ;;  %v4644_v11 = vor.u32 %v5382_v4, %v4641_v5  ;;  %v4929_v35 = vld [vmem:[#allocation7 + $0xab8] sm:$0xf0]  ;;  %v4548_v38 = vor.u32 %v5358_v31, %v4545_v32  ;;  %v5250_v41 = vld [vmem:[#allocation7 + $0x42c] sm:$0xf]  ;;  %v5079_v32 = vld [vmem:[#allocation7 + $0xbb0] sm:$0xf] }
  0x6c   :  { %2587 = vmatpush.bf16.msra.mxu3 %v4880_v15  ;;  %v5028_v15 = vor.u32 %v5478_v6, %v5025_v7  ;;  %v4932_v42 = vor.u32 %v5454_v34, %v4929_v35  ;;  %v4113_v43 = vld [vmem:[#allocation7 + $0x458] sm:$0xf0]  ;;  %v5442_v46 = vld [vmem:[#allocation7 + $0xa2c] sm:$0xf]  ;;  %v5497_v34 = vld [vmem:[#allocation7 + $0xbdc] sm:$0xf0] }
  0x6d   :  { %2546 = vmatpush.bf16.msra.mxu0 %v3680_v23  ;;  %v3828_v23 = vor.u32 %v5178_v12, %v3825_v13  ;;  %v4497_v45 = vld [vmem:[#allocation7 + $0x758] sm:$0xf0]  ;;  %v4116_v49 = vor.u32 %v5250_v41, %v4113_v43  ;;  %v5238_v53 = vld [vmem:[#allocation7 + $0x3cc] sm:$0xf]  ;;  %v4263_v41 = vld [vmem:[#allocation7 + $0x550] sm:$0xf] }
  0x6e   :  { %2560 = vmatpush.bf16.msra.mxu1 %v4064_v24  ;;  %v4212_v24 = vor.u32 %v5274_v14, %v4209_v17  ;;  %v4881_v47 = vld [vmem:[#allocation7 + $0xa58] sm:$0xf0]  ;;  %v5430_v58 = vld [vmem:[#allocation7 + $0x9cc] sm:$0xf]  ;;  %v5293_v43 = vld [vmem:[#allocation7 + $0x57c] sm:$0xf0] }
  0x6f   :  { %2574 = vmatpush.bf16.msra.mxu2 %v4448_v25  ;;  %v4596_v25 = vor.u32 %v5370_v18, %v4593_v19  ;;  %v3681_v52 = vld [vmem:[#allocation7 + $0xf8] sm:$0xf0]  ;;  %v4884_v54 = vor.u32 %v5442_v46, %v4881_v47  ;;  %v5130_v63 = vld [vmem:[#allocation7 + $0x6c] sm:$0xf]  ;;  %v5031_v46 = vld [vmem:[#allocation7 + $0xb50] sm:$0xf] }
  0x70   :  { %2588 = vmatpush.bf16.msra.mxu3 %v4832_v29  ;;  %v4980_v29 = vor.u32 %v5466_v21, %v4977_v22  ;;  %v4449_v57 = vld [vmem:[#allocation7 + $0x6f8] sm:$0xf0]  ;;  %v5226_v1 = vld [vmem:[#allocation7 + $0x36c] sm:$0xf]  ;;  %v5485_v47 = vld [vmem:[#allocation7 + $0xb7c] sm:$0xf0] }
  0x71   :  { %2547 = vmatpush.bf16.msra.mxu0 %v3632_v36  ;;  %v3780_v36 = vor.u32 %v5166_v26, %v3777_v27  ;;  %v3633_v0 = vld [vmem:[#allocation7 + $0x98] sm:$0xf0]  ;;  %v5322_v4 = vld [vmem:[#allocation7 + $0x66c] sm:$0xf]  ;;  %v5305_v27 = vld [vmem:[#allocation7 + $0x5dc] sm:$0xf0] }
  0x72   :  { %2561 = vmatpush.bf16.msra.mxu1 %v4016_v39  ;;  %v5154_v39 = vld [vmem:[#allocation7 + $0x12c] sm:$0xf]  ;;  %v4017_v3 = vld [vmem:[#allocation7 + $0x398] sm:$0xf0] }
  0x73   :  { %2575 = vmatpush.bf16.msra.mxu2 %v4400_v40  ;;  %v3729_v40 = vld [vmem:[#allocation7 + $0x158] sm:$0xf0]  ;;  %v5418_v6 = vld [vmem:[#allocation7 + $0x96c] sm:$0xf]  ;;  %v4020_v12 = vor.u32 %v5226_v1, %v4017_v3  ;;  %v4167_v1 = vld [vmem:[#allocation7 + $0x490] sm:$0xf] }
  0x74   :  { %2589 = vmatpush.bf16.msra.mxu3 %v4784_v44  ;;  %v5346_v44 = vld [vmem:[#allocation7 + $0x72c] sm:$0xf]  ;;  %v3732_v48 = vor.u32 %v5154_v39, %v3729_v40  ;;  %v4401_v5 = vld [vmem:[#allocation7 + $0x698] sm:$0xf0]  ;;  %v3879_v39 = vld [vmem:[#allocation7 + $0x250] sm:$0xf] }
  0x75   :  { %2548 = vmatpush.bf16.msra.mxu0 %v3584_v51  ;;  %v4500_v50 = vor.u32 %v5346_v44, %v4497_v45  ;;  %v5142_v51 = vld [vmem:[#allocation7 + $0xcc] sm:$0xf]  ;;  %v4785_v7 = vld [vmem:[#allocation7 + $0x998] sm:$0xf0]  ;;  %v4404_v13 = vor.u32 %v5322_v4, %v4401_v5  ;;  %v5197_v40 = vld [vmem:[#allocation7 + $0x27c] sm:$0xf0] }
  0x76   :  { %2562 = vmatpush.bf16.msra.mxu1 %v3968_v55  ;;  %v4065_v55 = vld [vmem:[#allocation7 + $0x3f8] sm:$0xf0]  ;;  %v5214_v14 = vld [vmem:[#allocation7 + $0x30c] sm:$0xf]  ;;  %v4788_v18 = vor.u32 %v5418_v6, %v4785_v7  ;;  %v4647_v44 = vld [vmem:[#allocation7 + $0x850] sm:$0xf] }
  0x77   :  { %2576 = vmatpush.bf16.msra.mxu2 %v4352_v56  ;;  %v5334_v56 = vld [vmem:[#allocation7 + $0x6cc] sm:$0xf]  ;;  %v4353_v19 = vld [vmem:[#allocation7 + $0x638] sm:$0xf0]  ;;  %v5389_v45 = vld [vmem:[#allocation7 + $0x87c] sm:$0xf0] }
  0x78   :  { %2590 = vmatpush.bf16.msra.mxu3 %v4736_v59  ;;  %2549 = vmatmul.bf16.vlgmr.msra.gmra.mxu0 %v5773_v16  ;;  %v4833_v59 = vld [vmem:[#allocation7 + $0x9f8] sm:$0xf0]  ;;  %v5310_v17 = vld [vmem:[#allocation7 + $0x60c] sm:$0xf]  ;;  %v5269_v3 = vld [vmem:[#allocation7 + $0x4bc] sm:$0xf0] }
  0x79   :  { %2597 = vmatpush.bf16.msrb.mxu0 %v3924_v60  ;;  %2563 = vmatmul.bf16.vlgmr.msra.gmra.mxu1 %v5779_v33  ;;  %v3684_v60 = vor.u32 %v5142_v51, %v3681_v52  ;;  %v5406_v21 = vld [vmem:[#allocation7 + $0x90c] sm:$0xf]  ;;  %v4737_v22 = vld [vmem:[#allocation7 + $0x938] sm:$0xf0]  ;;  %v4356_v31 = vor.u32 %v5310_v17, %v4353_v19  ;;  %v3831_v51 = vld [vmem:[#allocation7 + $0x1f0] sm:$0xf] }
  0x7a   :  { %2611 = vmatpush.bf16.msrb.mxu1 %v4308_v61  ;;  %2577 = vmatmul.bf16.vlgmr.msra.gmra.mxu2 %v5771_v9  ;;  %v4068_v61 = vor.u32 %v5238_v53, %v4065_v55  ;;  %v4740_v35 = vor.u32 %v5406_v21, %v4737_v22  ;;  %v5185_v52 = vld [vmem:[#allocation7 + $0x21c] sm:$0xf0]  ;;  %v4215_v53 = vld [vmem:[#allocation7 + $0x4f0] sm:$0xf] }
  0x7b   :  { %2625 = vmatpush.bf16.msrb.mxu2 %v4692_v62  ;;  %2591 = vmatmul.bf16.vlgmr.msra.gmra.mxu3 %v5776_v20  ;;  %v4452_v62 = vor.u32 %v5334_v56, %v4449_v57  ;;  %v5281_v55 = vld [vmem:[#allocation7 + $0x51c] sm:$0xf0]  ;;  %v4599_v56 = vld [vmem:[#allocation7 + $0x7f0] sm:$0xf] }
  0x7c   :  { %2639 = vmatpush.bf16.msrb.mxu3 %v5076_v2  ;;  %v4836_v2 = vor.u32 %v5430_v58, %v4833_v59  ;;  %v5377_v57 = vld [vmem:[#allocation7 + $0x81c] sm:$0xf0]  ;;  %v4983_v58 = vld [vmem:[#allocation7 + $0xaf0] sm:$0xf] }
  0x7d   :  { %2598 = vmatpush.bf16.msrb.mxu0 %v3876_v8  ;;  %v3636_v8 = vor.u32 %v5130_v63, %v3633_v0  ;;  %v5473_v59 = vld [vmem:[#allocation7 + $0xb1c] sm:$0xf0]  ;;  %v3783_v63 = vld [vmem:[#allocation7 + $0x190] sm:$0xf] }
  0x7e   :  { %2612 = vmatpush.bf16.msrb.mxu1 %v4260_v10  ;;  %v5118_v10 = vld [vmem:[#allocation7 + $0xc] sm:$0xf]  ;;  %v5173_v0 = vld [vmem:[#allocation7 + $0x1bc] sm:$0xf0]  ;;  %v4551_v4 = vld [vmem:[#allocation7 + $0x790] sm:$0xf] }
  0x7f   :  { %2626 = vmatpush.bf16.msrb.mxu2 %v4644_v11  ;;  %v3585_v11 = vld [vmem:[#allocation7 + $0x38] sm:$0xf0]  ;;  %v5365_v5 = vld [vmem:[#allocation7 + $0x7bc] sm:$0xf0]  ;;  %v4935_v6 = vld [vmem:[#allocation7 + $0xa90] sm:$0xf] }
  0x80   :  { %2640 = vmatpush.bf16.msrb.mxu3 %v5028_v15  ;;  %v3969_v15 = vld [vmem:[#allocation7 + $0x338] sm:$0xf0]  ;;  %v3588_v26 = vor.u32 %v5118_v10, %v3585_v11  ;;  %v5461_v7 = vld [vmem:[#allocation7 + $0xabc] sm:$0xf0]  ;;  %v4168_v10 = vor.u32 %v5269_v3, %v4167_v1  ;;  %v4552_v11 = vor.u32 %v5365_v5, %v4551_v4  ;;  %v4887_v21 = vld [vmem:[#allocation7 + $0xa30] sm:$0xf] }
  0x81   :  { %2599 = vmatpush.bf16.msrb.mxu0 %v3828_v23  ;;  %v3927_v23 = vld [vmem:[#allocation7 + $0x2b0] sm:$0xf]  ;;  %v3972_v30 = vor.u32 %v5214_v14, %v3969_v15  ;;  %v4936_v15 = vor.u32 %v5461_v7, %v4935_v6  ;;  %v5257_v17 = vld [vmem:[#allocation7 + $0x45c] sm:$0xf0]  ;;  %v5395_v1 = vld [vmem:[#allocation7 + $0x8b4] sm:$0xf] }
  0x82   :  { %2613 = vmatpush.bf16.msrb.mxu1 %v4212_v24  ;;  %v5209_v24 = vld [vmem:[#allocation7 + $0x2dc] sm:$0xf0]  ;;  %v4119_v14 = vld [vmem:[#allocation7 + $0x430] sm:$0xf]  ;;  %v5491_v5 = vld [vmem:[#allocation7 + $0xbb4] sm:$0xf] }
  0x83   :  { %2627 = vmatpush.bf16.msrb.mxu2 %v4596_v25  ;;  %v4311_v25 = vld [vmem:[#allocation7 + $0x5b0] sm:$0xf]  ;;  %v5353_v19 = vld [vmem:[#allocation7 + $0x75c] sm:$0xf0]  ;;  %v5081_v6 = vld [vmem:[#allocation7 + $0xbe0] sm:$0xf0] }
  0x84   :  { %2641 = vmatpush.bf16.msrb.mxu3 %v4980_v29  ;;  %v5401_v29 = vld [vmem:[#allocation7 + $0x8dc] sm:$0xf0] }
  0x85   :  { %2600 = vmatpush.bf16.msrb.mxu0 %v3780_v36  ;;  %v3928_v36 = vor.u32 %v5209_v24, %v3927_v23  ;;  %v5449_v22 = vld [vmem:[#allocation7 + $0xa5c] sm:$0xf0]  ;;  %v4120_v24 = vor.u32 %v5257_v17, %v4119_v14  ;;  %v5287_v14 = vld [vmem:[#allocation7 + $0x554] sm:$0xf]  ;;  %v4265_v17 = vld [vmem:[#allocation7 + $0x580] sm:$0xf0] }
  0x86   :  { %2614 = vmatpush.bf16.msrb.mxu1 %v4164_v37  ;;  %v4312_v37 = vor.u32 %v5305_v27, %v4311_v25  ;;  %v5149_v27 = vld [vmem:[#allocation7 + $0xfc] sm:$0xf0] }
  0x87   :  { %2628 = vmatpush.bf16.msrb.mxu2 %v4548_v38  ;;  %v4696_v38 = vor.u32 %v5401_v29, %v4695_v28  ;;  %v4071_v28 = vld [vmem:[#allocation7 + $0x3d0] sm:$0xf]  ;;  %v4888_v29 = vor.u32 %v5449_v22, %v4887_v21  ;;  %v5479_v21 = vld [vmem:[#allocation7 + $0xb54] sm:$0xf]  ;;  %v5033_v22 = vld [vmem:[#allocation7 + $0xb80] sm:$0xf0] }
  0x88   :  { %2642 = vmatpush.bf16.msrb.mxu3 %v4932_v42  ;;  %v5080_v42 = vor.u32 %v5497_v34, %v5079_v32  ;;  %v5341_v32 = vld [vmem:[#allocation7 + $0x6fc] sm:$0xf0]  ;;  %v4839_v34 = vld [vmem:[#allocation7 + $0x9d0] sm:$0xf] }
  0x89   :  { %2601 = vmatpush.bf16.msrb.mxu0 %v3732_v48  ;;  %v3880_v48 = vor.u32 %v5197_v40, %v3879_v39  ;;  %v3639_v39 = vld [vmem:[#allocation7 + $0x70] sm:$0xf]  ;;  %v5137_v40 = vld [vmem:[#allocation7 + $0x9c] sm:$0xf0] }
  0x8a   :  { %2615 = vmatpush.bf16.msrb.mxu1 %v4116_v49  ;;  %v4264_v49 = vor.u32 %v5293_v43, %v4263_v41  ;;  %v4023_v41 = vld [vmem:[#allocation7 + $0x370] sm:$0xf]  ;;  %v5233_v43 = vld [vmem:[#allocation7 + $0x39c] sm:$0xf0] }
  0x8b   :  { %2629 = vmatpush.bf16.msrb.mxu2 %v4500_v50  ;;  %v4648_v50 = vor.u32 %v5389_v45, %v4647_v44  ;;  %v4407_v44 = vld [vmem:[#allocation7 + $0x670] sm:$0xf]  ;;  %v5329_v45 = vld [vmem:[#allocation7 + $0x69c] sm:$0xf0] }
  0x8c   :  { %2643 = vmatpush.bf16.msrb.mxu3 %v4884_v54  ;;  %v5032_v54 = vor.u32 %v5485_v47, %v5031_v46  ;;  %v4791_v46 = vld [vmem:[#allocation7 + $0x970] sm:$0xf]  ;;  %v5425_v47 = vld [vmem:[#allocation7 + $0x99c] sm:$0xf0] }
  0x8d   :  { %2602 = vmatpush.bf16.msrb.mxu0 %v3684_v60  ;;  %v3832_v60 = vor.u32 %v5185_v52, %v3831_v51  ;;  %v4024_v51 = vor.u32 %v5233_v43, %v4023_v41  ;;  %v4408_v52 = vor.u32 %v5329_v45, %v4407_v44  ;;  %v5263_v41 = vld [vmem:[#allocation7 + $0x494] sm:$0xf]  ;;  %v4169_v43 = vld [vmem:[#allocation7 + $0x4c0] sm:$0xf0] }
  0x8e   :  { %2616 = vmatpush.bf16.msrb.mxu1 %v4068_v61  ;;  %v4216_v61 = vor.u32 %v5281_v55, %v4215_v53  ;;  %v3975_v53 = vld [vmem:[#allocation7 + $0x310] sm:$0xf]  ;;  %v5359_v44 = vld [vmem:[#allocation7 + $0x794] sm:$0xf]  ;;  %v4553_v45 = vld [vmem:[#allocation7 + $0x7c0] sm:$0xf0] }
  0x8f   :  { %2630 = vmatpush.bf16.msrb.mxu2 %v4452_v62  ;;  %v4600_v62 = vor.u32 %v5377_v57, %v4599_v56  ;;  %v4359_v55 = vld [vmem:[#allocation7 + $0x610] sm:$0xf]  ;;  %v4792_v56 = vor.u32 %v5425_v47, %v4791_v46  ;;  %v5317_v57 = vld [vmem:[#allocation7 + $0x63c] sm:$0xf0]  ;;  %v5455_v46 = vld [vmem:[#allocation7 + $0xa94] sm:$0xf] }
  0x90   :  { %2644 = vmatpush.bf16.msrb.mxu3 %v4836_v2  ;;  %v4984_v2 = vor.u32 %v5473_v59, %v4983_v58  ;;  %v4743_v58 = vld [vmem:[#allocation7 + $0x910] sm:$0xf]  ;;  %v5413_v59 = vld [vmem:[#allocation7 + $0x93c] sm:$0xf0]  ;;  %v4360_v4 = vor.u32 %v5317_v57, %v4359_v55  ;;  %v4937_v47 = vld [vmem:[#allocation7 + $0xac0] sm:$0xf0] }
  0x91   :  { %2603 = vmatpush.bf16.msrb.mxu0 %v3636_v8  ;;  %v3784_v8 = vor.u32 %v5173_v0, %v3783_v63  ;;  %v4313_v0 = vld [vmem:[#allocation7 + $0x5e0] sm:$0xf0]  ;;  %v4744_v7 = vor.u32 %v5413_v59, %v4743_v58  ;;  %v4940_v55 = vor.u32 %v5455_v46, %v4937_v47  ;;  %v5347_v57 = vld [vmem:[#allocation7 + $0x734] sm:$0xf]  ;;  %v5210_v46 = vld [vmem:[#allocation7 + $0x2e4] sm:$0xf0] }
  0x92   :  { %2617 = vmatpush.bf16.msrb.mxu1 %v4020_v12  ;;  %v3735_v12 = vld [vmem:[#allocation7 + $0x130] sm:$0xf]  ;;  %v4505_v58 = vld [vmem:[#allocation7 + $0x760] sm:$0xf0]  ;;  %v5443_v59 = vld [vmem:[#allocation7 + $0xa34] sm:$0xf] }
  0x93   :  { %2631 = vmatpush.bf16.msrb.mxu2 %v4404_v13  ;;  %v5161_v13 = vld [vmem:[#allocation7 + $0x15c] sm:$0xf0]  ;;  %v4319_v47 = vld [vmem:[#allocation7 + $0x5b8] sm:$0xf] }
  0x94   :  { %2645 = vmatpush.bf16.msrb.mxu3 %v4788_v18  ;;  %v4503_v18 = vld [vmem:[#allocation7 + $0x730] sm:$0xf]  ;;  %v3736_v23 = vor.u32 %v5161_v13, %v3735_v12  ;;  %v5191_v12 = vld [vmem:[#allocation7 + $0x254] sm:$0xf]  ;;  %v3881_v13 = vld [vmem:[#allocation7 + $0x280] sm:$0xf0] }
  0x95   :  { %2604 = vmatpush.bf16.msrb.mxu0 %v3588_v26  ;;  %v4504_v25 = vor.u32 %v5353_v19, %v4503_v18  ;;  %v3687_v26 = vld [vmem:[#allocation7 + $0xd0] sm:$0xf]  ;;  %v5383_v18 = vld [vmem:[#allocation7 + $0x854] sm:$0xf]  ;;  %v4649_v19 = vld [vmem:[#allocation7 + $0x880] sm:$0xf0] }
  0x96   :  { %2618 = vmatpush.bf16.msrb.mxu1 %v3972_v30  ;;  %v5245_v30 = vld [vmem:[#allocation7 + $0x3fc] sm:$0xf0] }
  0x97   :  { %2632 = vmatpush.bf16.msrb.mxu2 %v4356_v31  ;;  %v4455_v31 = vld [vmem:[#allocation7 + $0x6d0] sm:$0xf] }
  0x98   :  { %2646 = vmatpush.bf16.msrb.mxu3 %v4740_v35  ;;  %2605 = vmatmul.bf16.vlgmr.msrb.gmra.mxu0 %v5773_v16  ;;  %v5437_v35 = vld [vmem:[#allocation7 + $0x9fc] sm:$0xf0] }
  0x99   :  { %2653 = vmatpush.bf16.msra.mxu0 %v3928_v36  ;;  %2619 = vmatmul.bf16.vlgmr.msrb.gmra.mxu1 %v5779_v33  ;;  %v3688_v36 = vor.u32 %v5149_v27, %v3687_v26  ;;  %v5179_v26 = vld [vmem:[#allocation7 + $0x1f4] sm:$0xf]  ;;  %v3833_v27 = vld [vmem:[#allocation7 + $0x220] sm:$0xf0] }
  0x9a   :  { %2667 = vmatpush.bf16.msra.mxu1 %v4312_v37  ;;  %2633 = vmatmul.bf16.vlgmr.msrb.gmra.mxu2 %v5771_v9  ;;  %v4072_v37 = vor.u32 %v5245_v30, %v4071_v28  ;;  %v5275_v28 = vld [vmem:[#allocation7 + $0x4f4] sm:$0xf]  ;;  %v4217_v30 = vld [vmem:[#allocation7 + $0x520] sm:$0xf0] }
  0x9b   :  { %2681 = vmatpush.bf16.msra.mxu2 %v4696_v38  ;;  %2647 = vmatmul.bf16.vlgmr.msrb.gmra.mxu3 %v5776_v20  ;;  %v4456_v38 = vor.u32 %v5341_v32, %v4455_v31  ;;  %v5371_v31 = vld [vmem:[#allocation7 + $0x7f4] sm:$0xf]  ;;  %v4601_v32 = vld [vmem:[#allocation7 + $0x820] sm:$0xf0] }
  0x9c   :  { %2695 = vmatpush.bf16.msra.mxu3 %v5080_v42  ;;  %v4840_v42 = vor.u32 %v5437_v35, %v4839_v34  ;;  %v5467_v34 = vld [vmem:[#allocation7 + $0xaf4] sm:$0xf]  ;;  %v4985_v35 = vld [vmem:[#allocation7 + $0xb20] sm:$0xf0] }
  0x9d   :  { %2654 = vmatpush.bf16.msra.mxu0 %v3880_v48  ;;  %v3640_v48 = vor.u32 %v5137_v40, %v3639_v39  ;;  %v5167_v39 = vld [vmem:[#allocation7 + $0x194] sm:$0xf]  ;;  %v3785_v40 = vld [vmem:[#allocation7 + $0x1c0] sm:$0xf0] }
  0x9e   :  { %2668 = vmatpush.bf16.msra.mxu1 %v4264_v49  ;;  %v3591_v49 = vld [vmem:[#allocation7 + $0x10] sm:$0xf] }
  0x9f   :  { %2682 = vmatpush.bf16.msra.mxu2 %v4648_v50  ;;  %v5125_v50 = vld [vmem:[#allocation7 + $0x3c] sm:$0xf0] }
  0xa0   :  { %2696 = vmatpush.bf16.msra.mxu3 %v5032_v54  ;;  %v5221_v54 = vld [vmem:[#allocation7 + $0x33c] sm:$0xf0]  ;;  %v3592_v63 = vor.u32 %v5125_v50, %v3591_v49  ;;  %v5155_v49 = vld [vmem:[#allocation7 + $0x134] sm:$0xf]  ;;  %v4172_v50 = vor.u32 %v5263_v41, %v4169_v43  ;;  %v4361_v41 = vld [vmem:[#allocation7 + $0x640] sm:$0xf0] }
  0xa1   :  { %2655 = vmatpush.bf16.msra.mxu0 %v3832_v60  ;;  %v5203_v60 = vld [vmem:[#allocation7 + $0x2b4] sm:$0xf]  ;;  %v3976_v3 = vor.u32 %v5221_v54, %v3975_v53  ;;  %v5799_v54 = vld [vmem:[#allocation8] sm:$0xff] }
  0xa2   :  { %2669 = vmatpush.bf16.msra.mxu1 %v4216_v61  ;;  %v3929_v61 = vld [vmem:[#allocation7 + $0x2e0] sm:$0xf0]  ;;  %v5251_v53 = vld [vmem:[#allocation7 + $0x434] sm:$0xf] }
  0xa3   :  { %2683 = vmatpush.bf16.msra.mxu2 %v4600_v62  ;;  %v5299_v62 = vld [vmem:[#allocation7 + $0x5b4] sm:$0xf]  ;;  %v4745_v43 = vld [vmem:[#allocation7 + $0x940] sm:$0xf0] }
  0xa4   :  { %2697 = vmatpush.bf16.msra.mxu3 %v4984_v2  ;;  %v4697_v2 = vld [vmem:[#allocation7 + $0x8e0] sm:$0xf0] }
  0xa5   :  { %2656 = vmatpush.bf16.msra.mxu0 %v3784_v8  ;;  %v3932_v8 = vor.u32 %v5203_v60, %v3929_v61  ;;  %v4889_v60 = vld [vmem:[#allocation7 + $0xa60] sm:$0xf0] }
  0xa6   :  { %2670 = vmatpush.bf16.msra.mxu1 %v4168_v10  ;;  %v4316_v10 = vor.u32 %v5299_v62, %v4313_v0  ;;  %v6073_v62 = vperm.slane %v5799_v54, 0  ;;  %v4508_v0 = vor.u32 %v5347_v57, %v4505_v58  ;;  %v5498_v57 = vld [vmem:[#allocation7 + $0xbe4] sm:$0xf0] }
  0xa7   :  { %2684 = vmatpush.bf16.msra.mxu2 %v4552_v11  ;;  %v4700_v11 = vor.u32 %v5395_v1, %v4697_v2  ;;  %v5143_v1 = vld [vmem:[#allocation7 + $0xd4] sm:$0xf]  ;;  %v3689_v2 = vld [vmem:[#allocation7 + $0x100] sm:$0xf0] }
  0xa8   :  { %2698 = vmatpush.bf16.msra.mxu3 %v4936_v15  ;;  %v5084_v15 = vor.u32 %v5491_v5, %v5081_v6  ;;  %v4073_v5 = vld [vmem:[#allocation7 + $0x400] sm:$0xf0]  ;;  %v5335_v6 = vld [vmem:[#allocation7 + $0x6d4] sm:$0xf] }
  0xa9   :  { %2657 = vmatpush.bf16.msra.mxu0 %v3736_v23  ;;  %v3884_v23 = vor.u32 %v5191_v12, %v3881_v13  ;;  %v3692_v12 = vor.u32 %v5143_v1, %v3689_v2  ;;  %v4271_v1 = vld [vmem:[#allocation7 + $0x558] sm:$0xf] }
  0xaa   :  { %2671 = vmatpush.bf16.msra.mxu1 %v4120_v24  ;;  %v4268_v24 = vor.u32 %v5287_v14, %v4265_v17  ;;  %v5131_v17 = vld [vmem:[#allocation7 + $0x74] sm:$0xf] }
  0xab   :  { %2685 = vmatpush.bf16.msra.mxu2 %v4504_v25  ;;  %v4652_v25 = vor.u32 %v5383_v18, %v4649_v19  ;;  %v3641_v18 = vld [vmem:[#allocation7 + $0xa0] sm:$0xf0]  ;;  %v5227_v19 = vld [vmem:[#allocation7 + $0x374] sm:$0xf] }
  0xac   :  { %2699 = vmatpush.bf16.msra.mxu3 %v4888_v29  ;;  %v5036_v29 = vor.u32 %v5479_v21, %v5033_v22 }
  0xad   :  { %2658 = vmatpush.bf16.msra.mxu0 %v3688_v36  ;;  %v3836_v36 = vor.u32 %v5179_v26, %v3833_v27  ;;  %v5419_v27 = vld [vmem:[#allocation7 + $0x974] sm:$0xf] }
  0xae   :  { %2672 = vmatpush.bf16.msra.mxu1 %v4072_v37  ;;  %v4220_v37 = vor.u32 %v5275_v28, %v4217_v30  ;;  %v4793_v28 = vld [vmem:[#allocation7 + $0x9a0] sm:$0xf0]  ;;  %v3644_v30 = vor.u32 %v5131_v17, %v3641_v18  ;;  %v5282_v18 = vld [vmem:[#allocation7 + $0x524] sm:$0xf0] }
  0xaf   :  { %2686 = vmatpush.bf16.msra.mxu2 %v4456_v38  ;;  %v4604_v38 = vor.u32 %v5371_v31, %v4601_v32  ;;  %v5119_v31 = vld [vmem:[#allocation7 + $0x14] sm:$0xf]  ;;  %v3593_v32 = vld [vmem:[#allocation7 + $0x40] sm:$0xf0] }
  0xb0   :  { %2700 = vmatpush.bf16.msra.mxu3 %v4840_v42  ;;  %v4988_v42 = vor.u32 %v5467_v34, %v4985_v35 }
  0xb1   :  { %2659 = vmatpush.bf16.msra.mxu0 %v3640_v48  ;;  %v3788_v48 = vor.u32 %v5167_v39, %v3785_v40  ;;  %v5311_v39 = vld [vmem:[#allocation7 + $0x614] sm:$0xf]  ;;  %v4796_v40 = vor.u32 %v5419_v27, %v4793_v28 }
  0xb2   :  { %2673 = vmatpush.bf16.msra.mxu1 %v4024_v51  ;;  %v4556_v51 = vor.u32 %v5359_v44, %v4553_v45  ;;  %v3935_v45 = vld [vmem:[#allocation7 + $0x2b8] sm:$0xf] }
  0xb3   :  { %2687 = vmatpush.bf16.msra.mxu2 %v4408_v52  ;;  %v3737_v52 = vld [vmem:[#allocation7 + $0x160] sm:$0xf0] }
  0xb4   :  { %2701 = vmatpush.bf16.msra.mxu3 %v4792_v56  ;;  %v4121_v56 = vld [vmem:[#allocation7 + $0x460] sm:$0xf0]  ;;  %v3740_v61 = vor.u32 %v5155_v49, %v3737_v52  ;;  %v3596_v49 = vor.u32 %v5119_v31, %v3593_v32  ;;  %v5402_v52 = vld [vmem:[#allocation7 + $0x8e4] sm:$0xf0]  ;;  %v6071_v32 = vperm.slane %v5799_v54, 1 }
  0xb5   :  { %2660 = vmatpush.bf16.msra.mxu0 %v3592_v63  ;;  %v4124_v63 = vor.u32 %v5251_v53, %v4121_v56  ;;  %v5087_v56 = vld [vmem:[#allocation7 + $0xbb8] sm:$0xf] }
  0xb6   :  { %2674 = vmatpush.bf16.msra.mxu1 %v3976_v3  ;;  %v5239_v3 = vld [vmem:[#allocation7 + $0x3d4] sm:$0xf]  ;;  %v5088_v2 = vor.u32 %v5498_v57, %v5087_v56  ;;  %v4895_v56 = vld [vmem:[#allocation7 + $0xa38] sm:$0xf]  ;;  %v5450_v57 = vld [vmem:[#allocation7 + $0xa64] sm:$0xf0] }
  0xb7   :  { %2688 = vmatpush.bf16.msra.mxu2 %v4360_v4  ;;  %v4892_v4 = vor.u32 %v5443_v59, %v4889_v60  ;;  %v4076_v14 = vor.u32 %v5239_v3, %v4073_v5  ;;  %v3936_v59 = vor.u32 %v5210_v46, %v3935_v45  ;;  %v5294_v3 = vld [vmem:[#allocation7 + $0x584] sm:$0xf0]  ;;  %v3743_v45 = vld [vmem:[#allocation7 + $0x138] sm:$0xf] }
  0xb8   :  { %2702 = vmatpush.bf16.msra.mxu3 %v4744_v7  ;;  %2661 = vmatmul.bf16.vlgmr.msra.gmra.mxu0 %v5773_v16  ;;  %v4457_v7 = vld [vmem:[#allocation7 + $0x700] sm:$0xf0]  ;;  %v5390_v5 = vld [vmem:[#allocation7 + $0x884] sm:$0xf0] }
  0xb9   :  { %2709 = vmatpush.bf16.msrb.mxu0 %v3932_v8  ;;  %2675 = vmatmul.bf16.vlgmr.msra.gmra.mxu1 %v5779_v33  ;;  %v5431_v8 = vld [vmem:[#allocation7 + $0x9d4] sm:$0xf]  ;;  %v5162_v46 = vld [vmem:[#allocation7 + $0x164] sm:$0xf0] }
  0xba   :  { %2723 = vmatpush.bf16.msrb.mxu1 %v4316_v10  ;;  %2689 = vmatmul.bf16.vlgmr.msra.gmra.mxu2 %v5771_v9  ;;  %v4841_v10 = vld [vmem:[#allocation7 + $0xa00] sm:$0xf0] }
  0xbb   :  { %2737 = vmatpush.bf16.msrb.mxu2 %v4700_v11  ;;  %2703 = vmatmul.bf16.vlgmr.msra.gmra.mxu3 %v5776_v20  ;;  %v4844_v22 = vor.u32 %v5431_v8, %v4841_v10 }
  0xbc   :  { %2751 = vmatpush.bf16.msrb.mxu3 %v5084_v15  ;;  %v2438_v11 = vpop.f32.mrf.mxu0  ;;  %v4460_v15 = vor.u32 %v5335_v6, %v4457_v7  ;;  %v5039_v6 = vld [vmem:[#allocation7 + $0xb58] sm:$0xf]  ;;  %v5486_v7 = vld [vmem:[#allocation7 + $0xb84] sm:$0xf0] }
  0xbd   :  { %2710 = vmatpush.bf16.msrb.mxu0 %v3884_v23  ;;  %v2439_v13 = vadd.f32 %v2438_v11, %v6073_v62  ;;  %v4025_v23 = vld [vmem:[#allocation7 + $0x3a0] sm:$0xf0]  ;;  %v4272_v11 = vor.u32 %v5294_v3, %v4271_v1  ;;  %v5040_v17 = vor.u32 %v5486_v7, %v5039_v6  ;;  %v4079_v1 = vld [vmem:[#allocation7 + $0x3d8] sm:$0xf]  ;;  %v4896_v3 = vor.u32 %v5450_v57, %v4895_v56  ;;  %v5342_v6 = vld [vmem:[#allocation7 + $0x704] sm:$0xf0] }
  0xbe   :  { %2724 = vmatpush.bf16.msrb.mxu1 %v4268_v24  ;;  %v5323_v24 = vld [vmem:[#allocation7 + $0x674] sm:$0xf]  ;;  %v4028_v35 = vor.u32 %v5227_v19, %v4025_v23  ;;  %v4607_v19 = vld [vmem:[#allocation7 + $0x7f8] sm:$0xf]  ;;  %v5492_v56 = vld [vmem:[#allocation7 + $0xbbc] sm:$0xf] }
  0xbf   :  { %2738 = vmatpush.bf16.msrb.mxu2 %v4652_v25  ;;  %v4409_v25 = vld [vmem:[#allocation7 + $0x6a0] sm:$0xf0]  ;;  %v4991_v23 = vld [vmem:[#allocation7 + $0xaf8] sm:$0xf]  ;;  %v5089_v57 = vld [vmem:[#allocation7 + $0xbe8] sm:$0xf0] }
  0xc0   :  { %2752 = vmatpush.bf16.msrb.mxu3 %v5036_v29  ;;  %v2452_v21 = vpop.f32.mrf.mxu1  ;;  %v4287_v62 = vld [vmem:[#allocation7 + $0x568] sm:$0xf] }
  0xc1   :  { %2711 = vmatpush.bf16.msrb.mxu0 %v3836_v36  ;;  %v2453_v26 = vadd.f32 %v2452_v21, %v2439_v13  ;;  %v2466_v29 = vpop.f32.mrf.mxu2  ;;  %v4412_v36 = vor.u32 %v5323_v24, %v4409_v25  ;;  %v3839_v13 = vld [vmem:[#allocation7 + $0x1f8] sm:$0xf]  ;;  %v5378_v21 = vld [vmem:[#allocation7 + $0x824] sm:$0xf0] }
  0xc2   :  { %2725 = vmatpush.bf16.msrb.mxu1 %v4220_v37  ;;  %v5215_v37 = vld [vmem:[#allocation7 + $0x314] sm:$0xf]  ;;  %v5474_v24 = vld [vmem:[#allocation7 + $0xb24] sm:$0xf0]  ;;  %v4608_v28 = vor.u32 %v5378_v21, %v4607_v19  ;;  %v4031_v21 = vld [vmem:[#allocation7 + $0x378] sm:$0xf] }
  0xc3   :  { %2739 = vmatpush.bf16.msrb.mxu2 %v4604_v38  ;;  %v2467_v34 = vadd.f32 %v2466_v29, %v2453_v26  ;;  %v3977_v38 = vld [vmem:[#allocation7 + $0x340] sm:$0xf0]  ;;  %v3791_v26 = vld [vmem:[#allocation7 + $0x198] sm:$0xf]  ;;  %v5174_v29 = vld [vmem:[#allocation7 + $0x1c4] sm:$0xf0] }
  0xc4   :  { %2753 = vmatpush.bf16.msrb.mxu3 %v4988_v42  ;;  %v5407_v42 = vld [vmem:[#allocation7 + $0x914] sm:$0xf]  ;;  %v2480_v44 = vpop.f32.mrf.mxu3  ;;  %v3980_v53 = vor.u32 %v5215_v37, %v3977_v38  ;;  %v5806_v10 = vpop.f32.mrf.mxu0  ;;  %v5366_v37 = vld [vmem:[#allocation7 + $0x7c4] sm:$0xf0]  ;;  %v4943_v38 = vld [vmem:[#allocation7 + $0xa98] sm:$0xf] }
  0xc5   :  { %2712 = vmatpush.bf16.msrb.mxu0 %v3788_v48  ;;  %v5804_v48 = vadd.f32 %v2480_v44, %v2467_v34  ;;  %v4748_v58 = vor.u32 %v5407_v42, %v4745_v43  ;;  %v4992_v34 = vor.u32 %v5474_v24, %v4991_v23  ;;  %v5138_v19 = vld [vmem:[#allocation7 + $0xa4] sm:$0xf0] }
  0xc6   :  { %2726 = vmatpush.bf16.msrb.mxu1 %v4172_v50  ;;  %v5306_v50 = vld [vmem:[#allocation7 + $0x5e4] sm:$0xf0] }
  0xc7   :  { %2740 = vmatpush.bf16.msrb.mxu2 %v4556_v51  ;;  %v4703_v51 = vld [vmem:[#allocation7 + $0x8b8] sm:$0xf]  ;;  %v4320_v60 = vor.u32 %v5306_v50, %v4319_v47  ;;  %v5234_v24 = vld [vmem:[#allocation7 + $0x3a4] sm:$0xf0] }
  0xc8   :  { %2754 = vmatpush.bf16.msrb.mxu3 %v4940_v55  ;;  %v4364_v55 = vor.u32 %v5311_v39, %v4361_v41  ;;  %v5462_v39 = vld [vmem:[#allocation7 + $0xac4] sm:$0xf0]  ;;  %v3792_v41 = vor.u32 %v5174_v29, %v3791_v26  ;;  %v4127_v47 = vld [vmem:[#allocation7 + $0x438] sm:$0xf] }
  0xc9   :  { %2713 = vmatpush.bf16.msrb.mxu0 %v3740_v61  ;;  %v4704_v61 = vor.u32 %v5402_v52, %v4703_v51  ;;  %v5814_v31 = vpop.f32.mrf.mxu2  ;;  %v4944_v50 = vor.u32 %v5462_v39, %v4943_v38  ;;  %v5258_v51 = vld [vmem:[#allocation7 + $0x464] sm:$0xf0]  ;;  %v4511_v52 = vld [vmem:[#allocation7 + $0x738] sm:$0xf] }
  0xca   :  { %2727 = vmatpush.bf16.msrb.mxu1 %v4124_v63  ;;  %v3887_v63 = vld [vmem:[#allocation7 + $0x258] sm:$0xf]  ;;  %v5330_v26 = vld [vmem:[#allocation7 + $0x6a4] sm:$0xf0] }
  0xcb   :  { %2741 = vmatpush.bf16.msrb.mxu2 %v4508_v0  ;;  %v5198_v0 = vld [vmem:[#allocation7 + $0x284] sm:$0xf0]  ;;  %v4367_v39 = vld [vmem:[#allocation7 + $0x618] sm:$0xf] }
  0xcc   :  { %2755 = vmatpush.bf16.msrb.mxu3 %v4892_v4  ;;  %v4655_v4 = vld [vmem:[#allocation7 + $0x858] sm:$0xf]  ;;  %v3888_v8 = vor.u32 %v5198_v0, %v3887_v63  ;;  %v5150_v0 = vld [vmem:[#allocation7 + $0x104] sm:$0xf0] }
  0xcd   :  { %2714 = vmatpush.bf16.msrb.mxu0 %v3692_v12  ;;  %v4656_v12 = vor.u32 %v5390_v5, %v4655_v4  ;;  %v3695_v63 = vld [vmem:[#allocation7 + $0xd8] sm:$0xf]  ;;  %v5246_v4 = vld [vmem:[#allocation7 + $0x404] sm:$0xf0] }
  0xce   :  { %2728 = vmatpush.bf16.msrb.mxu1 %v4076_v14  ;;  %v5186_v14 = vld [vmem:[#allocation7 + $0x224] sm:$0xf0]  ;;  %v4463_v5 = vld [vmem:[#allocation7 + $0x6d8] sm:$0xf] }
  0xcf   :  { %2742 = vmatpush.bf16.msrb.mxu2 %v4460_v15  ;;  %v4223_v15 = vld [vmem:[#allocation7 + $0x4f8] sm:$0xf]  ;;  %v3840_v25 = vor.u32 %v5186_v14, %v3839_v13  ;;  %v3696_v13 = vor.u32 %v5150_v0, %v3695_v63  ;;  %v5222_v38 = vld [vmem:[#allocation7 + $0x344] sm:$0xf0]  ;;  %v5192_v63 = vld [vmem:[#allocation7 + $0x25c] sm:$0xf] }
  0xd0   :  { %2756 = vmatpush.bf16.msrb.mxu3 %v4844_v22  ;;  %v5808_v22 = vpop.f32.mrf.mxu1  ;;  %v4224_v27 = vor.u32 %v5282_v18, %v4223_v15  ;;  %v4080_v15 = vor.u32 %v5246_v4, %v4079_v1  ;;  %v3647_v18 = vld [vmem:[#allocation7 + $0x78] sm:$0xf]  ;;  %v3889_v0 = vld [vmem:[#allocation7 + $0x288] sm:$0xf0]  ;;  %v5288_v1 = vld [vmem:[#allocation7 + $0x55c] sm:$0xf] }
  0xd1   :  { %2715 = vmatpush.bf16.msrb.mxu0 %v3644_v30  ;;  %v4175_v30 = vld [vmem:[#allocation7 + $0x498] sm:$0xf]  ;;  %v3648_v29 = vor.u32 %v5138_v19, %v3647_v18  ;;  %v5384_v4 = vld [vmem:[#allocation7 + $0x85c] sm:$0xf] }
  0xd2   :  { %2729 = vmatpush.bf16.msrb.mxu1 %v4028_v35  ;;  %v5270_v35 = vld [vmem:[#allocation7 + $0x4c4] sm:$0xf0]  ;;  %v5276_v18 = vld [vmem:[#allocation7 + $0x4fc] sm:$0xf] }
  0xd3   :  { %2743 = vmatpush.bf16.msrb.mxu2 %v4412_v36  ;;  %v4559_v36 = vld [vmem:[#allocation7 + $0x798] sm:$0xf]  ;;  %v4176_v43 = vor.u32 %v5270_v35, %v4175_v30  ;;  %v4032_v35 = vor.u32 %v5234_v24, %v4031_v21  ;;  %v4225_v21 = vld [vmem:[#allocation7 + $0x528] sm:$0xf0] }
  0xd4   :  { %2757 = vmatpush.bf16.msrb.mxu3 %v4796_v40  ;;  %v5817_v40 = vpop.f32.mrf.mxu3  ;;  %v4560_v44 = vor.u32 %v5366_v37, %v4559_v36  ;;  %v3599_v30 = vld [vmem:[#allocation7 + $0x18] sm:$0xf]  ;;  %v4609_v24 = vld [vmem:[#allocation7 + $0x828] sm:$0xf0] }
  0xd5   :  { %2716 = vmatpush.bf16.msrb.mxu0 %v3596_v49  ;;  %v2494_v42 = vpop.f32.mrf.mxu0  ;;  %v3983_v37 = vld [vmem:[#allocation7 + $0x318] sm:$0xf] }
  0xd6   :  { %2730 = vmatpush.bf16.msrb.mxu1 %v3980_v53  ;;  %v2495_v49 = vadd.f32 %v2494_v42, %v6071_v32  ;;  %v5354_v53 = vld [vmem:[#allocation7 + $0x764] sm:$0xf0] }
  0xd7   :  { %2744 = vmatpush.bf16.msrb.mxu2 %v4364_v55  ;;  %v5318_v42 = vld [vmem:[#allocation7 + $0x644] sm:$0xf0] }
  0xd8   :  { %2758 = vmatpush.bf16.msrb.mxu3 %v4748_v58  ;;  %2717 = vmatmul.bf16.vlgmr.msrb.gmra.mxu0 %v5773_v16  ;;  %v2508_v55 = vpop.f32.mrf.mxu1  ;;  %v5103_v32 = vld [vmem:[#allocation7 + $0xbc8] sm:$0xf] }
  0xd9   :  { %2765 = vmatpush.bf16.msra.mxu0 %v3936_v59  ;;  %2731 = vmatmul.bf16.vlgmr.msrb.gmra.mxu1 %v5779_v33  ;;  %v2509_v58 = vadd.f32 %v2508_v55, %v2495_v49  ;;  %v3744_v59 = vor.u32 %v5162_v46, %v3743_v45  ;;  %v5204_v45 = vld [vmem:[#allocation7 + $0x2bc] sm:$0xf]  ;;  %v3937_v46 = vld [vmem:[#allocation7 + $0x2e8] sm:$0xf0]  ;;  %v4368_v55 = vor.u32 %v5318_v42, %v4367_v39 }
  0xda   :  { %2779 = vmatpush.bf16.msra.mxu1 %v4320_v60  ;;  %2745 = vmatmul.bf16.vlgmr.msrb.gmra.mxu2 %v5771_v9  ;;  %v4128_v60 = vor.u32 %v5258_v51, %v4127_v47  ;;  %v5300_v47 = vld [vmem:[#allocation7 + $0x5bc] sm:$0xf] }
  0xdb   :  { %2793 = vmatpush.bf16.msra.mxu2 %v4704_v61  ;;  %2759 = vmatmul.bf16.vlgmr.msrb.gmra.mxu3 %v5776_v20  ;;  %v4512_v61 = vor.u32 %v5354_v53, %v4511_v52  ;;  %v5396_v51 = vld [vmem:[#allocation7 + $0x8bc] sm:$0xf]  ;;  %v4705_v52 = vld [vmem:[#allocation7 + $0x8e8] sm:$0xf0]  ;;  %v3984_v53 = vor.u32 %v5222_v38, %v3983_v37  ;;  %v6072_v38 = vperm.slane %v5799_v54, 2 }
  0xdc   :  { %2807 = vmatpush.bf16.msra.mxu3 %v5088_v2  ;;  %v5360_v42 = vld [vmem:[#allocation7 + $0x79c] sm:$0xf] }
  0xdd   :  { %2766 = vmatpush.bf16.msra.mxu0 %v3888_v8  ;;  %v2522_v2 = vpop.f32.mrf.mxu2  ;;  %v4847_v8 = vld [vmem:[#allocation7 + $0x9d8] sm:$0xf] }
  0xde   :  { %2780 = vmatpush.bf16.msra.mxu1 %v4272_v11  ;;  %v2523_v7 = vadd.f32 %v2522_v2, %v2509_v58  ;;  %v5438_v11 = vld [vmem:[#allocation7 + $0xa04] sm:$0xf0]  ;;  %v5092_v2 = vor.u32 %v5492_v56, %v5089_v57 }
  0xdf   :  { %2794 = vmatpush.bf16.msra.mxu2 %v4656_v12  ;;  %v2536_v12 = vpop.f32.mrf.mxu3  ;;  %v4848_v23 = vor.u32 %v5438_v11, %v4847_v8  ;;  %v3892_v8 = vor.u32 %v5192_v63, %v3889_v0  ;;  %v5823_v11 = vpop.f32.mrf.mxu0  ;;  %v5444_v63 = vld [vmem:[#allocation7 + $0xa3c] sm:$0xf]  ;;  %v4897_v0 = vld [vmem:[#allocation7 + $0xa68] sm:$0xf0] }
  0xe0   :  { %2808 = vmatpush.bf16.msra.mxu3 %v5040_v17  ;;  %v5821_v14 = vadd.f32 %v2536_v12, %v2523_v7  ;;  %v4464_v17 = vor.u32 %v5342_v6, %v4463_v5  ;;  %v4657_v5 = vld [vmem:[#allocation7 + $0x888] sm:$0xf0]  ;;  %v5480_v6 = vld [vmem:[#allocation7 + $0xb5c] sm:$0xf] }
  0xe1   :  { %2767 = vmatpush.bf16.msra.mxu0 %v3840_v25  ;;  %v4415_v25 = vld [vmem:[#allocation7 + $0x678] sm:$0xf]  ;;  %v5041_v7 = vld [vmem:[#allocation7 + $0xb88] sm:$0xf0] }
  0xe2   :  { %2781 = vmatpush.bf16.msra.mxu1 %v4224_v27  ;;  %v4799_v27 = vld [vmem:[#allocation7 + $0x978] sm:$0xf]  ;;  %v4416_v36 = vor.u32 %v5330_v26, %v4415_v25  ;;  %v5044_v19 = vor.u32 %v5480_v6, %v5041_v7  ;;  %v5826_v25 = vpop.f32.mrf.mxu1  ;;  %v5468_v26 = vld [vmem:[#allocation7 + $0xafc] sm:$0xf]  ;;  %v3697_v6 = vld [vmem:[#allocation7 + $0x108] sm:$0xf0] }
  0xe3   :  { %2795 = vmatpush.bf16.msra.mxu2 %v4608_v28  ;;  %v5426_v28 = vld [vmem:[#allocation7 + $0x9a4] sm:$0xf0]  ;;  %v5240_v7 = vld [vmem:[#allocation7 + $0x3dc] sm:$0xf] }
  0xe4   :  { %2809 = vmatpush.bf16.msra.mxu3 %v4992_v34  ;;  %v5126_v34 = vld [vmem:[#allocation7 + $0x44] sm:$0xf0] }
  0xe5   :  { %2768 = vmatpush.bf16.msra.mxu0 %v3792_v41  ;;  %v4800_v41 = vor.u32 %v5426_v28, %v4799_v27  ;;  %v3600_v49 = vor.u32 %v5126_v34, %v3599_v30  ;;  %v4993_v27 = vld [vmem:[#allocation7 + $0xb28] sm:$0xf0]  ;;  %v4228_v30 = vor.u32 %v5276_v18, %v4225_v21  ;;  %v5831_v37 = vpop.f32.mrf.mxu2 }
  0xe6   :  { %2782 = vmatpush.bf16.msra.mxu1 %v4176_v43  ;;  %v4751_v43 = vld [vmem:[#allocation7 + $0x918] sm:$0xf]  ;;  %v4996_v39 = vor.u32 %v5468_v26, %v4993_v27  ;;  %v4849_v21 = vld [vmem:[#allocation7 + $0xa08] sm:$0xf0] }
  0xe7   :  { %2796 = vmatpush.bf16.msra.mxu2 %v4560_v44  ;;  %v5414_v44 = vld [vmem:[#allocation7 + $0x944] sm:$0xf0] }
  0xe8   :  { %2810 = vmatpush.bf16.msra.mxu3 %v4944_v50  ;;  %v4321_v50 = vld [vmem:[#allocation7 + $0x5e8] sm:$0xf0]  ;;  %v4752_v58 = vor.u32 %v5414_v44, %v4751_v43  ;;  %v5456_v44 = vld [vmem:[#allocation7 + $0xa9c] sm:$0xf] }
  0xe9   :  { %2769 = vmatpush.bf16.msra.mxu0 %v3744_v59  ;;  %v3940_v59 = vor.u32 %v5204_v45, %v3937_v46  ;;  %v4561_v43 = vld [vmem:[#allocation7 + $0x7c8] sm:$0xf0]  ;;  %v5834_v46 = vpop.f32.mrf.mxu3 }
  0xea   :  { %2783 = vmatpush.bf16.msra.mxu1 %v4128_v60  ;;  %v4324_v60 = vor.u32 %v5300_v47, %v4321_v50  ;;  %v4945_v45 = vld [vmem:[#allocation7 + $0xac8] sm:$0xf0]  ;;  %6076 = vst [vmem:[#allocation18_spill] sm:$0xff] %v5834_v46 }
  0xeb   :  { %2797 = vmatpush.bf16.msra.mxu2 %v4512_v61  ;;  %v4708_v61 = vor.u32 %v5396_v51, %v4705_v52  ;;  %v4564_v51 = vor.u32 %v5360_v42, %v4561_v43  ;;  %v5156_v52 = vld [vmem:[#allocation7 + $0x13c] sm:$0xf]  ;;  %v4948_v57 = vor.u32 %v5456_v44, %v4945_v45  ;;  %v4801_v43 = vld [vmem:[#allocation7 + $0x9a8] sm:$0xf0] }
  0xec   :  { %2811 = vmatpush.bf16.msra.mxu3 %v4896_v3  ;;  %v4273_v3 = vld [vmem:[#allocation7 + $0x588] sm:$0xf0]  ;;  %v5420_v42 = vld [vmem:[#allocation7 + $0x97c] sm:$0xf] }
  0xed   :  { %2770 = vmatpush.bf16.msra.mxu0 %v3696_v13  ;;  %v4276_v12 = vor.u32 %v5288_v1, %v4273_v3  ;;  %v4660_v13 = vor.u32 %v5384_v4, %v4657_v5  ;;  %v5144_v5 = vld [vmem:[#allocation7 + $0xdc] sm:$0xf]  ;;  %v5386_v46 = vld [vmem:[#allocation7 + $0x86c] sm:$0xf] }
  0xee   :  { %2784 = vmatpush.bf16.msra.mxu1 %v4080_v15  ;;  %v5180_v15 = vld [vmem:[#allocation7 + $0x1fc] sm:$0xf] }
  0xef   :  { %2798 = vmatpush.bf16.msra.mxu2 %v4464_v17  ;;  %v3841_v17 = vld [vmem:[#allocation7 + $0x228] sm:$0xf0]  ;;  %v5120_v45 = vld [vmem:[#allocation7 + $0x1c] sm:$0xf] }
  0xf0   :  { %2812 = vmatpush.bf16.msra.mxu3 %v4848_v23  ;;  %v5372_v23 = vld [vmem:[#allocation7 + $0x7fc] sm:$0xf]  ;;  %v3844_v28 = vor.u32 %v5180_v15, %v3841_v17  ;;  %v4465_v17 = vld [vmem:[#allocation7 + $0x708] sm:$0xf0] }
  0xf1   :  { %2771 = vmatpush.bf16.msra.mxu0 %v3648_v29  ;;  %v5168_v29 = vld [vmem:[#allocation7 + $0x19c] sm:$0xf]  ;;  %v4612_v34 = vor.u32 %v5372_v23, %v4609_v24  ;;  %v3700_v24 = vor.u32 %v5144_v5, %v3697_v6 }
  0xf2   :  { %2785 = vmatpush.bf16.msra.mxu1 %v4032_v35  ;;  %v3793_v35 = vld [vmem:[#allocation7 + $0x1c8] sm:$0xf0]  ;;  %v5336_v15 = vld [vmem:[#allocation7 + $0x6dc] sm:$0xf] }
  0xf3   :  { %2799 = vmatpush.bf16.msra.mxu2 %v4416_v36  ;;  %v5264_v36 = vld [vmem:[#allocation7 + $0x49c] sm:$0xf]  ;;  %v3796_v47 = vor.u32 %v5168_v29, %v3793_v35 }
  0xf4   :  { %2813 = vmatpush.bf16.msra.mxu3 %v4800_v41  ;;  %v4177_v41 = vld [vmem:[#allocation7 + $0x4c8] sm:$0xf0]  ;;  %v5132_v29 = vld [vmem:[#allocation7 + $0x7c] sm:$0xf] }
  0xf5   :  { %2772 = vmatpush.bf16.msra.mxu0 %v3600_v49  ;;  %v2550_v49 = vpop.f32.mrf.mxu0  ;;  %v4180_v50 = vor.u32 %v5264_v36, %v4177_v41  ;;  %v4033_v36 = vld [vmem:[#allocation7 + $0x3a8] sm:$0xf0] }
  0xf6   :  { %2786 = vmatpush.bf16.msra.mxu1 %v3984_v53  ;;  %v3745_v53 = vld [vmem:[#allocation7 + $0x168] sm:$0xf0]  ;;  %v2551_v56 = vadd.f32 %v2550_v49, %v6072_v38  ;;  %v5500_v38 = vld [vmem:[#allocation7 + $0xbf4] sm:$0xf0] }
  0xf7   :  { %2800 = vmatpush.bf16.msra.mxu2 %v4368_v55  ;;  %v5252_v55 = vld [vmem:[#allocation7 + $0x43c] sm:$0xf]  ;;  %v4417_v41 = vld [vmem:[#allocation7 + $0x6a8] sm:$0xf0] }
  0xf8   :  { %2814 = vmatpush.bf16.msra.mxu3 %v4752_v58  ;;  %2773 = vmatmul.bf16.vlgmr.msra.gmra.mxu0 %v5773_v16  ;;  %v4129_v58 = vld [vmem:[#allocation7 + $0x468] sm:$0xf0] }
  0xf9   :  { %2821 = vmatpush.bf16.msrb.mxu0 %v3940_v59  ;;  %2787 = vmatmul.bf16.vlgmr.msra.gmra.mxu1 %v5779_v33  ;;  %v5348_v59 = vld [vmem:[#allocation7 + $0x73c] sm:$0xf]  ;;  %v4132_v3 = vor.u32 %v5252_v55, %v4129_v58  ;;  %v4804_v55 = vor.u32 %v5420_v42, %v4801_v43  ;;  %v4753_v58 = vld [vmem:[#allocation7 + $0x948] sm:$0xf0]  ;;  %v5283_v42 = vld [vmem:[#allocation7 + $0x52c] sm:$0xf0] }
  0xfa   :  { %2835 = vmatpush.bf16.msrb.mxu1 %v4324_v60  ;;  %2801 = vmatmul.bf16.vlgmr.msra.gmra.mxu2 %v5771_v9  ;;  %v4513_v60 = vld [vmem:[#allocation7 + $0x768] sm:$0xf0]  ;;  %v4615_v43 = vld [vmem:[#allocation7 + $0x800] sm:$0xf] }
  0xfb   :  { %2849 = vmatpush.bf16.msrb.mxu2 %v4708_v61  ;;  %2815 = vmatmul.bf16.vlgmr.msra.gmra.mxu3 %v5776_v20  ;;  %v2564_v61 = vpop.f32.mrf.mxu1  ;;  %v4516_v4 = vor.u32 %v5348_v59, %v4513_v60  ;;  %v3943_v59 = vld [vmem:[#allocation7 + $0x2c0] sm:$0xf]  ;;  %v5211_v60 = vld [vmem:[#allocation7 + $0x2ec] sm:$0xf0] }
  0xfc   :  { %2863 = vmatpush.bf16.msrb.mxu3 %v5092_v2  ;;  %v2565_v1 = vadd.f32 %v2564_v61, %v2551_v56  ;;  %v3748_v2 = vor.u32 %v5156_v52, %v3745_v53  ;;  %v3985_v52 = vld [vmem:[#allocation7 + $0x348] sm:$0xf0]  ;;  %v5312_v53 = vld [vmem:[#allocation7 + $0x61c] sm:$0xf]  ;;  %v4327_v61 = vld [vmem:[#allocation7 + $0x5c0] sm:$0xf]  ;;  %v3944_v6 = vor.u32 %v5211_v60, %v3943_v59 }
  0xfd   :  { %2822 = vmatpush.bf16.msrb.mxu0 %v3892_v8  ;;  %v2578_v8 = vpop.f32.mrf.mxu2  ;;  %v4369_v56 = vld [vmem:[#allocation7 + $0x648] sm:$0xf0]  ;;  %v6070_v59 = vperm.slane %v5799_v54, 3  ;;  %v5271_v60 = vld [vmem:[#allocation7 + $0x4cc] sm:$0xf0] }
  0xfe   :  { %2836 = vmatpush.bf16.msrb.mxu1 %v4276_v12  ;;  %v4900_v12 = vor.u32 %v5444_v63, %v4897_v0  ;;  %v2579_v18 = vadd.f32 %v2578_v8, %v2565_v1  ;;  %v2592_v23 = vpop.f32.mrf.mxu3  ;;  %v5307_v0 = vld [vmem:[#allocation7 + $0x5ec] sm:$0xf0]  ;;  %v4711_v1 = vld [vmem:[#allocation7 + $0x8c0] sm:$0xf] }
  0xff   :  { %2850 = vmatpush.bf16.msrb.mxu2 %v4660_v13  ;;  %v4081_v13 = vld [vmem:[#allocation7 + $0x408] sm:$0xf0]  ;;  %v5499_v8 = vld [vmem:[#allocation7 + $0xbec] sm:$0xf0] }
 0x100   :  { %2864 = vmatpush.bf16.msrb.mxu3 %v5044_v19  ;;  %v5432_v19 = vld [vmem:[#allocation7 + $0x9dc] sm:$0xf]  ;;  %v5838_v26 = vadd.f32 %v2592_v23, %v2579_v18  ;;  %v4084_v27 = vor.u32 %v5240_v7, %v4081_v13  ;;  %v5095_v7 = vld [vmem:[#allocation7 + $0xbc0] sm:$0xf]  ;;  %v5391_v23 = vld [vmem:[#allocation7 + $0x88c] sm:$0xf0] }
 0x101   :  { %2823 = vmatpush.bf16.msrb.mxu0 %v3844_v28  ;;  %v4468_v28 = vor.u32 %v5336_v15, %v4465_v17  ;;  %v4852_v35 = vor.u32 %v5432_v19, %v4849_v21  ;;  %v3895_v15 = vld [vmem:[#allocation7 + $0x260] sm:$0xf]  ;;  %v5199_v17 = vld [vmem:[#allocation7 + $0x28c] sm:$0xf0] }
 0x102   :  { %2837 = vmatpush.bf16.msrb.mxu1 %v4228_v30  ;;  %v3649_v30 = vld [vmem:[#allocation7 + $0xa8] sm:$0xf0]  ;;  %v4279_v18 = vld [vmem:[#allocation7 + $0x560] sm:$0xf]  ;;  %v5295_v19 = vld [vmem:[#allocation7 + $0x58c] sm:$0xf0] }
 0x103   :  { %2851 = vmatpush.bf16.msrb.mxu2 %v4612_v34  ;;  %v5228_v34 = vld [vmem:[#allocation7 + $0x37c] sm:$0xf]  ;;  %v3652_v44 = vor.u32 %v5132_v29, %v3649_v30  ;;  %v4663_v21 = vld [vmem:[#allocation7 + $0x860] sm:$0xf]  ;;  %v5487_v29 = vld [vmem:[#allocation7 + $0xb8c] sm:$0xf0]  ;;  %v5840_v30 = vpop.f32.mrf.mxu0 }
 0x104   :  { %2865 = vmatpush.bf16.msrb.mxu3 %v4996_v39  ;;  %v5324_v39 = vld [vmem:[#allocation7 + $0x67c] sm:$0xf]  ;;  %v4036_v49 = vor.u32 %v5228_v34, %v4033_v36  ;;  %v4280_v34 = vor.u32 %v5295_v19, %v4279_v18  ;;  %v3847_v36 = vld [vmem:[#allocation7 + $0x200] sm:$0xf]  ;;  %v5355_v19 = vld [vmem:[#allocation7 + $0x76c] sm:$0xf0] }
 0x105   :  { %2824 = vmatpush.bf16.msrb.mxu0 %v3796_v47  ;;  %v3601_v47 = vld [vmem:[#allocation7 + $0x48] sm:$0xf0]  ;;  %v4519_v18 = vld [vmem:[#allocation7 + $0x740] sm:$0xf] }
 0x106   :  { %2838 = vmatpush.bf16.msrb.mxu1 %v4180_v50  ;;  %v4420_v50 = vor.u32 %v5324_v39, %v4417_v41  ;;  %v3604_v63 = vor.u32 %v5120_v45, %v3601_v47  ;;  %v5187_v39 = vld [vmem:[#allocation7 + $0x22c] sm:$0xf0]  ;;  %v4231_v41 = vld [vmem:[#allocation7 + $0x500] sm:$0xf]  ;;  %v5844_v45 = vpop.f32.mrf.mxu1 }
 0x107   :  { %2852 = vmatpush.bf16.msrb.mxu2 %v4564_v51  ;;  %v5216_v51 = vld [vmem:[#allocation7 + $0x31c] sm:$0xf] }
 0x108   :  { %2866 = vmatpush.bf16.msrb.mxu3 %v4948_v57  ;;  %v5408_v57 = vld [vmem:[#allocation7 + $0x91c] sm:$0xf] }
 0x109   :  { %2825 = vmatpush.bf16.msrb.mxu0 %v3748_v2  ;;  %v5403_v2 = vld [vmem:[#allocation7 + $0x8ec] sm:$0xf0]  ;;  %v4756_v5 = vor.u32 %v5408_v57, %v4753_v58  ;;  %v4183_v57 = vld [vmem:[#allocation7 + $0x4a0] sm:$0xf]  ;;  %v5848_v58 = vpop.f32.mrf.mxu2 }
 0x10a   :  { %2839 = vmatpush.bf16.msrb.mxu1 %v4132_v3  ;;  %v3988_v3 = vor.u32 %v5216_v51, %v3985_v52  ;;  %v4712_v13 = vor.u32 %v5403_v2, %v4711_v1  ;;  %v5475_v51 = vld [vmem:[#allocation7 + $0xb2c] sm:$0xf0]  ;;  %v3799_v52 = vld [vmem:[#allocation7 + $0x1a0] sm:$0xf] }
 0x10b   :  { %2853 = vmatpush.bf16.msrb.mxu2 %v4516_v4  ;;  %v4372_v4 = vor.u32 %v5312_v53, %v4369_v56  ;;  %v4232_v53 = vor.u32 %v5283_v42, %v4231_v41  ;;  %v5175_v56 = vld [vmem:[#allocation7 + $0x1cc] sm:$0xf0]  ;;  %v4087_v41 = vld [vmem:[#allocation7 + $0x3e0] sm:$0xf] }
 0x10c   :  { %2867 = vmatpush.bf16.msrb.mxu3 %v4900_v12  ;;  %v4328_v12 = vor.u32 %v5307_v0, %v4327_v61  ;;  %v4567_v61 = vld [vmem:[#allocation7 + $0x7a0] sm:$0xf]  ;;  %v5851_v0 = vpop.f32.mrf.mxu3  ;;  %v3800_v2 = vor.u32 %v5175_v56, %v3799_v52 }
 0x10d   :  { %2826 = vmatpush.bf16.msrb.mxu0 %v3700_v24  ;;  %v5096_v24 = vor.u32 %v5499_v8, %v5095_v7  ;;  %v3751_v8 = vld [vmem:[#allocation7 + $0x140] sm:$0xf] }
 0x10e   :  { %2840 = vmatpush.bf16.msrb.mxu1 %v4084_v27  ;;  %v3896_v27 = vor.u32 %v5199_v17, %v3895_v15  ;;  %v5259_v17 = vld [vmem:[#allocation7 + $0x46c] sm:$0xf0] }
 0x10f   :  { %2854 = vmatpush.bf16.msrb.mxu2 %v4468_v28  ;;  %v5047_v28 = vld [vmem:[#allocation7 + $0xb60] sm:$0xf] }
 0x110   :  { %2868 = vmatpush.bf16.msrb.mxu3 %v4852_v35  ;;  %v4664_v35 = vor.u32 %v5391_v23, %v4663_v21  ;;  %v5048_v47 = vor.u32 %v5487_v29, %v5047_v28  ;;  %v4903_v28 = vld [vmem:[#allocation7 + $0xa40] sm:$0xf]  ;;  %v5451_v29 = vld [vmem:[#allocation7 + $0xa6c] sm:$0xf0] }
 0x111   :  { %2827 = vmatpush.bf16.msrb.mxu0 %v3652_v44  ;;  %v5379_v44 = vld [vmem:[#allocation7 + $0x82c] sm:$0xf0] }
 0x112   :  { %2841 = vmatpush.bf16.msrb.mxu1 %v4036_v49  ;;  %v3848_v49 = vor.u32 %v5187_v39, %v3847_v36  ;;  %v3703_v36 = vld [vmem:[#allocation7 + $0xe0] sm:$0xf]  ;;  %v5151_v39 = vld [vmem:[#allocation7 + $0x10c] sm:$0xf0] }
 0x113   :  { %2855 = vmatpush.bf16.msrb.mxu2 %v4420_v50  ;;  %v4999_v50 = vld [vmem:[#allocation7 + $0xb00] sm:$0xf]  ;;  %v3704_v52 = vor.u32 %v5151_v39, %v3703_v36  ;;  %v5397_v36 = vld [vmem:[#allocation7 + $0x8c4] sm:$0xf]  ;;  %v4713_v39 = vld [vmem:[#allocation7 + $0x8f0] sm:$0xf0] }
 0x114   :  { %2869 = vmatpush.bf16.msrb.mxu3 %v4804_v55  ;;  %v4616_v55 = vor.u32 %v5379_v44, %v4615_v43  ;;  %v5000_v1 = vor.u32 %v5475_v51, %v4999_v50  ;;  %v5247_v43 = vld [vmem:[#allocation7 + $0x40c] sm:$0xf0]  ;;  %v4471_v44 = vld [vmem:[#allocation7 + $0x6e0] sm:$0xf]  ;;  %v4904_v51 = vor.u32 %v5451_v29, %v4903_v28  ;;  %v5301_v28 = vld [vmem:[#allocation7 + $0x5c4] sm:$0xf] }
 0x115   :  { %2828 = vmatpush.bf16.msrb.mxu0 %v3604_v63  ;;  %v5367_v63 = vld [vmem:[#allocation7 + $0x7cc] sm:$0xf0]  ;;  %v4329_v29 = vld [vmem:[#allocation7 + $0x5f0] sm:$0xf0] }
 0x116   :  { %2842 = vmatpush.bf16.msrb.mxu1 %v3988_v3  ;;  %v4951_v3 = vld [vmem:[#allocation7 + $0xaa0] sm:$0xf]  ;;  %v4568_v7 = vor.u32 %v5367_v63, %v4567_v61  ;;  %v2620_v21 = vpop.f32.mrf.mxu1  ;;  %v5139_v63 = vld [vmem:[#allocation7 + $0xac] sm:$0xf0] }
 0x117   :  { %2856 = vmatpush.bf16.msrb.mxu2 %v4372_v4  ;;  %v5463_v4 = vld [vmem:[#allocation7 + $0xacc] sm:$0xf0]  ;;  %v3655_v61 = vld [vmem:[#allocation7 + $0x80] sm:$0xf] }
 0x118   :  { %2870 = vmatpush.bf16.msrb.mxu3 %v4756_v5  ;;  %2829 = vmatmul.bf16.vlgmr.msrb.gmra.mxu0 %v5773_v16  ;;  %v2606_v5 = vpop.f32.mrf.mxu0 }
 0x119   :  { %2877 = vmatpush.bf16.msra.mxu0 %v3944_v6  ;;  %2843 = vmatmul.bf16.vlgmr.msrb.gmra.mxu1 %v5779_v33  ;;  %v4184_v6 = vor.u32 %v5271_v60, %v4183_v57  ;;  %v2607_v15 = vadd.f32 %v2606_v5, %v6070_v59  ;;  %v4088_v57 = vor.u32 %v5247_v43, %v4087_v41  ;;  %v4759_v43 = vld [vmem:[#allocation7 + $0x920] sm:$0xf]  ;;  %v5212_v59 = vld [vmem:[#allocation7 + $0x2f4] sm:$0xf0] }
 0x11a   :  { %2891 = vmatpush.bf16.msra.mxu1 %v4328_v12  ;;  %2857 = vmatmul.bf16.vlgmr.msrb.gmra.mxu2 %v5771_v9  ;;  %v5163_v12 = vld [vmem:[#allocation7 + $0x16c] sm:$0xf0] }
 0x11b   :  { %2905 = vmatpush.bf16.msra.mxu2 %v4712_v13  ;;  %2871 = vmatmul.bf16.vlgmr.msrb.gmra.mxu3 %v5776_v20  ;;  %v4135_v13 = vld [vmem:[#allocation7 + $0x440] sm:$0xf]  ;;  %v2621_v23 = vadd.f32 %v2620_v21, %v2607_v15 }
 0x11c   :  { %2919 = vmatpush.bf16.msra.mxu3 %v5096_v24  ;;  %v4952_v24 = vor.u32 %v5463_v4, %v4951_v3  ;;  %v4423_v3 = vld [vmem:[#allocation7 + $0x680] sm:$0xf]  ;;  %v5331_v4 = vld [vmem:[#allocation7 + $0x6ac] sm:$0xf0] }
 0x11d   :  { %2878 = vmatpush.bf16.msra.mxu0 %v3896_v27  ;;  %v3752_v27 = vor.u32 %v5163_v12, %v3751_v8  ;;  %v2634_v42 = vpop.f32.mrf.mxu2  ;;  %v5427_v8 = vld [vmem:[#allocation7 + $0x9ac] sm:$0xf0]  ;;  %v3607_v12 = vld [vmem:[#allocation7 + $0x20] sm:$0xf]  ;;  %v4424_v15 = vor.u32 %v5331_v4, %v4423_v3 }
 0x11e   :  { %2892 = vmatpush.bf16.msra.mxu1 %v4280_v34  ;;  %v4136_v34 = vor.u32 %v5259_v17, %v4135_v13  ;;  %v2648_v50 = vpop.f32.mrf.mxu3  ;;  %v5127_v17 = vld [vmem:[#allocation7 + $0x4c] sm:$0xf0]  ;;  %v4375_v21 = vld [vmem:[#allocation7 + $0x620] sm:$0xf] }
 0x11f   :  { %2906 = vmatpush.bf16.msra.mxu2 %v4664_v35  ;;  %v4520_v35 = vor.u32 %v5355_v19, %v4519_v18  ;;  %v3991_v18 = vld [vmem:[#allocation7 + $0x320] sm:$0xf]  ;;  %v5223_v19 = vld [vmem:[#allocation7 + $0x34c] sm:$0xf0] }
 0x120   :  { %2920 = vmatpush.bf16.msra.mxu3 %v5048_v47  ;;  %v5343_v47 = vld [vmem:[#allocation7 + $0x70c] sm:$0xf0]  ;;  %v3992_v41 = vor.u32 %v5223_v19, %v3991_v18  ;;  %v5860_v18 = vpop.f32.mrf.mxu1  ;;  %v5373_v19 = vld [vmem:[#allocation7 + $0x804] sm:$0xf] }
 0x121   :  { %2879 = vmatpush.bf16.msra.mxu0 %v3848_v49  ;;  %v2635_v49 = vadd.f32 %v2634_v42, %v2621_v23  ;;  %v4472_v60 = vor.u32 %v5343_v47, %v4471_v44  ;;  %v5319_v23 = vld [vmem:[#allocation7 + $0x64c] sm:$0xf0]  ;;  %6077 = vst [vmem:[#allocation19_spill] sm:$0xff] %v5860_v18  ;;  %v3905_v18 = vld [vmem:[#allocation7 + $0x298] sm:$0xf0] }
 0x122   :  { %2893 = vmatpush.bf16.msra.mxu1 %v4232_v53  ;;  %v4855_v53 = vld [vmem:[#allocation7 + $0x9e0] sm:$0xf]  ;;  %v4376_v42 = vor.u32 %v5319_v23, %v4375_v21  ;;  %v5415_v44 = vld [vmem:[#allocation7 + $0x94c] sm:$0xf0]  ;;  %v4617_v21 = vld [vmem:[#allocation7 + $0x830] sm:$0xf0] }
 0x123   :  { %2907 = vmatpush.bf16.msra.mxu2 %v4616_v55  ;;  %v5439_v55 = vld [vmem:[#allocation7 + $0xa0c] sm:$0xf0]  ;;  %v5855_v56 = vadd.f32 %v2648_v50, %v2635_v49  ;;  %v4332_v49 = vor.u32 %v5301_v28, %v4329_v29  ;;  %v5493_v50 = vld [vmem:[#allocation7 + $0xbc4] sm:$0xf]  ;;  %v5001_v29 = vld [vmem:[#allocation7 + $0xb30] sm:$0xf0] }
 0x124   :  { %2921 = vmatpush.bf16.msra.mxu3 %v5000_v1  ;;  %v4039_v1 = vld [vmem:[#allocation7 + $0x380] sm:$0xf]  ;;  %v4856_v5 = vor.u32 %v5439_v55, %v4855_v53  ;;  %v4716_v53 = vor.u32 %v5397_v36, %v4713_v39  ;;  %v3897_v55 = vld [vmem:[#allocation7 + $0x290] sm:$0xf0]  ;;  %v5469_v28 = vld [vmem:[#allocation7 + $0xb04] sm:$0xf] }
 0x125   :  { %2880 = vmatpush.bf16.msra.mxu0 %v3800_v2  ;;  %v5235_v2 = vld [vmem:[#allocation7 + $0x3ac] sm:$0xf0]  ;;  %v3801_v36 = vld [vmem:[#allocation7 + $0x1d0] sm:$0xf0]  ;;  %v5265_v39 = vld [vmem:[#allocation7 + $0x4a4] sm:$0xf] }
 0x126   :  { %2894 = vmatpush.bf16.msra.mxu1 %v4184_v6  ;;  %v3656_v6 = vor.u32 %v5139_v63, %v3655_v61  ;;  %v4040_v13 = vor.u32 %v5235_v2, %v4039_v1  ;;  %v4760_v61 = vor.u32 %v5415_v44, %v4759_v43  ;;  %v5385_v63 = vld [vmem:[#allocation7 + $0x864] sm:$0xf]  ;;  %v4665_v1 = vld [vmem:[#allocation7 + $0x890] sm:$0xf0] }
 0x127   :  { %2908 = vmatpush.bf16.msra.mxu2 %v4568_v7  ;;  %v4807_v7 = vld [vmem:[#allocation7 + $0x980] sm:$0xf]  ;;  %v5361_v43 = vld [vmem:[#allocation7 + $0x7a4] sm:$0xf]  ;;  %v4569_v44 = vld [vmem:[#allocation7 + $0x7d0] sm:$0xf0] }
 0x128   :  { %2922 = vmatpush.bf16.msra.mxu3 %v4952_v24  ;;  %v5205_v24 = vld [vmem:[#allocation7 + $0x2c4] sm:$0xf] }
 0x129   :  { %2881 = vmatpush.bf16.msra.mxu0 %v3752_v27  ;;  %v3945_v27 = vld [vmem:[#allocation7 + $0x2f0] sm:$0xf0] }
 0x12a   :  { %2895 = vmatpush.bf16.msra.mxu1 %v4136_v34  ;;  %v4808_v34 = vor.u32 %v5427_v8, %v4807_v7  ;;  %v3948_v47 = vor.u32 %v5205_v24, %v3945_v27  ;;  %v5181_v7 = vld [vmem:[#allocation7 + $0x204] sm:$0xf]  ;;  %v5857_v8 = vpop.f32.mrf.mxu0 }
 0x12b   :  { %2909 = vmatpush.bf16.msra.mxu2 %v4520_v35  ;;  %v3608_v35 = vor.u32 %v5127_v17, %v3607_v12  ;;  %v4668_v12 = vor.u32 %v5385_v63, %v4665_v1  ;;  %v4233_v17 = vld [vmem:[#allocation7 + $0x530] sm:$0xf0]  ;;  %v5253_v63 = vld [vmem:[#allocation7 + $0x444] sm:$0xf] }
 0x12c   :  { %2923 = vmatpush.bf16.msra.mxu3 %v4904_v51  ;;  %v5097_v51 = vld [vmem:[#allocation7 + $0xbf0] sm:$0xf0] }
 0x12d   :  { %2882 = vmatpush.bf16.msra.mxu0 %v3704_v52  ;;  %v5193_v52 = vld [vmem:[#allocation7 + $0x264] sm:$0xf]  ;;  %v5100_v2 = vor.u32 %v5493_v50, %v5097_v51  ;;  %v4137_v1 = vld [vmem:[#allocation7 + $0x470] sm:$0xf0] }
 0x12e   :  { %2896 = vmatpush.bf16.msra.mxu1 %v4088_v57  ;;  %v5289_v57 = vld [vmem:[#allocation7 + $0x564] sm:$0xf]  ;;  %v3900_v3 = vor.u32 %v5193_v52, %v3897_v55 }
 0x12f   :  { %2910 = vmatpush.bf16.msra.mxu2 %v4472_v60  ;;  %v4281_v60 = vld [vmem:[#allocation7 + $0x590] sm:$0xf0]  ;;  %v5457_v52 = vld [vmem:[#allocation7 + $0xaa4] sm:$0xf] }
 0x130   :  { %2924 = vmatpush.bf16.msra.mxu3 %v4856_v5  ;;  %v4284_v4 = vor.u32 %v5289_v57, %v4281_v60  ;;  %v5481_v5 = vld [vmem:[#allocation7 + $0xb64] sm:$0xf]  ;;  %v4572_v60 = vor.u32 %v5361_v43, %v4569_v44  ;;  %v4857_v44 = vld [vmem:[#allocation7 + $0xa10] sm:$0xf0] }
 0x131   :  { %2883 = vmatpush.bf16.msra.mxu0 %v3656_v6  ;;  %v5049_v6 = vld [vmem:[#allocation7 + $0xb90] sm:$0xf0]  ;;  %v5157_v55 = vld [vmem:[#allocation7 + $0x144] sm:$0xf] }
 0x132   :  { %2897 = vmatpush.bf16.msra.mxu1 %v4040_v13  ;;  %v3849_v13 = vld [vmem:[#allocation7 + $0x230] sm:$0xf0]  ;;  %v5052_v23 = vor.u32 %v5481_v5, %v5049_v6  ;;  %v5445_v6 = vld [vmem:[#allocation7 + $0xa44] sm:$0xf] }
 0x133   :  { %2911 = vmatpush.bf16.msra.mxu2 %v4424_v15  ;;  %v5277_v15 = vld [vmem:[#allocation7 + $0x504] sm:$0xf]  ;;  %v3852_v24 = vor.u32 %v5181_v7, %v3849_v13  ;;  %v4905_v13 = vld [vmem:[#allocation7 + $0xa70] sm:$0xf0] }
 0x134   :  { %2925 = vmatpush.bf16.msra.mxu3 %v4808_v34  ;;  %v4236_v27 = vor.u32 %v5277_v15, %v4233_v17  ;;  %v5169_v34 = vld [vmem:[#allocation7 + $0x1a4] sm:$0xf]  ;;  %v3705_v17 = vld [vmem:[#allocation7 + $0x110] sm:$0xf0] }
 0x135   :  { %2884 = vmatpush.bf16.msra.mxu0 %v3608_v35  ;;  %v4620_v35 = vor.u32 %v5373_v19, %v4617_v21  ;;  %v3804_v50 = vor.u32 %v5169_v34, %v3801_v36  ;;  %v5869_v57 = vpop.f32.mrf.mxu0  ;;  %v5145_v15 = vld [vmem:[#allocation7 + $0xe4] sm:$0xf]  ;;  %v4473_v34 = vld [vmem:[#allocation7 + $0x710] sm:$0xf0]  ;;  %v4908_v36 = vor.u32 %v5445_v6, %v4905_v13 }
 0x136   :  { %2898 = vmatpush.bf16.msra.mxu1 %v3992_v41  ;;  %v4185_v41 = vld [vmem:[#allocation7 + $0x4d0] sm:$0xf0]  ;;  %v5241_v21 = vld [vmem:[#allocation7 + $0x3e4] sm:$0xf] }
 0x137   :  { %2912 = vmatpush.bf16.msra.mxu2 %v4376_v42  ;;  %v5865_v42 = vpop.f32.mrf.mxu2  ;;  %v4188_v51 = vor.u32 %v5265_v39, %v4185_v41  ;;  %v3708_v39 = vor.u32 %v5145_v15, %v3705_v17  ;;  %v5433_v43 = vld [vmem:[#allocation7 + $0x9e4] sm:$0xf]  ;;  %v3609_v15 = vld [vmem:[#allocation7 + $0x50] sm:$0xf0] }
 0x138   :  { %2885 = vmatmul.bf16.vlgmr.msra.gmra.mxu0 %v5773_v16  ;;  %2926 = vmatpush.bf16.msra.mxu3 %v4760_v61  ;;  %6078 = vst [vmem:[#allocation20_spill] sm:$0xff] %v5865_v42  ;;  %v3753_v61 = vld [vmem:[#allocation7 + $0x170] sm:$0xf0]  ;;  %v5121_v13 = vld [vmem:[#allocation7 + $0x24] sm:$0xf] }
 0x139   :  { %2933 = vmatpush.bf16.msrb.mxu0 %v3948_v47  ;;  %2899 = vmatmul.bf16.vlgmr.msra.gmra.mxu1 %v5779_v33  ;;  %v5867_v47 = vpop.f32.mrf.mxu3  ;;  %v3756_v7 = vor.u32 %v5157_v55, %v3753_v61  ;;  %v4041_v55 = vld [vmem:[#allocation7 + $0x3b0] sm:$0xf0]  ;;  %v5217_v17 = vld [vmem:[#allocation7 + $0x324] sm:$0xf] }
 0x13a   :  { %2947 = vmatpush.bf16.msrb.mxu1 %v4332_v49  ;;  %2913 = vmatmul.bf16.vlgmr.msra.gmra.mxu2 %v5771_v9  ;;  %6079 = vst [vmem:[#allocation21_spill] sm:$0xff] %v5867_v47  ;;  %v5004_v49 = vor.u32 %v5469_v28, %v5001_v29  ;;  %v5337_v29 = vld [vmem:[#allocation7 + $0x6e4] sm:$0xf] }
 0x13b   :  { %2961 = vmatpush.bf16.msrb.mxu2 %v4716_v53  ;;  %2927 = vmatmul.bf16.vlgmr.msra.gmra.mxu3 %v5776_v20  ;;  %v4953_v53 = vld [vmem:[#allocation7 + $0xad0] sm:$0xf0] }
 0x13c   :  { %2975 = vmatpush.bf16.msrb.mxu3 %v5100_v2  ;;  %v5871_v2 = vpop.f32.mrf.mxu1  ;;  %v4956_v5 = vor.u32 %v5457_v52, %v4953_v53  ;;  %v3657_v52 = vld [vmem:[#allocation7 + $0xb0] sm:$0xf0]  ;;  %v5229_v53 = vld [vmem:[#allocation7 + $0x384] sm:$0xf] }
 0x13d   :  { %2934 = vmatpush.bf16.msrb.mxu0 %v3900_v3  ;;  %v5349_v3 = vld [vmem:[#allocation7 + $0x744] sm:$0xf] }
 0x13e   :  { %2948 = vmatpush.bf16.msrb.mxu1 %v4284_v4  ;;  %v4521_v4 = vld [vmem:[#allocation7 + $0x770] sm:$0xf0] }
 0x13f   :  { %2962 = vmatpush.bf16.msrb.mxu2 %v4668_v12  ;;  %v4140_v12 = vor.u32 %v5253_v63, %v4137_v1  ;;  %v4524_v19 = vor.u32 %v5349_v3, %v4521_v4  ;;  %v5876_v28 = vpop.f32.mrf.mxu2  ;;  %v5325_v63 = vld [vmem:[#allocation7 + $0x684] sm:$0xf]  ;;  %v4425_v1 = vld [vmem:[#allocation7 + $0x6b0] sm:$0xf0]  ;;  %v4860_v3 = vor.u32 %v5433_v43, %v4857_v44 }
 0x140   :  { %2976 = vmatpush.bf16.msrb.mxu3 %v5052_v23  ;;  %v4089_v23 = vld [vmem:[#allocation7 + $0x410] sm:$0xf0]  ;;  %v5421_v4 = vld [vmem:[#allocation7 + $0x984] sm:$0xf] }
 0x141   :  { %2935 = vmatpush.bf16.msrb.mxu0 %v3852_v24  ;;  %v5873_v24 = vld [vmem:[#allocation8] sm:$0xff]  ;;  %v4092_v41 = vor.u32 %v5241_v21, %v4089_v23  ;;  %v3993_v21 = vld [vmem:[#allocation7 + $0x350] sm:$0xf0] }
 0x142   :  { %2949 = vmatpush.bf16.msrb.mxu1 %v4236_v27  ;;  %v6075_v27 = vperm.slane %v5873_v24, 4  ;;  %v5313_v23 = vld [vmem:[#allocation7 + $0x624] sm:$0xf] }
 0x143   :  { %2963 = vmatpush.bf16.msrb.mxu2 %v4620_v35  ;;  %v5878_v35 = vpop.f32.mrf.mxu3 }
 0x144   :  { %2977 = vmatpush.bf16.msrb.mxu3 %v5004_v49  ;;  %v5133_v49 = vld [vmem:[#allocation7 + $0x84] sm:$0xf]  ;;  %v2678_v61 = vpop.f32.mrf.mxu1 }
 0x145   :  { %2936 = vmatpush.bf16.msrb.mxu0 %v3804_v50  ;;  %v2664_v50 = vpop.f32.mrf.mxu0 }
 0x146   :  { %2950 = vmatpush.bf16.msrb.mxu1 %v4188_v51  ;;  %v4476_v51 = vor.u32 %v5337_v29, %v4473_v34  ;;  %v4377_v29 = vld [vmem:[#allocation7 + $0x650] sm:$0xf0] }
 0x147   :  { %2964 = vmatpush.bf16.msrb.mxu2 %v4572_v60  ;;  %v2665_v60 = vadd.f32 %v2664_v50, %v6075_v27  ;;  %v2692_v34 = vpop.f32.mrf.mxu2  ;;  %v3951_v50 = vld [vmem:[#allocation7 + $0x2c8] sm:$0xf]  ;;  %v5302_v27 = vld [vmem:[#allocation7 + $0x5cc] sm:$0xf] }
 0x148   :  { %2978 = vmatpush.bf16.msrb.mxu3 %v4956_v5  ;;  %v4809_v5 = vld [vmem:[#allocation7 + $0x9b0] sm:$0xf0] }
 0x149   :  { %2937 = vmatpush.bf16.msrb.mxu0 %v3756_v7  ;;  %v2679_v6 = vadd.f32 %v2678_v61, %v2665_v60  ;;  %v3660_v7 = vor.u32 %v5133_v49, %v3657_v52  ;;  %v4812_v60 = vor.u32 %v5421_v4, %v4809_v5  ;;  %v5404_v49 = vld [vmem:[#allocation7 + $0x8f4] sm:$0xf0]  ;;  %v3612_v52 = vor.u32 %v5121_v13, %v3609_v15  ;;  %v4671_v13 = vld [vmem:[#allocation7 + $0x868] sm:$0xf] }
 0x14a   :  { %2951 = vmatpush.bf16.msrb.mxu1 %v4140_v12  ;;  %v4044_v12 = vor.u32 %v5229_v53, %v4041_v55  ;;  %v3996_v53 = vor.u32 %v5217_v17, %v3993_v21  ;;  %v4761_v55 = vld [vmem:[#allocation7 + $0x950] sm:$0xf0]  ;;  %v5200_v4 = vld [vmem:[#allocation7 + $0x294] sm:$0xf0] }
 0x14b   :  { %2965 = vmatpush.bf16.msrb.mxu2 %v4524_v19  ;;  %v4428_v19 = vor.u32 %v5325_v63, %v4425_v1  ;;  %v2693_v43 = vadd.f32 %v2692_v34, %v2679_v6  ;;  %v2706_v44 = vpop.f32.mrf.mxu3  ;;  %v4380_v63 = vor.u32 %v5313_v23, %v4377_v29  ;;  %v3952_v1 = vor.u32 %v5212_v59, %v3951_v50  ;;  %v5392_v15 = vld [vmem:[#allocation7 + $0x894] sm:$0xf0]  ;;  %v3855_v23 = vld [vmem:[#allocation7 + $0x208] sm:$0xf] }
 0x14c   :  { %2979 = vmatpush.bf16.msrb.mxu3 %v4908_v36  ;;  %v4335_v36 = vld [vmem:[#allocation7 + $0x5c8] sm:$0xf]  ;;  %v5488_v59 = vld [vmem:[#allocation7 + $0xb94] sm:$0xf0]  ;;  %v4672_v50 = vor.u32 %v5392_v15, %v4671_v13 }
 0x14d   :  { %2938 = vmatpush.bf16.msrb.mxu0 %v3708_v39  ;;  %v5308_v39 = vld [vmem:[#allocation7 + $0x5f4] sm:$0xf0]  ;;  %v5882_v61 = vadd.f32 %v2706_v44, %v2693_v43 }
 0x14e   :  { %2952 = vmatpush.bf16.msrb.mxu1 %v4092_v41  ;;  %v4719_v41 = vld [vmem:[#allocation7 + $0x8c8] sm:$0xf]  ;;  %v4336_v6 = vor.u32 %v5308_v39, %v4335_v36  ;;  %v5188_v29 = vld [vmem:[#allocation7 + $0x234] sm:$0xf0] }
 0x14f   :  { %2966 = vmatpush.bf16.msrb.mxu2 %v4476_v51  ;;  %v5409_v51 = vld [vmem:[#allocation7 + $0x924] sm:$0xf]  ;;  %v4720_v34 = vor.u32 %v5404_v49, %v4719_v41  ;;  %v4239_v36 = vld [vmem:[#allocation7 + $0x508] sm:$0xf]  ;;  %v5284_v43 = vld [vmem:[#allocation7 + $0x534] sm:$0xf0] }
 0x150   :  { %2980 = vmatpush.bf16.msrb.mxu3 %v4860_v3  ;;  %v3903_v3 = vld [vmem:[#allocation7 + $0x268] sm:$0xf]  ;;  %v4764_v5 = vor.u32 %v5409_v51, %v4761_v55  ;;  %v5380_v44 = vld [vmem:[#allocation7 + $0x834] sm:$0xf0]  ;;  %v4240_v41 = vor.u32 %v5284_v43, %v4239_v36 }
 0x151   :  { %2939 = vmatpush.bf16.msrb.mxu0 %v3660_v7  ;;  %v5296_v7 = vld [vmem:[#allocation7 + $0x594] sm:$0xf0]  ;;  %v3904_v17 = vor.u32 %v5200_v4, %v3903_v3  ;;  %v5007_v39 = vld [vmem:[#allocation7 + $0xb08] sm:$0xf] }
 0x152   :  { %2953 = vmatpush.bf16.msrb.mxu1 %v4044_v12  ;;  %v5104_v12 = vor.u32 %v5500_v38, %v5103_v32  ;;  %v4288_v21 = vor.u32 %v5296_v7, %v4287_v62  ;;  %v4623_v38 = vld [vmem:[#allocation7 + $0x808] sm:$0xf]  ;;  %v5476_v62 = vld [vmem:[#allocation7 + $0xb34] sm:$0xf0] }
 0x153   :  { %2967 = vmatpush.bf16.msrb.mxu2 %v4428_v19  ;;  %v5055_v19 = vld [vmem:[#allocation7 + $0xb68] sm:$0xf]  ;;  %v5272_v55 = vld [vmem:[#allocation7 + $0x4d4] sm:$0xf0] }
 0x154   :  { %2981 = vmatpush.bf16.msrb.mxu3 %v4812_v60  ;;  %v5056_v32 = vor.u32 %v5488_v59, %v5055_v19  ;;  %v3856_v60 = vor.u32 %v5188_v29, %v3855_v23  ;;  %v3807_v49 = vld [vmem:[#allocation7 + $0x1a8] sm:$0xf]  ;;  %v5464_v4 = vld [vmem:[#allocation7 + $0xad4] sm:$0xf0] }
 0x155   :  { %2940 = vmatpush.bf16.msrb.mxu0 %v3612_v52  ;;  %v5176_v52 = vld [vmem:[#allocation7 + $0x1d4] sm:$0xf0]  ;;  %v4191_v51 = vld [vmem:[#allocation7 + $0x4a8] sm:$0xf]  ;;  %v5888_v13 = vpop.f32.mrf.mxu0 }
 0x156   :  { %2954 = vmatpush.bf16.msrb.mxu1 %v3996_v53  ;;  %v4624_v53 = vor.u32 %v5380_v44, %v4623_v38  ;;  %v4959_v3 = vld [vmem:[#allocation7 + $0xaa8] sm:$0xf]  ;;  %v5260_v19 = vld [vmem:[#allocation7 + $0x474] sm:$0xf0]  ;;  %v5890_v59 = vpop.f32.mrf.mxu1 }
 0x157   :  { %2968 = vmatpush.bf16.msrb.mxu2 %v4380_v63  ;;  %v5008_v63 = vor.u32 %v5476_v62, %v5007_v39  ;;  %v3759_v7 = vld [vmem:[#allocation7 + $0x148] sm:$0xf]  ;;  %v5356_v29 = vld [vmem:[#allocation7 + $0x774] sm:$0xf0] }
 0x158   :  { %2982 = vmatpush.bf16.msrb.mxu3 %v4764_v5  ;;  %2941 = vmatmul.bf16.vlgmr.msrb.gmra.mxu0 %v5773_v16  ;;  %v4192_v5 = vor.u32 %v5272_v55, %v4191_v51  ;;  %v4527_v23 = vld [vmem:[#allocation7 + $0x748] sm:$0xf]  ;;  %v5452_v43 = vld [vmem:[#allocation7 + $0xa74] sm:$0xf0] }
 0x159   :  { %2989 = vmatpush.bf16.msra.mxu0 %v3952_v1  ;;  %2955 = vmatmul.bf16.vlgmr.msrb.gmra.mxu1 %v5779_v33  ;;  %v4575_v1 = vld [vmem:[#allocation7 + $0x7a8] sm:$0xf]  ;;  %v5152_v44 = vld [vmem:[#allocation7 + $0x114] sm:$0xf0] }
 0x15a   :  { %3003 = vmatpush.bf16.msra.mxu1 %v4336_v6  ;;  %2969 = vmatmul.bf16.vlgmr.msrb.gmra.mxu2 %v5771_v9  ;;  %v5368_v6 = vld [vmem:[#allocation7 + $0x7d4] sm:$0xf0]  ;;  %v4911_v36 = vld [vmem:[#allocation7 + $0xa48] sm:$0xf] }
 0x15b   :  { %3017 = vmatpush.bf16.msra.mxu2 %v4720_v34  ;;  %2983 = vmatmul.bf16.vlgmr.msrb.gmra.mxu3 %v5776_v20  ;;  %v3808_v34 = vor.u32 %v5176_v52, %v3807_v49  ;;  %v4576_v15 = vor.u32 %v5368_v6, %v4575_v1  ;;  %v3711_v38 = vld [vmem:[#allocation7 + $0xe8] sm:$0xf]  ;;  %v5248_v62 = vld [vmem:[#allocation7 + $0x414] sm:$0xf0]  ;;  %v4912_v52 = vor.u32 %v5452_v43, %v4911_v36 }
 0x15c   :  { %3031 = vmatpush.bf16.msra.mxu3 %v5104_v12  ;;  %v5164_v12 = vld [vmem:[#allocation7 + $0x174] sm:$0xf0]  ;;  %v4095_v39 = vld [vmem:[#allocation7 + $0x3e8] sm:$0xf] }
 0x15d   :  { %2990 = vmatpush.bf16.msra.mxu0 %v3904_v17  ;;  %v4143_v17 = vld [vmem:[#allocation7 + $0x448] sm:$0xf]  ;;  %v5893_v49 = vpop.f32.mrf.mxu2  ;;  %v5344_v51 = vld [vmem:[#allocation7 + $0x714] sm:$0xf0] }
 0x15e   :  { %3004 = vmatpush.bf16.msra.mxu1 %v4288_v21  ;;  %v4960_v21 = vor.u32 %v5464_v4, %v4959_v3  ;;  %v5895_v55 = vpop.f32.mrf.mxu3  ;;  %v4863_v1 = vld [vmem:[#allocation7 + $0x9e8] sm:$0xf]  ;;  %v5440_v6 = vld [vmem:[#allocation7 + $0xa14] sm:$0xf0] }
 0x15f   :  { %3018 = vmatpush.bf16.msra.mxu2 %v4672_v50  ;;  %v3760_v50 = vor.u32 %v5164_v12, %v3759_v7  ;;  %v3663_v3 = vld [vmem:[#allocation7 + $0x88] sm:$0xf]  ;;  %v5140_v4 = vld [vmem:[#allocation7 + $0xb4] sm:$0xf0] }
 0x160   :  { %3032 = vmatpush.bf16.msra.mxu3 %v5056_v32  ;;  %v4144_v32 = vor.u32 %v5260_v19, %v4143_v17  ;;  %v4047_v12 = vld [vmem:[#allocation7 + $0x388] sm:$0xf]  ;;  %v2734_v19 = vpop.f32.mrf.mxu1  ;;  %v3664_v36 = vor.u32 %v5140_v4, %v3663_v3  ;;  %v5428_v43 = vld [vmem:[#allocation7 + $0x9b4] sm:$0xf0]  ;;  %v5398_v3 = vld [vmem:[#allocation7 + $0x8cc] sm:$0xf] }
 0x161   :  { %2991 = vmatpush.bf16.msra.mxu0 %v3856_v60  ;;  %v4528_v60 = vor.u32 %v5356_v29, %v4527_v23  ;;  %v4431_v23 = vld [vmem:[#allocation7 + $0x688] sm:$0xf]  ;;  %v5332_v29 = vld [vmem:[#allocation7 + $0x6b4] sm:$0xf0] }
 0x162   :  { %3005 = vmatpush.bf16.msra.mxu1 %v4240_v41  ;;  %v6074_v41 = vperm.slane %v5873_v24, 5 }
 0x163   :  { %3019 = vmatpush.bf16.msra.mxu2 %v4624_v53  ;;  %v4479_v53 = vld [vmem:[#allocation7 + $0x6e8] sm:$0xf] }
 0x164   :  { %3033 = vmatpush.bf16.msra.mxu3 %v5008_v63  ;;  %v3712_v63 = vor.u32 %v5152_v44, %v3711_v38  ;;  %v4480_v7 = vor.u32 %v5344_v51, %v4479_v53  ;;  %v5128_v38 = vld [vmem:[#allocation7 + $0x54] sm:$0xf0]  ;;  %v4383_v53 = vld [vmem:[#allocation7 + $0x628] sm:$0xf]  ;;  %v4432_v51 = vor.u32 %v5332_v29, %v4431_v23  ;;  %v5494_v23 = vld [vmem:[#allocation7 + $0xbcc] sm:$0xf] }
 0x165   :  { %2992 = vmatpush.bf16.msra.mxu0 %v3808_v34  ;;  %v4096_v34 = vor.u32 %v5248_v62, %v4095_v39  ;;  %v3999_v39 = vld [vmem:[#allocation7 + $0x328] sm:$0xf]  ;;  %v5224_v62 = vld [vmem:[#allocation7 + $0x354] sm:$0xf0]  ;;  %v5105_v29 = vld [vmem:[#allocation7 + $0xbf8] sm:$0xf0] }
 0x166   :  { %3006 = vmatpush.bf16.msra.mxu1 %v4192_v5  ;;  %v2720_v5 = vpop.f32.mrf.mxu0  ;;  %v2762_v47 = vpop.f32.mrf.mxu3 }
 0x167   :  { %3020 = vmatpush.bf16.msra.mxu2 %v4576_v15  ;;  %v5236_v15 = vld [vmem:[#allocation7 + $0x3b4] sm:$0xf0]  ;;  %v2721_v17 = vadd.f32 %v2720_v5, %v6074_v41  ;;  %v5206_v41 = vld [vmem:[#allocation7 + $0x2cc] sm:$0xf] }
 0x168   :  { %3034 = vmatpush.bf16.msra.mxu3 %v4960_v21  ;;  %v4864_v21 = vor.u32 %v5440_v6, %v4863_v1  ;;  %v5320_v5 = vld [vmem:[#allocation7 + $0x654] sm:$0xf0]  ;;  %v2748_v1 = vpop.f32.mrf.mxu2 }
 0x169   :  { %2993 = vmatpush.bf16.msra.mxu0 %v3760_v50  ;;  %v4815_v50 = vld [vmem:[#allocation7 + $0x988] sm:$0xf]  ;;  %v2735_v44 = vadd.f32 %v2734_v19, %v2721_v17  ;;  %v4000_v19 = vor.u32 %v5224_v62, %v3999_v39  ;;  %v5482_v39 = vld [vmem:[#allocation7 + $0xb6c] sm:$0xf] }
 0x16a   :  { %3007 = vmatpush.bf16.msra.mxu1 %v4144_v32  ;;  %v3615_v32 = vld [vmem:[#allocation7 + $0x28] sm:$0xf]  ;;  %v4816_v6 = vor.u32 %v5428_v43, %v4815_v50  ;;  %v5194_v43 = vld [vmem:[#allocation7 + $0x26c] sm:$0xf] }
 0x16b   :  { %3021 = vmatpush.bf16.msra.mxu2 %v4528_v60  ;;  %v4048_v60 = vor.u32 %v5236_v15, %v4047_v12  ;;  %v2749_v4 = vadd.f32 %v2748_v1, %v2735_v44  ;;  %v3616_v17 = vor.u32 %v5128_v38, %v3615_v32  ;;  %v4767_v12 = vld [vmem:[#allocation7 + $0x928] sm:$0xf]  ;;  %v5416_v15 = vld [vmem:[#allocation7 + $0x954] sm:$0xf0]  ;;  %v4289_v32 = vld [vmem:[#allocation7 + $0x598] sm:$0xf0]  ;;  %v5108_v38 = vor.u32 %v5494_v23, %v5105_v29 }
 0x16c   :  { %3035 = vmatpush.bf16.msra.mxu3 %v4912_v52  ;;  %v3953_v52 = vld [vmem:[#allocation7 + $0x2f8] sm:$0xf0]  ;;  %v4768_v1 = vor.u32 %v5416_v15, %v4767_v12  ;;  %v5170_v12 = vld [vmem:[#allocation7 + $0x1ac] sm:$0xf] }
 0x16d   :  { %2994 = vmatpush.bf16.msra.mxu0 %v3712_v63  ;;  %v4337_v63 = vld [vmem:[#allocation7 + $0x5f8] sm:$0xf0]  ;;  %v5899_v42 = vadd.f32 %v2762_v47, %v2749_v4  ;;  %v5470_v4 = vld [vmem:[#allocation7 + $0xb0c] sm:$0xf] }
 0x16e   :  { %3008 = vmatpush.bf16.msra.mxu1 %v4096_v34  ;;  %v4721_v34 = vld [vmem:[#allocation7 + $0x8f8] sm:$0xf0]  ;;  %v4340_v50 = vor.u32 %v5302_v27, %v4337_v63  ;;  %v5182_v27 = vld [vmem:[#allocation7 + $0x20c] sm:$0xf] }
 0x16f   :  { %3022 = vmatpush.bf16.msra.mxu2 %v4480_v7  ;;  %v3956_v7 = vor.u32 %v5206_v41, %v3953_v52  ;;  %v4724_v44 = vor.u32 %v5398_v3, %v4721_v34  ;;  %v3908_v41 = vor.u32 %v5194_v43, %v3905_v18  ;;  %v5057_v47 = vld [vmem:[#allocation7 + $0xb98] sm:$0xf0]  ;;  %v5374_v63 = vld [vmem:[#allocation7 + $0x80c] sm:$0xf] }
 0x170   :  { %3036 = vmatpush.bf16.msra.mxu3 %v4864_v21  ;;  %v4384_v21 = vor.u32 %v5320_v5, %v4383_v53  ;;  %v3857_v53 = vld [vmem:[#allocation7 + $0x238] sm:$0xf0]  ;;  %v5278_v5 = vld [vmem:[#allocation7 + $0x50c] sm:$0xf] }
 0x171   :  { %2995 = vmatpush.bf16.msra.mxu0 %v3664_v36  ;;  %v5290_v36 = vld [vmem:[#allocation7 + $0x56c] sm:$0xf]  ;;  %v4241_v52 = vld [vmem:[#allocation7 + $0x538] sm:$0xf0]  ;;  %v3860_v18 = vor.u32 %v5182_v27, %v3857_v53 }
 0x172   :  { %3009 = vmatpush.bf16.msra.mxu1 %v4048_v60  ;;  %v4673_v60 = vld [vmem:[#allocation7 + $0x898] sm:$0xf0]  ;;  %v4292_v62 = vor.u32 %v5290_v36, %v4289_v32  ;;  %v4244_v34 = vor.u32 %v5278_v5, %v4241_v52  ;;  %v5362_v29 = vld [vmem:[#allocation7 + $0x7ac] sm:$0xf] }
 0x173   :  { %3023 = vmatpush.bf16.msra.mxu2 %v4432_v51  ;;  %v4676_v51 = vor.u32 %v5386_v46, %v4673_v60  ;;  %v4625_v3 = vld [vmem:[#allocation7 + $0x838] sm:$0xf0]  ;;  %v5458_v43 = vld [vmem:[#allocation7 + $0xaac] sm:$0xf] }
 0x174   :  { %3037 = vmatpush.bf16.msra.mxu3 %v4816_v6  ;;  %v5060_v6 = vor.u32 %v5482_v39, %v5057_v47  ;;  %v3809_v46 = vld [vmem:[#allocation7 + $0x1d8] sm:$0xf0]  ;;  %v4628_v15 = vor.u32 %v5374_v63, %v4625_v3  ;;  %v5158_v32 = vld [vmem:[#allocation7 + $0x14c] sm:$0xf] }
 0x175   :  { %2996 = vmatpush.bf16.msra.mxu0 %v3616_v17  ;;  %v5009_v17 = vld [vmem:[#allocation7 + $0xb38] sm:$0xf0]  ;;  %v2774_v47 = vpop.f32.mrf.mxu0 }
 0x176   :  { %3010 = vmatpush.bf16.msra.mxu1 %v4000_v19  ;;  %v5266_v19 = vld [vmem:[#allocation7 + $0x4ac] sm:$0xf]  ;;  %v5012_v23 = vor.u32 %v5470_v4, %v5009_v17  ;;  %v4145_v39 = vld [vmem:[#allocation7 + $0x478] sm:$0xf0]  ;;  %v2788_v52 = vpop.f32.mrf.mxu1 }
 0x177   :  { %3024 = vmatpush.bf16.msra.mxu2 %v4384_v21  ;;  %v4577_v21 = vld [vmem:[#allocation7 + $0x7d8] sm:$0xf0]  ;;  %v5446_v4 = vld [vmem:[#allocation7 + $0xa4c] sm:$0xf] }
 0x178   :  { %3038 = vmatpush.bf16.msra.mxu3 %v4768_v1  ;;  %2997 = vmatmul.bf16.vlgmr.msra.gmra.mxu0 %v5773_v16  ;;  %v491_v1 = vperm.slane %v5873_v24, 6  ;;  %v4580_v60 = vor.u32 %v5362_v29, %v4577_v21  ;;  %v4529_v5 = vld [vmem:[#allocation7 + $0x778] sm:$0xf0]  ;;  %v5338_v29 = vld [vmem:[#allocation7 + $0x6ec] sm:$0xf] }
 0x179   :  { %3045 = vmatpush.bf16.msrb.mxu0 %v3956_v7  ;;  %3011 = vmatmul.bf16.vlgmr.msra.gmra.mxu1 %v5779_v33  ;;  %v4193_v7 = vld [vmem:[#allocation7 + $0x4d8] sm:$0xf0] }
 0x17a   :  { %3059 = vmatpush.bf16.msrb.mxu1 %v4340_v50  ;;  %3025 = vmatmul.bf16.vlgmr.msra.gmra.mxu2 %v5771_v9  ;;  %v3812_v50 = vor.u32 %v5170_v12, %v3809_v46  ;;  %v4196_v36 = vor.u32 %v5266_v19, %v4193_v7  ;;  %v4913_v17 = vld [vmem:[#allocation7 + $0xa78] sm:$0xf0]  ;;  %v5146_v12 = vld [vmem:[#allocation7 + $0xec] sm:$0xf] }
 0x17b   :  { %3073 = vmatpush.bf16.msrb.mxu2 %v4724_v44  ;;  %3039 = vmatmul.bf16.vlgmr.msra.gmra.mxu3 %v5776_v20  ;;  %v4961_v44 = vld [vmem:[#allocation7 + $0xad8] sm:$0xf0] }
 0x17c   :  { %3087 = vmatpush.bf16.msrb.mxu3 %v5108_v38  ;;  %v3761_v38 = vld [vmem:[#allocation7 + $0x178] sm:$0xf0]  ;;  %v4964_v53 = vor.u32 %v5458_v43, %v4961_v44 }
 0x17d   :  { %3046 = vmatpush.bf16.msrb.mxu0 %v3908_v41  ;;  %v5254_v41 = vld [vmem:[#allocation7 + $0x44c] sm:$0xf]  ;;  %v3764_v3 = vor.u32 %v5158_v32, %v3761_v38  ;;  %v3713_v46 = vld [vmem:[#allocation7 + $0x118] sm:$0xf0] }
 0x17e   :  { %3060 = vmatpush.bf16.msrb.mxu1 %v4292_v62  ;;  %v6080_v62 = vperm.slane %v5873_v24, 4  ;;  %v4097_v19 = vld [vmem:[#allocation7 + $0x418] sm:$0xf0]  ;;  %v3716_v44 = vor.u32 %v5146_v12, %v3713_v46  ;;  %v2816_v38 = vpop.f32.mrf.mxu3  ;;  %v5122_v46 = vld [vmem:[#allocation7 + $0x2c] sm:$0xf] }
 0x17f   :  { %3074 = vmatpush.bf16.msrb.mxu2 %v4676_v51  ;;  %v5350_v51 = vld [vmem:[#allocation7 + $0x74c] sm:$0xf]  ;;  %v4481_v21 = vld [vmem:[#allocation7 + $0x718] sm:$0xf0] }
 0x180   :  { %3088 = vmatpush.bf16.msrb.mxu3 %v5060_v6  ;;  %v2663_v27 = vadd.f32 %v5869_v57, %v6080_v62  ;;  %v6081_v6 = vperm.slane %v5873_v24, 5  ;;  %v4532_v57 = vor.u32 %v5350_v51, %v4529_v5  ;;  %v4865_v32 = vld [vmem:[#allocation7 + $0xa18] sm:$0xf0] }
 0x181   :  { %3047 = vmatpush.bf16.msrb.mxu0 %v3860_v18  ;;  %v2775_v18 = vadd.f32 %v2774_v47, %v491_v1  ;;  %v4484_v47 = vor.u32 %v5338_v29, %v4481_v21  ;;  %v4049_v62 = vld [vmem:[#allocation7 + $0x3b8] sm:$0xf0] }
 0x182   :  { %3061 = vmatpush.bf16.msrb.mxu1 %v4244_v34  ;;  %v2719_v63 = vadd.f32 %v5888_v13, %v6081_v6  ;;  %v4148_v34 = vor.u32 %v5254_v41, %v4145_v39  ;;  %v2677_v7 = vadd.f32 %v5871_v2, %v2663_v27  ;;  %v2802_v13 = vpop.f32.mrf.mxu2  ;;  %v5134_v41 = vld [vmem:[#allocation7 + $0x8c] sm:$0xf]  ;;  %v3665_v39 = vld [vmem:[#allocation7 + $0xb8] sm:$0xf0]  ;;  %v2776_v27 = vpop.f32.mrf.mxu0 }
 0x183   :  { %3075 = vmatpush.bf16.msrb.mxu2 %v4628_v15  ;;  %v5242_v15 = vld [vmem:[#allocation7 + $0x3ec] sm:$0xf]  ;;  %v2789_v43 = vadd.f32 %v2788_v52, %v2775_v18  ;;  %v4433_v5 = vld [vmem:[#allocation7 + $0x6b8] sm:$0xf0]  ;;  %v2777_v52 = vadd.f32 %v2776_v27, %v491_v1  ;;  %v2790_v6 = vpop.f32.mrf.mxu1  ;;  %v3668_v18 = vor.u32 %v5134_v41, %v3665_v39 }
 0x184   :  { %3089 = vmatpush.bf16.msrb.mxu3 %v5012_v23  ;;  %v4916_v23 = vor.u32 %v5446_v4, %v4913_v17  ;;  %v5230_v2 = vld [vmem:[#allocation7 + $0x38c] sm:$0xf]  ;;  %v4817_v17 = vld [vmem:[#allocation7 + $0x9b8] sm:$0xf0] }
 0x185   :  { %3048 = vmatpush.bf16.msrb.mxu0 %v3812_v50  ;;  %v2733_v50 = vadd.f32 %v5890_v59, %v2719_v63  ;;  %v5326_v59 = vld [vmem:[#allocation7 + $0x68c] sm:$0xf]  ;;  %v2791_v12 = vadd.f32 %v2790_v6, %v2777_v52 }
 0x186   :  { %3062 = vmatpush.bf16.msrb.mxu1 %v4196_v36  ;;  %v5434_v36 = vld [vmem:[#allocation7 + $0x9ec] sm:$0xf] }
 0x187   :  { %3076 = vmatpush.bf16.msrb.mxu2 %v4580_v60  ;;  %v4100_v60 = vor.u32 %v5242_v15, %v4097_v19  ;;  %v4868_v51 = vor.u32 %v5434_v36, %v4865_v32  ;;  %v2747_v63 = vadd.f32 %v5893_v49, %v2733_v50  ;;  %v5422_v4 = vld [vmem:[#allocation7 + $0x98c] sm:$0xf]  ;;  %v4001_v19 = vld [vmem:[#allocation7 + $0x358] sm:$0xf0]  ;;  %v2818_v32 = vpop.f32.mrf.mxu3 }
 0x188   :  { %3090 = vmatpush.bf16.msrb.mxu3 %v4964_v53  ;;  %v2691_v53 = vadd.f32 %v5876_v28, %v2677_v7  ;;  %v4436_v28 = vor.u32 %v5326_v59, %v4433_v5  ;;  %v5218_v15 = vld [vmem:[#allocation7 + $0x32c] sm:$0xf]  ;;  %v4820_v1 = vor.u32 %v5422_v4, %v4817_v17  ;;  %v4385_v49 = vld [vmem:[#allocation7 + $0x658] sm:$0xf0]  ;;  %v3101_v59 = vpack.c.bf16 %v5804_v48, %v5804_v48 }
 0x189   :  { %3049 = vmatpush.bf16.msrb.mxu0 %v3764_v3  ;;  %v2803_v3 = vadd.f32 %v2802_v13, %v2789_v43  ;;  %v2761_v21 = vadd.f32 %v5895_v55, %v2747_v63  ;;  %v4769_v36 = vld [vmem:[#allocation7 + $0x958] sm:$0xf0]  ;;  %v492_v55 = vperm.slane %v5873_v24, 7  ;;  %v3116_v5 = vpack.c.bf16 %v5821_v14, %v5821_v14 }
 0x18a   :  { %3063 = vmatpush.bf16.msrb.mxu1 %v4148_v34  ;;  %v4052_v34 = vor.u32 %v5230_v2, %v4049_v62  ;;  %v2705_v7 = vadd.f32 %v5878_v35, %v2691_v53  ;;  %v2804_v29 = vpop.f32.mrf.mxu2 }
 0x18b   :  { %3077 = vmatpush.bf16.msrb.mxu2 %v4532_v57  ;;  %v3617_v57 = vld [vmem:[#allocation7 + $0x58] sm:$0xf0]  ;;  %v2817_v13 = vadd.f32 %v2816_v38, %v2803_v3  ;;  %v2805_v43 = vadd.f32 %v2804_v29, %v2791_v12  ;;  %v3117_v2 = vpack.c.bf16 %v2761_v21, %v2761_v21 }
 0x18c   :  { %3091 = vmatpush.bf16.msrb.mxu3 %v4916_v23  ;;  %v5314_v23 = vld [vmem:[#allocation7 + $0x62c] sm:$0xf]  ;;  %v3620_v50 = vor.u32 %v5122_v46, %v3617_v57  ;;  %v3102_v35 = vpack.c.bf16 %v2705_v7, %v2705_v7 }
 0x18d   :  { %3050 = vmatpush.bf16.msrb.mxu0 %v3716_v44  ;;  %v5410_v44 = vld [vmem:[#allocation7 + $0x92c] sm:$0xf]  ;;  %v4388_v41 = vor.u32 %v5314_v23, %v4385_v49  ;;  %v5918_v39 = vadd.f32 %v2818_v32, %v2805_v43  ;;  %v3132_v62 = vpack.c.bf16 %v2817_v13, %v2817_v13 }
 0x18e   :  { %3064 = vmatpush.bf16.msrb.mxu1 %v4100_v60  ;;  %v4004_v60 = vor.u32 %v5218_v15, %v4001_v19 }
 0x18f   :  { %3078 = vmatpush.bf16.msrb.mxu2 %v4484_v47  ;;  %v4772_v47 = vor.u32 %v5410_v44, %v4769_v36 }
 0x190   :  { %3092 = vmatpush.bf16.msrb.mxu3 %v4868_v51 }
 0x191   :  { %3051 = vmatpush.bf16.msrb.mxu0 %v3668_v18 }
 0x192   :  { %3065 = vmatpush.bf16.msrb.mxu1 %v4052_v34  ;;  %v3146_v34 = vpack.c.bf16 %v5855_v56, %v5855_v56  ;;  %v3319_v56 = vpack.c.bf16 %v5882_v61, %v5882_v61 }
 0x193   :  { %3079 = vmatpush.bf16.msrb.mxu2 %v4436_v28 }
 0x194   :  { %3093 = vmatpush.bf16.msrb.mxu3 %v4820_v1 }
 0x195   :  { %3052 = vmatpush.bf16.msrb.mxu0 %v3620_v50  ;;  %v2830_v38 = vpop.f32.mrf.mxu0 }
 0x196   :  { %3066 = vmatpush.bf16.msrb.mxu1 %v4004_v60  ;;  %v2844_v27 = vpop.f32.mrf.mxu1  ;;  %v2831_v53 = vadd.f32 %v2830_v38, %v492_v55 }
 0x197   :  { %3080 = vmatpush.bf16.msrb.mxu2 %v4388_v41 }
 0x198   :  { %3094 = vmatpush.bf16.msrb.mxu3 %v4772_v47  ;;  %3053 = vmatmul.bf16.vlgmr.msrb.gmra.mxu0 %v5773_v16  ;;  %v2845_v51 = vadd.f32 %v2844_v27, %v2831_v53 }
 0x199   :  { %3110 = vmatpush.bf16.xpose.msra.mxu0 %v3102_v35  ;;  %3067 = vmatmul.bf16.vlgmr.msrb.gmra.mxu1 %v5779_v33  ;;  %v3131_v33 = vpack.c.bf16 %v5838_v26, %v5838_v26  ;;  %v5935_v26 = vld [vmem:[#allocation8 + $0x8] sm:$0xf] }
 0x19a   :  { %3125 = vmatpush.bf16.xpose.msra.mxu1 %v3117_v2  ;;  %3081 = vmatmul.bf16.vlgmr.msrb.gmra.mxu2 %v5771_v9  ;;  %v493_v12 = vperm.slane %v5935_v26, 0  ;;  %v494_v41 = vperm.slane %v5935_v26, 1 }
 0x19b   :  { %3140 = vmatpush.bf16.xpose.msra.mxu2 %v3132_v62  ;;  %3095 = vmatmul.bf16.vlgmr.msrb.gmra.mxu3 %v5776_v20 }
 0x19d   :  { %v2858_v16 = vpop.f32.mrf.mxu2  ;;  %v2832_v20 = vpop.f32.mrf.mxu0 }
 0x19e   :  { %v2872_v52 = vpop.f32.mrf.mxu3  ;;  %v2859_v9 = vadd.f32 %v2858_v16, %v2845_v51  ;;  %v2833_v24 = vadd.f32 %v2832_v20, %v492_v55  ;;  %v2846_v63 = vpop.f32.mrf.mxu1 }
 0x1a0   :  { %v2873_v6 = vadd.f32 %v2872_v52, %v2859_v9  ;;  %v2847_v3 = vadd.f32 %v2846_v63, %v2833_v24  ;;  %v3334_v52 = vpack.c.bf16 %v5899_v42, %v5899_v42  ;;  %v495_v63 = vperm.slane %v5935_v26, 2 }
 0x1a2   :  { %v3147_v18 = vpack.c.bf16 %v2873_v6, %v2873_v6 }
 0x1a4   :  { %3155 = vmatpush.bf16.xpose.msra.mxu3 %v3147_v18 }
 0x1a5   :  { %v2860_v48 = vpop.f32.mrf.mxu2 }
 0x1a6   :  { %v2861_v4 = vadd.f32 %v2860_v48, %v2847_v3  ;;  %v2874_v17 = vpop.f32.mrf.mxu3 }
 0x1a8   :  { %3111 = vmatmul.bf16.vlgmr.msra.gmra.mxu0 %v3101_v59  ;;  %v5931_v14 = vadd.f32 %v2874_v17, %v2861_v4 }
 0x1a9   :  { %3126 = vmatmul.bf16.vlgmr.msra.gmra.mxu1 %v3116_v5 }
 0x1aa   :  { %3141 = vmatmul.bf16.vlgmr.msra.gmra.mxu2 %v3131_v33 }
 0x1ab   :  { %3156 = vmatmul.bf16.vlgmr.msra.gmra.mxu3 %v3146_v34 }
 0x1b5   :  { %v2886_v46 = vpop.f32.mrf.mxu0 }
 0x1b6   :  { %v2887_v57 = vadd.f32 %v2886_v46, %v493_v12  ;;  %v2900_v28 = vpop.f32.mrf.mxu1 }
 0x1b8   :  { %v2901_v15 = vadd.f32 %v2900_v28, %v2887_v57 }
 0x1bd   :  { %v2914_v19 = vpop.f32.mrf.mxu2  ;;  %v2888_v1 = vpop.f32.mrf.mxu0 }
 0x1be   :  { %v2915_v7 = vadd.f32 %v2914_v19, %v2901_v15  ;;  %v2889_v23 = vadd.f32 %v2888_v1, %v493_v12  ;;  %v2928_v49 = vpop.f32.mrf.mxu3  ;;  %v2902_v29 = vpop.f32.mrf.mxu1 }
 0x1c0   :  { %v2929_v21 = vadd.f32 %v2928_v49, %v2915_v7  ;;  %v2903_v13 = vadd.f32 %v2902_v29, %v2889_v23  ;;  %v3349_v7 = vpack.c.bf16 %v5918_v39, %v5918_v39 }
 0x1c2   :  { %v3220_v50 = vpack.c.bf16 %v2929_v21, %v2929_v21 }
 0x1c4   :  { %v3226_v43 = vsel %vm3224_vm0, %v3220_v50, 0 }
 0x1c5   :  { %v2916_v44 = vpop.f32.mrf.mxu2  ;;  %3235 = vmatpush.bf16.msrb.mxu0 %v3226_v43 }
 0x1c6   :  { %v2917_v36 = vadd.f32 %v2916_v44, %v2903_v13  ;;  %v2930_v32 = vpop.f32.mrf.mxu3  ;;  %v496_v13 = vperm.slane %v5935_v26, 3  ;;  %v91_v44 = vld [vmem:[#allocation5] sm:$0x1]  ;;  %v3364_v26 = vpack.c.bf16 %v5931_v14, %v5931_v14 }
 0x1c7   :  { %vm3165_vm1 = vcmp.eq.f32.partialorder %v91_v44, 0.0 }
 0x1c8   :  { %v5941_v60 = vadd.f32 %v2930_v32, %v2917_v36 }
 0x1c9   :  { %3327 = vmatpush.bf16.xpose.msra.mxu0 %v3319_v56 }
 0x1d5   :  { %v2942_v35 = vpop.f32.mrf.mxu0 }
 0x1d6   :  { %v2943_v47 = vadd.f32 %v2942_v35, %v494_v41  ;;  %v2956_v2 = vpop.f32.mrf.mxu1 }
 0x1d8   :  { %v2957_v62 = vadd.f32 %v2956_v2, %v2943_v47 }
 0x1dd   :  { %v2970_v55 = vpop.f32.mrf.mxu2  ;;  %v2944_v27 = vpop.f32.mrf.mxu0 }
 0x1de   :  { %v2971_v38 = vadd.f32 %v2970_v55, %v2957_v62  ;;  %v2984_v53 = vpop.f32.mrf.mxu3  ;;  %v2945_v61 = vadd.f32 %v2944_v27, %v494_v41  ;;  %v2958_v59 = vpop.f32.mrf.mxu1  ;;  %v5721_v62 = vmov 0  }
 0x1df   :  { %v3166_v55 = vsel %vm3165_vm1, 1, %v5721_v62 }
 0x1e0   :  { %v2985_v51 = vadd.f32 %v2984_v53, %v2971_v38  ;;  %v2959_v5 = vadd.f32 %v2958_v59, %v2945_v61  ;;  %v3167_v53 = vperm.slane %v3166_v55, 0 }
 0x1e2   :  { %v3246_v16 = vpack.c.bf16 %v2985_v51, %v2985_v51  ;;  %vm5960_vm2 = vcmp.eq.s32.totalorder %v3167_v53, 1 }
 0x1e4   :  { %v3251_v33 = vsel %vm3224_vm0, %v3246_v16, 0 }
 0x1e5   :  { %3260 = vmatpush.bf16.msrb.mxu1 %v3251_v33  ;;  %v2972_v9 = vpop.f32.mrf.mxu2 }
 0x1e6   :  { %v2973_v20 = vadd.f32 %v2972_v9, %v2959_v5  ;;  %v2986_v24 = vpop.f32.mrf.mxu3 }
 0x1e8   :  { %v5947_v6 = vadd.f32 %v2986_v24, %v2973_v20 }
 0x1e9   :  { %3342 = vmatpush.bf16.xpose.msra.mxu1 %v3334_v52 }
 0x1f5   :  { %v2998_v3 = vpop.f32.mrf.mxu0 }
 0x1f6   :  { %v2999_v18 = vadd.f32 %v2998_v3, %v495_v63  ;;  %v3012_v48 = vpop.f32.mrf.mxu1 }
 0x1f8   :  { %v3013_v4 = vadd.f32 %v3012_v48, %v2999_v18 }
 0x1fd   :  { %v3026_v17 = vpop.f32.mrf.mxu2  ;;  %v3000_v46 = vpop.f32.mrf.mxu0 }
 0x1fe   :  { %v3027_v34 = vadd.f32 %v3026_v17, %v3013_v4  ;;  %v3040_v12 = vpop.f32.mrf.mxu3  ;;  %v3001_v42 = vadd.f32 %v3000_v46, %v495_v63  ;;  %v3014_v28 = vpop.f32.mrf.mxu1 }
 0x200   :  { %v3041_v57 = vadd.f32 %v3040_v12, %v3027_v34  ;;  %v3015_v19 = vadd.f32 %v3014_v28, %v3001_v42 }
 0x202   :  { %v3271_v15 = vpack.c.bf16 %v3041_v57, %v3041_v57 }
 0x204   :  { %v3276_v1 = vsel %vm3224_vm0, %v3271_v15, 0 }
 0x205   :  { %3285 = vmatpush.bf16.msrb.mxu2 %v3276_v1  ;;  %v3028_v23 = vpop.f32.mrf.mxu2 }
 0x206   :  { %v3029_v49 = vadd.f32 %v3028_v23, %v3015_v19  ;;  %v3042_v29 = vpop.f32.mrf.mxu3 }
 0x208   :  { %v5953_v21 = vadd.f32 %v3042_v29, %v3029_v49 }
 0x209   :  { %3357 = vmatpush.bf16.xpose.msra.mxu2 %v3349_v7 }
 0x215   :  { %v3054_v50 = vpop.f32.mrf.mxu0 }
 0x216   :  { %v3055_v56 = vadd.f32 %v3054_v50, %v496_v13  ;;  %v3068_v43 = vpop.f32.mrf.mxu1 }
 0x218   :  { %v3069_v36 = vadd.f32 %v3068_v43, %v3055_v56 }
 0x21d   :  { %v3082_v32 = vpop.f32.mrf.mxu2  ;;  %v3056_v41 = vpop.f32.mrf.mxu0 }
 0x21e   :  { %v3083_v39 = vadd.f32 %v3082_v32, %v3069_v36  ;;  %v3057_v35 = vadd.f32 %v3056_v41, %v496_v13  ;;  %v3070_v47 = vpop.f32.mrf.mxu1  ;;  %v3096_v2 = vpop.f32.mrf.mxu3 }
 0x220   :  { %v3071_v38 = vadd.f32 %v3070_v47, %v3057_v35  ;;  %v3097_v27 = vadd.f32 %v3096_v2, %v3083_v39 }
 0x222   :  { %v3296_v61 = vpack.c.bf16 %v3097_v27, %v3097_v27 }
 0x224   :  { %v3301_v51 = vsel %vm3224_vm0, %v3296_v61, 0 }
 0x225   :  { %v3084_v59 = vpop.f32.mrf.mxu2  ;;  %3310 = vmatpush.bf16.msrb.mxu3 %v3301_v51  ;;  %v3112_v5 = vpop.f32.mrf.mxu0 }
 0x226   :  { %v3085_v52 = vadd.f32 %v3084_v59, %v3071_v38  ;;  %v3161_v33 = vmul.f32 0.088388346, %v3112_v5  ;;  %v3127_v9 = vpop.f32.mrf.mxu1  ;;  %v3098_v20 = vpop.f32.mrf.mxu3  ;;  %v3437_v59 = vpack.c.bf16 %v5941_v60, %v5941_v60 }
 0x227   :  { %v3162_v3 = vmul.f32 0.088388346, %v3127_v9 }
 0x228   :  { %v3169_v24 = vsel %vm5960_vm2, -1e+09, %v3161_v33  ;;  %v5966_v63 = vadd.f32 %v3098_v20, %v3085_v52  ;;  %v6084_v33 = vperm.slane %v5799_v54, 0 }
 0x229   :  { %3372 = vmatpush.bf16.xpose.msra.mxu3 %v3364_v26  ;;  %v3174_v14 = vsel %vm3173_vm3, %v3169_v24, -inf  ;;  %v3170_v34 = vsel %vm5960_vm2, -1e+09, %v3162_v3 }
 0x22a   :  { %3175 = vmax.xlane.f32.xlu1 %v3174_v14  ;;  %v3177_v42 = vsel %vm3173_vm3, %v3170_v34, -inf  ;;  %v2441_v9 = vadd.f32 %v5806_v10, %v6084_v33  ;;  %v3462_v10 = vpack.c.bf16 %v5947_v6, %v5947_v6 }
 0x22c   :  { %v2455_v14 = vadd.f32 %v5808_v22, %v2441_v9  ;;  %v6086_v22 = vperm.slane %v5799_v54, 1 }
 0x22d   :  { %v3142_v18 = vpop.f32.mrf.mxu2  ;;  %v3114_v48 = vpop.f32.mrf.mxu0 }
 0x22e   :  { %v3163_v4 = vmul.f32 0.088388346, %v3142_v18  ;;  %v3129_v17 = vpop.f32.mrf.mxu1  ;;  %v3157_v28 = vpop.f32.mrf.mxu3  ;;  %v3487_v18 = vpack.c.bf16 %v5953_v21, %v5953_v21 }
 0x22f   :  { %v3164_v15 = vmul.f32 0.088388346, %v3157_v28  ;;  %v2469_v17 = vadd.f32 %v5814_v31, %v2455_v14  ;;  %v3467_v31 = vsel %vm3224_vm0, %v3462_v10, 0 }
 0x230   :  { %v3171_v12 = vsel %vm5960_vm2, -1e+09, %v3163_v4  ;;  %v3492_v6 = vsel %vm3224_vm0, %v3487_v18, 0 }
 0x231   :  { %v3180_v46 = vsel %vm3173_vm3, %v3171_v12, -inf  ;;  %v3172_v19 = vsel %vm5960_vm2, -1e+09, %v3164_v15 }
 0x232   :  { %3181 = vmax.xlane.f32.xlu0 %v3180_v46  ;;  %3178 = vmax.xlane.f32.xlu1 %v3177_v42  ;;  %v3183_v7 = vsel %vm3173_vm3, %v3172_v19, -inf  ;;  %v2497_v42 = vadd.f32 %v5823_v11, %v6086_v22 }
 0x234   :  { %v2511_v11 = vadd.f32 %v5826_v25, %v2497_v42 }
 0x235   :  { %v3144_v57 = vpop.f32.mrf.mxu2 }
 0x236   :  { %v3159_v1 = vpop.f32.mrf.mxu3 }
 0x237   :  { %v2525_v1 = vadd.f32 %v5831_v37, %v2511_v11  ;;  %v6089_v37 = vld [vmem:[#allocation19_spill] sm:$0xff] }
 0x23a   :  { %3184 = vmax.xlane.f32.xlu0 %v3183_v7 }
 0x29d   :  { %v3176_v23 = vpop.xlane.xlu1 %3175 }
 0x29e   :  { %v3186_v49 = vsub.f32 %v3169_v24, %v3176_v23  ;;  %v3442_v24 = vsel %vm3224_vm0, %v3437_v59, 0  ;;  %v3512_v23 = vpack.c.bf16 %v5966_v63, %v5966_v63 }
 0x2a0   :  { %v3190_v29 = vmul.f32 1.442695, %v3186_v49 }
 0x2a2   :  { %5516 = vpow2.f32 %v3190_v29  ;;  %v6087_v29 = vperm.slane %v5799_v54, 3 }
 0x2a5   :  { %v3182_v13 = vpop.xlane.xlu0 %3181  ;;  %v3179_v50 = vpop.xlane.xlu1 %3178 }
 0x2a6   :  { %v3188_v56 = vsub.f32 %v3171_v12, %v3182_v13  ;;  %v3187_v43 = vsub.f32 %v3170_v34, %v3179_v50  ;;  %v6085_v34 = vperm.slane %v5799_v54, 2  ;;  %v6088_v13 = vld [vmem:[#allocation18_spill] sm:$0xff]  ;;  %v6090_v54 = vld [vmem:[#allocation20_spill] sm:$0xff] }
 0x2a7   :  { %v2539_v50 = vadd.f32 %v6088_v13, %v2525_v1 }
 0x2a8   :  { %v5517_v44 = vpop.eup %5516  ;;  %v3194_v36 = vmul.f32 1.442695, %v3188_v56  ;;  %v3192_v32 = vmul.f32 1.442695, %v3187_v43  ;;  %v2553_v12 = vadd.f32 %v5840_v30, %v6085_v34  ;;  %v2483_v30 = vadd.f32 %v5817_v40, %v2469_v17 }
 0x2a9   :  { %v3198_v41 = vsel %vm3173_vm3, %v5517_v44, 0.0  ;;  %v2609_v40 = vadd.f32 %v5857_v8, %v6087_v29  ;;  %v3333_v43 = vpack.c.bf16 %v2539_v50, %v2539_v50  ;;  %v6091_v8 = vld [vmem:[#allocation21_spill] sm:$0xff] }
 0x2aa   :  { %5518 = vpow2.f32 %v3194_v36  ;;  %3199 = vadd.xlane.f32.xlu0 %v3198_v41  ;;  %v2567_v28 = vadd.f32 %v5844_v45, %v2553_v12  ;;  %v5549_v41 = vld [vmem:[#allocation2] sm:$0xff] }
 0x2ab   :  { %5520 = vpow2.f32 %v3192_v32  ;;  %v2623_v63 = vadd.f32 %v6089_v37, %v2609_v40 }
 0x2ac   :  { %v2581_v7 = vadd.f32 %v5848_v58, %v2567_v28  ;;  %v3517_v58 = vsel %vm3224_vm0, %v3512_v23, 0 }
 0x2ad   :  { %v3185_v35 = vpop.xlane.xlu0 %3184 }
 0x2ae   :  { %v3189_v55 = vsub.f32 %v3172_v19, %v3185_v35  ;;  %v3318_v19 = vpack.c.bf16 %v2483_v30, %v2483_v30  ;;  %v2595_v25 = vadd.f32 %v5851_v0, %v2581_v7  ;;  %v92_v35 = vld [vmem:[#allocation5 + $0x1] sm:$0x1] }
 0x2af   :  { %vm3382_vm4 = vcmp.eq.f32.partialorder %v92_v35, 0.0 }
 0x2b0   :  { %v5519_v39 = vpop.eup %5518  ;;  %v3196_v27 = vmul.f32 1.442695, %v3189_v55  ;;  %v3348_v56 = vpack.c.bf16 %v2595_v25, %v2595_v25  ;;  %v3383_v55 = vsel %vm3382_vm4, 1, %v5721_v62 }
 0x2b1   :  { %v5521_v47 = vpop.eup %5520  ;;  %v3204_v2 = vsel %vm3173_vm3, %v5519_v39, 0.0 }
 0x2b2   :  { %3205 = vadd.xlane.f32.xlu2 %v3204_v2  ;;  %v3201_v38 = vsel %vm3173_vm3, %v5521_v47, 0.0  ;;  %5522 = vpow2.f32 %v3196_v27 }
 0x2b3   :  { %3202 = vadd.xlane.f32.xlu1 %v3201_v38  ;;  %v5550_v38 = vld [vmem:[#allocation2 + $0x8] sm:$0xff] }
 0x2b8   :  { %v5523_v53 = vpop.eup %5522 }
 0x2b9   :  { %v3207_v61 = vsel %vm3173_vm3, %v5523_v53, 0.0 }
 0x2ba   :  { %3208 = vadd.xlane.f32.xlu2 %v3207_v61 }
 0x31d   :  { %v3200_v26 = vpop.xlane.xlu0 %3199 }
 0x31e   :  { %5524 = vrcp.f32 %v3200_v26  ;;  %v5551_v26 = vld [vmem:[#allocation2 + $0x10] sm:$0xff] }
 0x324   :  { %v5525_v51 = vpop.eup %5524 }
 0x325   :  { %v3214_v5 = vmul.f32 %v5525_v51, %v5517_v44  ;;  %v3206_v16 = vpop.xlane.xlu2 %3205  ;;  %v2637_v44 = vadd.f32 %v6090_v54, %v2623_v63 }
 0x326   :  { %5526 = vrcp.f32 %v3206_v16  ;;  %v3203_v52 = vpop.xlane.xlu1 %3202 }
 0x327   :  { %3218 = vst.msk [vmem:[#allocation11] sm:$0xff] %vm3173_vm3, %v3214_v5  ;;  %v3219_v20 = vpack.c.bf16 %v3214_v5, %v3214_v5  ;;  %5528 = vrcp.f32 %v3203_v52  ;;  %v2651_v36 = vadd.f32 %v6091_v8, %v2637_v44 }
 0x329   :  { %5109 = vmatmul.msk.bf16.vlgmr.msrb.gmra.mxu0 %vm3173_vm3, %v3219_v20  ;;  %v3363_v32 = vpack.c.bf16 %v2651_v36, %v2651_v36 }
 0x32a   :  { %3451 = vmatpush.bf16.msrb.mxu0 %v3442_v24 }
 0x32c   :  { %v5527_v60 = vpop.eup %5526 }
 0x32d   :  { %v5529_v3 = vpop.eup %5528  ;;  %v3216_v48 = vmul.f32 %v5527_v60, %v5519_v39  ;;  %v3209_v57 = vpop.xlane.xlu2 %3208  ;;  %v5552_v60 = vld [vmem:[#allocation2 + $0x18] sm:$0xff] }
 0x32e   :  { %v3215_v4 = vmul.f32 %v5529_v3, %v5521_v47  ;;  %5530 = vrcp.f32 %v3209_v57 }
 0x32f   :  { %3269 = vst.msk [vmem:[#allocation11 + $0x10] sm:$0xff] %vm3173_vm3, %v3216_v48  ;;  %v3270_v46 = vpack.c.bf16 %v3216_v48, %v3216_v48 }
 0x330   :  { %3244 = vst.msk [vmem:[#allocation11 + $0x8] sm:$0xff] %vm3173_vm3, %v3215_v4  ;;  %v3245_v21 = vpack.c.bf16 %v3215_v4, %v3215_v4 }
 0x331   :  { %5111 = vmatmul.msk.bf16.vlgmr.msrb.gmra.mxu2 %vm3173_vm3, %v3270_v46 }
 0x332   :  { %3501 = vmatpush.bf16.msrb.mxu2 %v3492_v6  ;;  %5110 = vmatmul.msk.bf16.vlgmr.msrb.gmra.mxu1 %vm3173_vm3, %v3245_v21 }
 0x333   :  { %3476 = vmatpush.bf16.msrb.mxu1 %v3467_v31 }
 0x334   :  { %v5531_v15 = vpop.eup %5530 }
 0x335   :  { %v3217_v49 = vmul.f32 %v5531_v15, %v5523_v53  ;;  %v3384_v53 = vperm.slane %v3383_v55, 0 }
 0x337   :  { %3294 = vst.msk [vmem:[#allocation11 + $0x18] sm:$0xff] %vm3173_vm3, %v3217_v49  ;;  %v3295_v45 = vpack.c.bf16 %v3217_v49, %v3217_v49  ;;  %vm6027_vm5 = vcmp.eq.s32.totalorder %v3384_v53, 1 }
 0x339   :  { %3328 = vmatmul.bf16.vlgmr.msra.gmra.mxu0 %v3318_v19  ;;  %5112 = vmatmul.msk.bf16.vlgmr.msrb.gmra.mxu3 %vm3173_vm3, %v3295_v45 }
 0x33a   :  { %3526 = vmatpush.bf16.msrb.mxu3 %v3517_v58 }
 0x341   :  { %3358 = vmatmul.bf16.vlgmr.msra.gmra.mxu2 %v3348_v56 }
 0x342   :  { %3343 = vmatmul.bf16.vlgmr.msra.gmra.mxu1 %v3333_v43 }
 0x349   :  { %3373 = vmatmul.bf16.vlgmr.msra.gmra.mxu3 %v3363_v32 }
 0x3a6   :  { %v3237_v0 = vpop.f32.mrf.mxu0 }
 0x3a7   :  { %v3241_v39 = vadd.f32 %v5549_v41, %v3237_v0 }
 0x3a9   :  { %3242 = vst [vmem:[#allocation10] sm:$0xff] %v3241_v39 }
 0x3ae   :  { %v3239_v47 = vpop.f32.mrf.mxu0 }
 0x3af   :  { %v3262_v2 = vpop.f32.mrf.mxu1 }
 0x3b0   :  { %v3266_v27 = vadd.f32 %v5550_v38, %v3262_v2 }
 0x3b2   :  { %3267 = vst [vmem:[#allocation10 + $0x8] sm:$0xff] %v3266_v27 }
 0x3b4   :  { %v3287_v61 = vpop.f32.mrf.mxu2 }
 0x3b5   :  { %v3291_v51 = vadd.f32 %v5551_v26, %v3287_v61 }
 0x3b6   :  { %v3329_v59 = vpop.f32.mrf.mxu0 }
 0x3b7   :  { %3292 = vst [vmem:[#allocation10 + $0x10] sm:$0xff] %v3291_v51  ;;  %v3264_v16 = vpop.f32.mrf.mxu1  ;;  %v3378_v52 = vmul.f32 0.088388346, %v3329_v59  ;;  %v5553_v59 = vld [vmem:[#allocation2 + $0x20] sm:$0xff] }
 0x3b9   :  { %v3386_v33 = vsel %vm6027_vm5, -1e+09, %v3378_v52 }
 0x3ba   :  { %v3390_v62 = vsel %vm3173_vm3, %v3386_v33, -inf }
 0x3bb   :  { %3391 = vmax.xlane.f32.xlu1 %v3390_v62 }
 0x3bc   :  { %v3289_v9 = vpop.f32.mrf.mxu2  ;;  %v3312_v14 = vpop.f32.mrf.mxu3 }
 0x3bd   :  { %v3316_v3 = vadd.f32 %v5552_v60, %v3312_v14 }
 0x3be   :  { %v3331_v20 = vpop.f32.mrf.mxu0 }
 0x3bf   :  { %v3344_v24 = vpop.f32.mrf.mxu1  ;;  %3317 = vst [vmem:[#allocation10 + $0x18] sm:$0xff] %v3316_v3  ;;  %v5555_v20 = vld [vmem:[#allocation2 + $0x28] sm:$0xff] }
 0x3c0   :  { %v3379_v12 = vmul.f32 0.088388346, %v3344_v24 }
 0x3c2   :  { %v3387_v22 = vsel %vm6027_vm5, -1e+09, %v3379_v12 }
 0x3c3   :  { %v3393_v57 = vsel %vm3173_vm3, %v3387_v22, -inf }
 0x3c4   :  { %v3359_v18 = vpop.f32.mrf.mxu2  ;;  %v3314_v4 = vpop.f32.mrf.mxu3 }
 0x3c5   :  { %v3380_v48 = vmul.f32 0.088388346, %v3359_v18  ;;  %v5556_v18 = vld [vmem:[#allocation2 + $0x38] sm:$0xff] }
 0x3c7   :  { %v3346_v10 = vpop.f32.mrf.mxu1  ;;  %v3388_v17 = vsel %vm6027_vm5, -1e+09, %v3380_v48 }
 0x3c8   :  { %v3396_v34 = vsel %vm3173_vm3, %v3388_v17, -inf }
 0x3c9   :  { %3397 = vmax.xlane.f32.xlu2 %v3396_v34 }
 0x3cc   :  { %v3361_v46 = vpop.f32.mrf.mxu2  ;;  %v3374_v42 = vpop.f32.mrf.mxu3 }
 0x3cd   :  { %v3381_v21 = vmul.f32 0.088388346, %v3374_v42 }
 0x3cf   :  { %v3389_v6 = vsel %vm6027_vm5, -1e+09, %v3381_v21 }
 0x3d0   :  { %v3399_v31 = vsel %vm3173_vm3, %v3389_v6, -inf }
 0x3d1   :  { %3394 = vmax.xlane.f32.xlu2 %v3393_v57  ;;  %3400 = vmax.xlane.f32.xlu0 %v3399_v31 }
 0x3d4   :  { %v3376_v30 = vpop.f32.mrf.mxu3 }
 0x42e   :  { %v3392_v28 = vpop.xlane.xlu1 %3391 }
 0x42f   :  { %v3402_v11 = vsub.f32 %v3386_v33, %v3392_v28  ;;  %v5554_v33 = vld [vmem:[#allocation2 + $0x30] sm:$0xff] }
 0x431   :  { %v3406_v15 = vmul.f32 1.442695, %v3402_v11 }
 0x433   :  { %5532 = vpow2.f32 %v3406_v15 }
 0x439   :  { %v5533_v19 = vpop.eup %5532 }
 0x43a   :  { %v3414_v7 = vsel %vm3173_vm3, %v5533_v19, 0.0 }
 0x43b   :  { %3415 = vadd.xlane.f32.xlu2 %v3414_v7 }
 0x43c   :  { %v3398_v1 = vpop.xlane.xlu2 %3397 }
 0x43d   :  { %v3404_v23 = vsub.f32 %v3388_v17, %v3398_v1 }
 0x43f   :  { %v3410_v49 = vmul.f32 1.442695, %v3404_v23 }
 0x441   :  { %5534 = vpow2.f32 %v3410_v49 }
 0x444   :  { %v3395_v29 = vpop.xlane.xlu2 %3394  ;;  %v3401_v13 = vpop.xlane.xlu0 %3400 }
 0x445   :  { %v3403_v40 = vsub.f32 %v3387_v22, %v3395_v29  ;;  %v3405_v58 = vsub.f32 %v3389_v6, %v3401_v13 }
 0x447   :  { %v5535_v45 = vpop.eup %5534  ;;  %v3408_v25 = vmul.f32 1.442695, %v3403_v40  ;;  %v3412_v37 = vmul.f32 1.442695, %v3405_v58 }
 0x448   :  { %v3420_v50 = vsel %vm3173_vm3, %v5535_v45, 0.0 }
 0x449   :  { %5536 = vpow2.f32 %v3408_v25  ;;  %3421 = vadd.xlane.f32.xlu0 %v3420_v50 }
 0x44a   :  { %5538 = vpow2.f32 %v3412_v37 }
 0x44f   :  { %v5537_v63 = vpop.eup %5536 }
 0x450   :  { %v3417_v56 = vsel %vm3173_vm3, %v5537_v63, 0.0  ;;  %v5539_v43 = vpop.eup %5538 }
 0x451   :  { %3418 = vadd.xlane.f32.xlu0 %v3417_v56  ;;  %v3423_v54 = vsel %vm3173_vm3, %v5539_v43, 0.0 }
 0x452   :  { %3424 = vadd.xlane.f32.xlu1 %v3423_v54 }
 0x4ae   :  { %v3416_v44 = vpop.xlane.xlu2 %3415 }
 0x4af   :  { %5540 = vrcp.f32 %v3416_v44 }
 0x4b5   :  { %v5541_v8 = vpop.eup %5540 }
 0x4b6   :  { %v3430_v36 = vmul.f32 %v5541_v8, %v5533_v19 }
 0x4b8   :  { %3435 = vst.msk [vmem:[#allocation11 + $0x20] sm:$0xff] %vm3173_vm3, %v3430_v36  ;;  %v3436_v32 = vpack.c.bf16 %v3430_v36, %v3430_v36 }
 0x4ba   :  { %5113 = vmatmul.msk.bf16.vlgmr.msrb.gmra.mxu0 %vm3173_vm3, %v3436_v32 }
 0x4bc   :  { %v3422_v0 = vpop.xlane.xlu0 %3421 }
 0x4bd   :  { %5542 = vrcp.f32 %v3422_v0 }
 0x4c3   :  { %v5543_v41 = vpop.eup %5542 }
 0x4c4   :  { %v3432_v39 = vmul.f32 %v5543_v41, %v5535_v45  ;;  %v3419_v35 = vpop.xlane.xlu0 %3418 }
 0x4c5   :  { %5544 = vrcp.f32 %v3419_v35  ;;  %v3425_v2 = vpop.xlane.xlu1 %3424 }
 0x4c6   :  { %3485 = vst.msk [vmem:[#allocation11 + $0x30] sm:$0xff] %vm3173_vm3, %v3432_v39  ;;  %v3486_v47 = vpack.c.bf16 %v3432_v39, %v3432_v39  ;;  %5546 = vrcp.f32 %v3425_v2 }
 0x4c8   :  { %5115 = vmatmul.msk.bf16.vlgmr.msrb.gmra.mxu2 %vm3173_vm3, %v3486_v47 }
 0x4cb   :  { %v5545_v55 = vpop.eup %5544 }
 0x4cc   :  { %v3431_v38 = vmul.f32 %v5545_v55, %v5537_v63  ;;  %v5547_v27 = vpop.eup %5546 }
 0x4cd   :  { %v3433_v61 = vmul.f32 %v5547_v27, %v5539_v43 }
 0x4ce   :  { %3460 = vst.msk [vmem:[#allocation11 + $0x28] sm:$0xff] %vm3173_vm3, %v3431_v38  ;;  %v3461_v53 = vpack.c.bf16 %v3431_v38, %v3431_v38 }
 0x4cf   :  { %3510 = vst.msk [vmem:[#allocation11 + $0x38] sm:$0xff] %vm3173_vm3, %v3433_v61  ;;  %v3511_v26 = vpack.c.bf16 %v3433_v61, %v3433_v61 }
 0x4d0   :  { %5114 = vmatmul.msk.bf16.vlgmr.msrb.gmra.mxu1 %vm3173_vm3, %v3461_v53  ;;  %3559 = dma.vmem_to_hbm [thread:$0]  %s3552_s3, 1024, %s3554_s19, [#allocation12], %s5723_s20, %s5723_s20, %s5724_s21  }
 0x4d1   :  { %5116 = vmatmul.msk.bf16.vlgmr.msrb.gmra.mxu3 %vm3173_vm3, %v3511_v26 }
 0x537   :  { %v3453_v51 = vpop.f32.mrf.mxu0 }
 0x538   :  { %v3457_v5 = vadd.f32 %v5553_v59, %v3453_v51 }
 0x53a   :  { %3458 = vst [vmem:[#allocation10 + $0x20] sm:$0xff] %v3457_v5 }
 0x53f   :  { %v3455_v16 = vpop.f32.mrf.mxu0 }
 0x54b   :  { %v3503_v52 = vpop.f32.mrf.mxu2 }
 0x54c   :  { %v3507_v62 = vadd.f32 %v5554_v33, %v3503_v52 }
 0x54d   :  { %v3478_v9 = vpop.f32.mrf.mxu1 }
 0x54e   :  { %3508 = vst [vmem:[#allocation10 + $0x30] sm:$0xff] %v3507_v62  ;;  %v3482_v24 = vadd.f32 %v5555_v20, %v3478_v9 }
 0x550   :  { %3483 = vst [vmem:[#allocation10 + $0x28] sm:$0xff] %v3482_v24 }
 0x553   :  { %v3505_v14 = vpop.f32.mrf.mxu2 }
 0x554   :  { %v3528_v3 = vpop.f32.mrf.mxu3 }
 0x555   :  { %v3480_v60 = vpop.f32.mrf.mxu1  ;;  %v3532_v48 = vadd.f32 %v5556_v18, %v3528_v3 }
 0x557   :  { %3533 = vst [vmem:[#allocation10 + $0x38] sm:$0xff] %v3532_v48 }
 0x558   :  { %3546 = dma.vmem_to_hbm [thread:$0]  %s3539_s22, 1024, %s3541_s25, [#allocation4], %s5715_s30, %s5715_s30, %s5716_s6  }
 0x55c   :  { %v3530_v10 = vpop.f32.mrf.mxu3 }
 0x55d   :  { %5707 = dma.done.wait [#allocation4], 1024  }
 0x55e   :  { %5708 = vsyncadd [#allocation4], 4294966272 }
 0x55f   :  { %5709 = dma.done.wait [#allocation12], 1024  }
 0x560   :  { %5710 = vsyncadd [#allocation12], 4294966272 }
 0x561   :  { %3568 = vsyncpa [#allocation3], 1 }
 0x562   :  { %3569 = vsyncpa [#allocation6], 1 }
 0x563   :  { %3570 = vsyncpa [#allocation9], 1 }
 0x564   :  { %3571 = vsyncpa [#allocation4], 1 }
 0x565   :  { %3572 = vsyncpa [#allocation12], 1 }

</bundles_post_ra>
